<compile_context>
chip_gen: v7x
topology: tpu7x:2x2x1
jax: 0.10.0
libtpu: 0.0.40
codegen_flags: <defaults>
</compile_context>

<pallas_src>
from functools import partial

import jax
import jax.numpy as jnp
from jax import lax
from jax.experimental import pallas as pl
from jax.experimental.pallas import tpu as pltpu


def _elu(z):
    # ELU(alpha=1): z if z > 0 else exp(z) - 1
    return jnp.where(z > 0, z, jnp.exp(z) - 1.0)


def _make_kernel(H, L, C, Mblk):
    """Kernel closed over statics: H rows/image, L = W*C lanes per plane,
    C channels, Mblk = Bblk*H rows per grid step."""

    def kernel(x_ref, w_ref, c_ref, o_ref):
        x = x_ref[...]                       # (Mblk, 2L) f32, [Xr | Xi]
        cv = c_ref[...]                      # (16, 2L) f32 packed constants
        b1 = cv[0]                           # (2L,)  [br-bi | br+bi] (stage 1)
        b3 = cv[1]                           # (2L,)  (stage 3)
        gamma2 = cv[2]                       # (2L,)  [gamma | gamma]

        # ----- stage 1: complex 1x1 conv + bias + complex ELU ----------------
        # One block-complex, block-diagonal matmul on the packed [Xr | Xi] slab.
        y1 = jnp.dot(x.astype(jnp.bfloat16), w_ref[0],
                     preferred_element_type=jnp.float32) + b1
        a = _elu(y1)                         # joint (Mblk, 2L)

        # ----- stage 2: complex depthwise 3x3 (padding=1, no bias) + ELU -----
        # 128-aligned (free) lane slices give the separate real/imag planes.
        a_r = a[:, :L]
        a_i = a[:, L:]

        # Hoisted boundary masks: built once, shared by all 9 taps.  Row masks
        # use (row mod H) so batch-blocked rows never mix across images.
        rows = lax.broadcasted_iota(jnp.int32, (Mblk, L), 0) % H
        lanes = lax.broadcasted_iota(jnp.int32, (Mblk, L), 1)
        row_mask = {1: rows >= 1, -1: rows < (H - 1)}
        lane_mask = {C: lanes >= C, -C: lanes < (L - C)}

        def shift_lanes(p, dl):              # out[:, l] = p[:, l - dl]
            if dl == 0:
                return p
            y = pltpu.roll(p, shift=dl % L, axis=1)      # XLU lane rotate
            return jnp.where(lane_mask[dl], y, 0.0)

        def shift_rows(p, dr):               # out[m, :] = p[m - dr, :]
            if dr == 0:
                return p
            y = pltpu.roll(p, shift=dr % Mblk, axis=0)   # XLU sublane rotate
            return jnp.where(row_mask[dr], y, 0.0)

        # Column (w +/- 1) shifts are lane shifts by C; shared across the rows.
        ar_cols = [shift_lanes(a_r, (1 - dj) * C) for dj in range(3)]
        ai_cols = [shift_lanes(a_i, (1 - dj) * C) for dj in range(3)]

        v_r = None
        v_i = None
        for di in range(3):
            dr = 1 - di
            for dj in range(3):
                pr = shift_rows(ar_cols[dj], dr)
                pi = shift_rows(ai_cols[dj], dr)
                tap = cv[3 + di * 3 + dj]    # (2L,) = [kr tiled | ki tiled]
                kr = tap[:L]
                ki = tap[L:]
                tr = pr * kr - pi * ki
                ti = pi * kr + pr * ki
                if v_r is None:              # init accumulator from first tap
                    v_r, v_i = tr, ti
                else:
                    v_r = v_r + tr
                    v_i = v_i + ti

        b_r = _elu(v_r).astype(jnp.bfloat16)
        b_i = _elu(v_i).astype(jnp.bfloat16)

        # ----- stage 3: complex 1x1 conv + bias + complex ELU ----------------
        # Split-K form (Br @ Wtop + Bi @ Wbot) avoids a lane-axis concatenate.
        y3 = (jnp.dot(b_r, w_ref[1, :L, :], preferred_element_type=jnp.float32)
              + jnp.dot(b_i, w_ref[1, L:, :], preferred_element_type=jnp.float32)
              + b3)
        c = _elu(y3)

        # ----- layer-scale (real) + residual, one fused 2L-wide store --------
        o_ref[...] = gamma2 * c + x

    return kernel


def pack_params(params, W):
    """Build the two packed operand slabs ONCE (reuse across calls):
       w13:    (2, 2L, 2L) bf16  block-complex 1x1 weights for stage 1 / 3
       consts: (16, 2L)    f32   row 0: b1, row 1: b3, row 2: [gamma|gamma],
                                 rows 3..11: depthwise taps [kr | ki], rest 0."""
    (w1r, w1i, b1r, b1i, k2r, k2i, w3r, w3i, b3r, b3i, gamma) = params
    C = w1r.shape[0]
    L = W * C
    eye = jnp.eye(W, dtype=jnp.float32)

    def block_w(wr, wi):
        # [Xr | Xi] @ [[BD(wr), BD(wi)], [-BD(wi), BD(wr)]] = [Re | Im]
        bdr = jnp.kron(eye, wr)              # (L, L) block-diagonal per column
        bdi = jnp.kron(eye, wi)
        top = jnp.concatenate([bdr, bdi], axis=1)
        bot = jnp.concatenate([-bdi, bdr], axis=1)
        return jnp.concatenate([top, bot], axis=0)           # (2L, 2L)

    w13 = jnp.stack([block_w(w1r, w1i),
                     block_w(w3r, w3i)]).astype(jnp.bfloat16)

    def joint_bias(br, bi):
        # apply_complex: real bias = br - bi, imag bias = br + bi (matches
        # (conv_r(xr)+br) - (conv_i(xi)+bi)  and  (conv_r(xi)+br)+(conv_i(xr)+bi))
        return jnp.concatenate([jnp.tile(br[0] - bi[0], W),
                                jnp.tile(br[0] + bi[0], W)])  # (2L,)

    rows = [joint_bias(b1r, b1i),
            joint_bias(b3r, b3i),
            jnp.tile(gamma[0], 2 * W)]
    for di in range(3):
        for dj in range(3):
            rows.append(jnp.concatenate([jnp.tile(k2r[di, dj], W),
                                         jnp.tile(k2i[di, dj], W)]))
    while len(rows) < 16:                                     # pad to 16 rows
        rows.append(jnp.zeros((2 * L,), jnp.float32))
    consts = jnp.stack(rows).astype(jnp.float32)              # (16, 2L)
    return w13, consts


@partial(jax.jit, static_argnames=("block_batch",))
def frequency_block_pallas(xr, xi, w13, consts, block_batch=None):
    """xr, xi: (B, H, W, C) f32 NHWC real/imag planes.  w13/consts from
    pack_params().  Returns (out_r, out_i) NHWC."""
    B, H, W, C = xr.shape
    L = W * C
    if block_batch is None:
        # Keep grid length >= 2 when possible so both v7x TensorCores get work.
        block_batch = B // 2 if (B >= 2 and B % 2 == 0) else B
    assert B % block_batch == 0
    steps = B // block_batch
    Mblk = block_batch * H

    # Wrapper-side packing (cheap XLA ops, outside the kernel): lane-dense
    # [Xr | Xi] slab of shape (B*H, 2L); row-major identical to NHWC planes.
    x_packed = jnp.concatenate([xr.reshape(B * H, L),
                                xi.reshape(B * H, L)], axis=1)

    kernel = _make_kernel(H, L, C, Mblk)

    grid_spec = pltpu.PrefetchScalarGridSpec(
        num_scalar_prefetch=0,
        grid=(steps,),
        in_specs=[
            pl.BlockSpec((Mblk, 2 * L), lambda i: (i, 0)),
            # Constant index maps -> fetched once, kept resident across steps.
            pl.BlockSpec(w13.shape, lambda i: (0, 0, 0)),
            pl.BlockSpec(consts.shape, lambda i: (0, 0)),
        ],
        out_specs=pl.BlockSpec((Mblk, 2 * L), lambda i: (i, 0)),
    )

    out = pl.pallas_call(
        kernel,
        out_shape=jax.ShapeDtypeStruct((B * H, 2 * L), jnp.float32),
        grid_spec=grid_spec,
        compiler_params=pltpu.CompilerParams(
            dimension_semantics=("parallel",)),
    )(x_packed, w13, consts)

    out_r = out[:, :L].reshape(B, H, W, C)
    out_i = out[:, L:].reshape(B, H, W, C)
    return out_r, out_i


def init_params(key, C, init_values=1e-4):
    """Deterministic synthetic parameters (shapes follow the PyTorch module)."""
    ks = jax.random.split(key, 10)

    def conv1x1_w(k):   # torch weight (out, in, 1, 1) -> kernel layout (in, out)
        w = 0.3 * jax.random.normal(k, (C, C), jnp.float32)
        return w.T

    def dw_w(k):        # torch weight (C, 1, 3, 3) -> kernel layout (3, 3, C)
        w = 0.3 * jax.random.normal(k, (C, 3, 3), jnp.float32)
        return jnp.transpose(w, (1, 2, 0))

    def bias(k):
        return 0.1 * jax.random.normal(k, (1, C), jnp.float32)

    w1r, w1i = conv1x1_w(ks[0]), conv1x1_w(ks[1])
    b1r, b1i = bias(ks[2]), bias(ks[3])
    k2r, k2i = dw_w(ks[4]), dw_w(ks[5])
    w3r, w3i = conv1x1_w(ks[6]), conv1x1_w(ks[7])
    b3r, b3i = bias(ks[8]), bias(ks[9])
    gamma = jnp.full((1, C), init_values, jnp.float32)   # nn.Parameter (1,C,1,1)
    return (w1r, w1i, b1r, b1i, k2r, k2i, w3r, w3i, b3r, b3i, gamma)


def frequency_block_ref(xr, xi, params):
    """Pure-JAX reference with identical semantics (NHWC, real/imag planes)."""
    (w1r, w1i, b1r, b1i, k2r, k2i, w3r, w3i, b3r, b3i, gamma) = params
    B, H, W, C = xr.shape

    def c1x1(ar, ai, wr, wi, br, bi):
        rr = jnp.einsum('bhwc,co->bhwo', ar, wr) + br[0]
        ii = jnp.einsum('bhwc,co->bhwo', ai, wi) + bi[0]
        ir = jnp.einsum('bhwc,co->bhwo', ai, wr) + br[0]
        ri = jnp.einsum('bhwc,co->bhwo', ar, wi) + bi[0]
        return rr - ii, ir + ri

    def dw(a, k):
        ap = jnp.pad(a, ((0, 0), (1, 1), (1, 1), (0, 0)))
        out = jnp.zeros_like(a)
        for i in range(3):
            for j in range(3):
                out = out + ap[:, i:i + H, j:j + W, :] * k[i, j, :]
        return out

    ur, ui = c1x1(xr, xi, w1r, w1i, b1r, b1i)
    ar, ai = _elu(ur), _elu(ui)
    vr = dw(ar, k2r) - dw(ai, k2i)
    vi = dw(ai, k2r) + dw(ar, k2i)
    br_, bi_ = _elu(vr), _elu(vi)
    wr_, wi_ = c1x1(br_, bi_, w3r, w3i, b3r, b3i)
    cr, ci = _elu(wr_), _elu(wi_)
    return gamma[0] * cr + xr, gamma[0] * ci + xi


if __name__ == "__main__":
    # W*C = 128 -> exactly one lane-dense vreg row per plane row;
    # B=8 with block_batch=4 -> grid (2,), M = 64 rows per 1x1-conv matmul.
    B, C, H, W = 8, 8, 16, 16

    key = jax.random.PRNGKey(0)
    kx, kp = jax.random.split(key)
    k1, k2 = jax.random.split(kx)

    # PyTorch-style complex NCHW input, built from two real planes.
    xr_nchw = jax.random.normal(k1, (B, C, H, W), jnp.float32)
    xi_nchw = jax.random.normal(k2, (B, C, H, W), jnp.float32)

    # NCHW -> NHWC for the kernel.
    xr = jnp.transpose(xr_nchw, (0, 2, 3, 1))
    xi = jnp.transpose(xi_nchw, (0, 2, 3, 1))

    params = init_params(kp, C)
    # Packed block weights / constant slabs are built once and reused.
    w13, consts = pack_params(params, W)

    out_r, out_i = frequency_block_pallas(xr, xi, w13, consts)
    out_r = jax.block_until_ready(out_r)
    out_i = jax.block_until_ready(out_i)

    # Cross-check against a pure-JAX reference of the same math.
    ref_r, ref_i = frequency_block_ref(xr, xi, params)
    assert jnp.allclose(out_r, ref_r, atol=1e-4, rtol=1e-4), "real part mismatch"
    assert jnp.allclose(out_i, ref_i, atol=1e-4, rtol=1e-4), "imag part mismatch"

    # Back to PyTorch's NCHW complex64 output convention.
    out = (jnp.transpose(out_r, (0, 3, 1, 2))
           + 1j * jnp.transpose(out_i, (0, 3, 1, 2))).astype(jnp.complex64)
    jax.block_until_ready(out)
    print("KERNEL_OK")
</pallas_src>

<mosaic_0001>
module attributes {stable_mosaic.version = 11 : i64} {
  func.func @kernel(%arg0: i32, %arg1: memref<64x256xf32, #tpu.memory_space<vmem>>, %arg2: memref<2x256x256xbf16, #tpu.memory_space<vmem>>, %arg3: memref<16x256xf32, #tpu.memory_space<vmem>>, %arg4: memref<64x256xf32, #tpu.memory_space<vmem>>) attributes {dimension_semantics = [#tpu.dimension_semantics<parallel>], iteration_bounds = array<i64: 2>, scalar_prefetch = 0 : i64, scratch_operands = 0 : i64, tpu.core_type = #tpu.core_type<tc>, window_params = [{transform_indices = @transform_0, window_bounds = array<i64: 64, 256>}, {pipeline_mode = #tpu.pipeline_mode<synchronous>, transform_indices = @transform_1, window_bounds = array<i64: 2, 256, 256>}, {pipeline_mode = #tpu.pipeline_mode<synchronous>, transform_indices = @transform_2, window_bounds = array<i64: 16, 256>}, {transform_indices = @transform_3, window_bounds = array<i64: 64, 256>}]} {
    %c0 = arith.constant 0 : index
    %c0_0 = arith.constant 0 : index
    %0 = vector.load %arg1[%c0, %c0_0] : memref<64x256xf32, #tpu.memory_space<vmem>>, vector<64x256xf32>
    %c0_1 = arith.constant 0 : index
    %c0_2 = arith.constant 0 : index
    %1 = vector.load %arg3[%c0_1, %c0_2] : memref<16x256xf32, #tpu.memory_space<vmem>>, vector<16x256xf32>
    %2 = vector.extract_strided_slice %1 {offsets = [0, 0], sizes = [1, 256], strides = [1, 1]} : vector<16x256xf32> to vector<1x256xf32>
    %3 = vector.shape_cast %2 : vector<1x256xf32> to vector<256xf32>
    %4 = vector.extract_strided_slice %1 {offsets = [1, 0], sizes = [1, 256], strides = [1, 1]} : vector<16x256xf32> to vector<1x256xf32>
    %5 = vector.shape_cast %4 : vector<1x256xf32> to vector<256xf32>
    %6 = vector.extract_strided_slice %1 {offsets = [2, 0], sizes = [1, 256], strides = [1, 1]} : vector<16x256xf32> to vector<1x256xf32>
    %7 = vector.shape_cast %6 : vector<1x256xf32> to vector<256xf32>
    %8 = arith.truncf %0 : vector<64x256xf32> to vector<64x256xbf16>
    %c0_3 = arith.constant 0 : index
    %c0_4 = arith.constant 0 : index
    %c0_5 = arith.constant 0 : index
    %9 = vector.load %arg2[%c0_3, %c0_4, %c0_5] : memref<2x256x256xbf16, #tpu.memory_space<vmem>>, vector<1x256x256xbf16>
    %10 = vector.shape_cast %9 : vector<1x256x256xbf16> to vector<256x256xbf16>
    %cst = arith.constant dense<0.000000e+00> : vector<64x256xf32>
    %11 = tpu.matmul %8, %10, %cst {dimension_numbers = #tpu.dot_dimension_numbers<[1], [0], [0], [1], [0, 0, 1, 1], [], []>} : vector<64x256xbf16>, vector<256x256xbf16>, vector<64x256xf32> -> vector<64x256xf32>
    %12 = vector.shape_cast %3 : vector<256xf32> to vector<1x256xf32>
    %13 = vector.broadcast %12 : vector<1x256xf32> to vector<64x256xf32>
    %14 = arith.addf %11, %13 : vector<64x256xf32>
    %cst_6 = arith.constant 0.000000e+00 : f32
    %15 = vector.broadcast %cst_6 : f32 to vector<64x256xf32>
    %16 = arith.cmpf ogt, %14, %15 : vector<64x256xf32>
    %17 = math.exp %14 : vector<64x256xf32>
    %cst_7 = arith.constant 1.000000e+00 : f32
    %18 = vector.broadcast %cst_7 : f32 to vector<64x256xf32>
    %19 = arith.subf %17, %18 : vector<64x256xf32>
    %20 = arith.select %16, %14, %19 : vector<64x256xi1>, vector<64x256xf32>
    %21 = vector.extract_strided_slice %20 {offsets = [0, 0], sizes = [64, 128], strides = [1, 1]} : vector<64x256xf32> to vector<64x128xf32>
    %22 = vector.extract_strided_slice %20 {offsets = [0, 128], sizes = [64, 128], strides = [1, 1]} : vector<64x256xf32> to vector<64x128xf32>
    %23 = tpu.iota {dimensions = array<i32: 0>} : vector<64x128xi32>
    %c16_i32 = arith.constant 16 : i32
    %c0_i32 = arith.constant 0 : i32
    %24 = arith.cmpi eq, %c16_i32, %c0_i32 : i32
    %c1_i32 = arith.constant 1 : i32
    %25 = arith.select %24, %c1_i32, %c16_i32 : i32
    %26 = vector.broadcast %25 : i32 to vector<64x128xi32>
    %27 = arith.remsi %23, %26 : vector<64x128xi32>
    %c0_i32_8 = arith.constant 0 : i32
    %28 = vector.broadcast %c0_i32_8 : i32 to vector<64x128xi32>
    %29 = arith.cmpi ne, %27, %28 : vector<64x128xi32>
    %c0_i32_9 = arith.constant 0 : i32
    %30 = vector.broadcast %c0_i32_9 : i32 to vector<64x128xi32>
    %31 = arith.cmpi slt, %27, %30 : vector<64x128xi32>
    %c0_i32_10 = arith.constant 0 : i32
    %32 = arith.cmpi slt, %25, %c0_i32_10 : i32
    %33 = vector.broadcast %32 : i1 to vector<64x128xi1>
    %34 = vector.broadcast %33 : vector<64x128xi1> to vector<64x128xi1>
    %35 = arith.xori %31, %34 : vector<64x128xi1>
    %36 = arith.andi %35, %29 : vector<64x128xi1>
    %37 = vector.broadcast %25 : i32 to vector<64x128xi32>
    %38 = arith.addi %27, %37 : vector<64x128xi32>
    %39 = arith.select %36, %38, %27 : vector<64x128xi1>, vector<64x128xi32>
    %40 = tpu.iota {dimensions = array<i32: 1>} : vector<64x128xi32>
    %c1_i32_11 = arith.constant 1 : i32
    %41 = vector.broadcast %c1_i32_11 : i32 to vector<64x128xi32>
    %42 = arith.cmpi sge, %39, %41 : vector<64x128xi32>
    %c15_i32 = arith.constant 15 : i32
    %43 = vector.broadcast %c15_i32 : i32 to vector<64x128xi32>
    %44 = arith.cmpi slt, %39, %43 : vector<64x128xi32>
    %c8_i32 = arith.constant 8 : i32
    %45 = vector.broadcast %c8_i32 : i32 to vector<64x128xi32>
    %46 = arith.cmpi sge, %40, %45 : vector<64x128xi32>
    %c120_i32 = arith.constant 120 : i32
    %47 = vector.broadcast %c120_i32 : i32 to vector<64x128xi32>
    %48 = arith.cmpi slt, %40, %47 : vector<64x128xi32>
    %c8_i32_12 = arith.constant 8 : i32
    %49 = tpu.dynamic_rotate %21 by %c8_i32_12 dim 1 : vector<64x128xf32>, i32 -> vector<64x128xf32>
    %cst_13 = arith.constant 0.000000e+00 : f32
    %50 = vector.broadcast %cst_13 : f32 to vector<64x128xf32>
    %51 = arith.select %46, %49, %50 : vector<64x128xi1>, vector<64x128xf32>
    %c120_i32_14 = arith.constant 120 : i32
    %52 = tpu.dynamic_rotate %21 by %c120_i32_14 dim 1 : vector<64x128xf32>, i32 -> vector<64x128xf32>
    %cst_15 = arith.constant 0.000000e+00 : f32
    %53 = vector.broadcast %cst_15 : f32 to vector<64x128xf32>
    %54 = arith.select %48, %52, %53 : vector<64x128xi1>, vector<64x128xf32>
    %c8_i32_16 = arith.constant 8 : i32
    %55 = tpu.dynamic_rotate %22 by %c8_i32_16 dim 1 : vector<64x128xf32>, i32 -> vector<64x128xf32>
    %cst_17 = arith.constant 0.000000e+00 : f32
    %56 = vector.broadcast %cst_17 : f32 to vector<64x128xf32>
    %57 = arith.select %46, %55, %56 : vector<64x128xi1>, vector<64x128xf32>
    %c120_i32_18 = arith.constant 120 : i32
    %58 = tpu.dynamic_rotate %22 by %c120_i32_18 dim 1 : vector<64x128xf32>, i32 -> vector<64x128xf32>
    %cst_19 = arith.constant 0.000000e+00 : f32
    %59 = vector.broadcast %cst_19 : f32 to vector<64x128xf32>
    %60 = arith.select %48, %58, %59 : vector<64x128xi1>, vector<64x128xf32>
    %c1_i32_20 = arith.constant 1 : i32
    %61 = tpu.dynamic_rotate %51 by %c1_i32_20 dim 0 : vector<64x128xf32>, i32 -> vector<64x128xf32>
    %cst_21 = arith.constant 0.000000e+00 : f32
    %62 = vector.broadcast %cst_21 : f32 to vector<64x128xf32>
    %63 = arith.select %42, %61, %62 : vector<64x128xi1>, vector<64x128xf32>
    %c1_i32_22 = arith.constant 1 : i32
    %64 = tpu.dynamic_rotate %57 by %c1_i32_22 dim 0 : vector<64x128xf32>, i32 -> vector<64x128xf32>
    %cst_23 = arith.constant 0.000000e+00 : f32
    %65 = vector.broadcast %cst_23 : f32 to vector<64x128xf32>
    %66 = arith.select %42, %64, %65 : vector<64x128xi1>, vector<64x128xf32>
    %67 = vector.extract_strided_slice %1 {offsets = [3, 0], sizes = [1, 256], strides = [1, 1]} : vector<16x256xf32> to vector<1x256xf32>
    %68 = vector.shape_cast %67 : vector<1x256xf32> to vector<256xf32>
    %69 = vector.extract_strided_slice %68 {offsets = [0], sizes = [128], strides = [1]} : vector<256xf32> to vector<128xf32>
    %70 = vector.extract_strided_slice %68 {offsets = [128], sizes = [128], strides = [1]} : vector<256xf32> to vector<128xf32>
    %71 = vector.shape_cast %69 : vector<128xf32> to vector<1x128xf32>
    %72 = vector.broadcast %71 : vector<1x128xf32> to vector<64x128xf32>
    %73 = arith.mulf %63, %72 : vector<64x128xf32>
    %74 = vector.shape_cast %70 : vector<128xf32> to vector<1x128xf32>
    %75 = vector.broadcast %74 : vector<1x128xf32> to vector<64x128xf32>
    %76 = arith.mulf %66, %75 : vector<64x128xf32>
    %77 = arith.subf %73, %76 : vector<64x128xf32>
    %78 = vector.shape_cast %69 : vector<128xf32> to vector<1x128xf32>
    %79 = vector.broadcast %78 : vector<1x128xf32> to vector<64x128xf32>
    %80 = arith.mulf %66, %79 : vector<64x128xf32>
    %81 = vector.shape_cast %70 : vector<128xf32> to vector<1x128xf32>
    %82 = vector.broadcast %81 : vector<1x128xf32> to vector<64x128xf32>
    %83 = arith.mulf %63, %82 : vector<64x128xf32>
    %84 = arith.addf %80, %83 : vector<64x128xf32>
    %c1_i32_24 = arith.constant 1 : i32
    %85 = tpu.dynamic_rotate %21 by %c1_i32_24 dim 0 : vector<64x128xf32>, i32 -> vector<64x128xf32>
    %cst_25 = arith.constant 0.000000e+00 : f32
    %86 = vector.broadcast %cst_25 : f32 to vector<64x128xf32>
    %87 = arith.select %42, %85, %86 : vector<64x128xi1>, vector<64x128xf32>
    %c1_i32_26 = arith.constant 1 : i32
    %88 = tpu.dynamic_rotate %22 by %c1_i32_26 dim 0 : vector<64x128xf32>, i32 -> vector<64x128xf32>
    %cst_27 = arith.constant 0.000000e+00 : f32
    %89 = vector.broadcast %cst_27 : f32 to vector<64x128xf32>
    %90 = arith.select %42, %88, %89 : vector<64x128xi1>, vector<64x128xf32>
    %91 = vector.extract_strided_slice %1 {offsets = [4, 0], sizes = [1, 256], strides = [1, 1]} : vector<16x256xf32> to vector<1x256xf32>
    %92 = vector.shape_cast %91 : vector<1x256xf32> to vector<256xf32>
    %93 = vector.extract_strided_slice %92 {offsets = [0], sizes = [128], strides = [1]} : vector<256xf32> to vector<128xf32>
    %94 = vector.extract_strided_slice %92 {offsets = [128], sizes = [128], strides = [1]} : vector<256xf32> to vector<128xf32>
    %95 = vector.shape_cast %93 : vector<128xf32> to vector<1x128xf32>
    %96 = vector.broadcast %95 : vector<1x128xf32> to vector<64x128xf32>
    %97 = arith.mulf %87, %96 : vector<64x128xf32>
    %98 = vector.shape_cast %94 : vector<128xf32> to vector<1x128xf32>
    %99 = vector.broadcast %98 : vector<1x128xf32> to vector<64x128xf32>
    %100 = arith.mulf %90, %99 : vector<64x128xf32>
    %101 = arith.subf %97, %100 : vector<64x128xf32>
    %102 = vector.shape_cast %93 : vector<128xf32> to vector<1x128xf32>
    %103 = vector.broadcast %102 : vector<1x128xf32> to vector<64x128xf32>
    %104 = arith.mulf %90, %103 : vector<64x128xf32>
    %105 = vector.shape_cast %94 : vector<128xf32> to vector<1x128xf32>
    %106 = vector.broadcast %105 : vector<1x128xf32> to vector<64x128xf32>
    %107 = arith.mulf %87, %106 : vector<64x128xf32>
    %108 = arith.addf %104, %107 : vector<64x128xf32>
    %109 = arith.addf %77, %101 : vector<64x128xf32>
    %110 = arith.addf %84, %108 : vector<64x128xf32>
    %c1_i32_28 = arith.constant 1 : i32
    %111 = tpu.dynamic_rotate %54 by %c1_i32_28 dim 0 : vector<64x128xf32>, i32 -> vector<64x128xf32>
    %cst_29 = arith.constant 0.000000e+00 : f32
    %112 = vector.broadcast %cst_29 : f32 to vector<64x128xf32>
    %113 = arith.select %42, %111, %112 : vector<64x128xi1>, vector<64x128xf32>
    %c1_i32_30 = arith.constant 1 : i32
    %114 = tpu.dynamic_rotate %60 by %c1_i32_30 dim 0 : vector<64x128xf32>, i32 -> vector<64x128xf32>
    %cst_31 = arith.constant 0.000000e+00 : f32
    %115 = vector.broadcast %cst_31 : f32 to vector<64x128xf32>
    %116 = arith.select %42, %114, %115 : vector<64x128xi1>, vector<64x128xf32>
    %117 = vector.extract_strided_slice %1 {offsets = [5, 0], sizes = [1, 256], strides = [1, 1]} : vector<16x256xf32> to vector<1x256xf32>
    %118 = vector.shape_cast %117 : vector<1x256xf32> to vector<256xf32>
    %119 = vector.extract_strided_slice %118 {offsets = [0], sizes = [128], strides = [1]} : vector<256xf32> to vector<128xf32>
    %120 = vector.extract_strided_slice %118 {offsets = [128], sizes = [128], strides = [1]} : vector<256xf32> to vector<128xf32>
    %121 = vector.shape_cast %119 : vector<128xf32> to vector<1x128xf32>
    %122 = vector.broadcast %121 : vector<1x128xf32> to vector<64x128xf32>
    %123 = arith.mulf %113, %122 : vector<64x128xf32>
    %124 = vector.shape_cast %120 : vector<128xf32> to vector<1x128xf32>
    %125 = vector.broadcast %124 : vector<1x128xf32> to vector<64x128xf32>
    %126 = arith.mulf %116, %125 : vector<64x128xf32>
    %127 = arith.subf %123, %126 : vector<64x128xf32>
    %128 = vector.shape_cast %119 : vector<128xf32> to vector<1x128xf32>
    %129 = vector.broadcast %128 : vector<1x128xf32> to vector<64x128xf32>
    %130 = arith.mulf %116, %129 : vector<64x128xf32>
    %131 = vector.shape_cast %120 : vector<128xf32> to vector<1x128xf32>
    %132 = vector.broadcast %131 : vector<1x128xf32> to vector<64x128xf32>
    %133 = arith.mulf %113, %132 : vector<64x128xf32>
    %134 = arith.addf %130, %133 : vector<64x128xf32>
    %135 = arith.addf %109, %127 : vector<64x128xf32>
    %136 = arith.addf %110, %134 : vector<64x128xf32>
    %137 = vector.extract_strided_slice %1 {offsets = [6, 0], sizes = [1, 256], strides = [1, 1]} : vector<16x256xf32> to vector<1x256xf32>
    %138 = vector.shape_cast %137 : vector<1x256xf32> to vector<256xf32>
    %139 = vector.extract_strided_slice %138 {offsets = [0], sizes = [128], strides = [1]} : vector<256xf32> to vector<128xf32>
    %140 = vector.extract_strided_slice %138 {offsets = [128], sizes = [128], strides = [1]} : vector<256xf32> to vector<128xf32>
    %141 = vector.shape_cast %139 : vector<128xf32> to vector<1x128xf32>
    %142 = vector.broadcast %141 : vector<1x128xf32> to vector<64x128xf32>
    %143 = arith.mulf %51, %142 : vector<64x128xf32>
    %144 = vector.shape_cast %140 : vector<128xf32> to vector<1x128xf32>
    %145 = vector.broadcast %144 : vector<1x128xf32> to vector<64x128xf32>
    %146 = arith.mulf %57, %145 : vector<64x128xf32>
    %147 = arith.subf %143, %146 : vector<64x128xf32>
    %148 = vector.shape_cast %139 : vector<128xf32> to vector<1x128xf32>
    %149 = vector.broadcast %148 : vector<1x128xf32> to vector<64x128xf32>
    %150 = arith.mulf %57, %149 : vector<64x128xf32>
    %151 = vector.shape_cast %140 : vector<128xf32> to vector<1x128xf32>
    %152 = vector.broadcast %151 : vector<1x128xf32> to vector<64x128xf32>
    %153 = arith.mulf %51, %152 : vector<64x128xf32>
    %154 = arith.addf %150, %153 : vector<64x128xf32>
    %155 = arith.addf %135, %147 : vector<64x128xf32>
    %156 = arith.addf %136, %154 : vector<64x128xf32>
    %157 = vector.extract_strided_slice %1 {offsets = [7, 0], sizes = [1, 256], strides = [1, 1]} : vector<16x256xf32> to vector<1x256xf32>
    %158 = vector.shape_cast %157 : vector<1x256xf32> to vector<256xf32>
    %159 = vector.extract_strided_slice %158 {offsets = [0], sizes = [128], strides = [1]} : vector<256xf32> to vector<128xf32>
    %160 = vector.extract_strided_slice %158 {offsets = [128], sizes = [128], strides = [1]} : vector<256xf32> to vector<128xf32>
    %161 = vector.shape_cast %159 : vector<128xf32> to vector<1x128xf32>
    %162 = vector.broadcast %161 : vector<1x128xf32> to vector<64x128xf32>
    %163 = arith.mulf %21, %162 : vector<64x128xf32>
    %164 = vector.shape_cast %160 : vector<128xf32> to vector<1x128xf32>
    %165 = vector.broadcast %164 : vector<1x128xf32> to vector<64x128xf32>
    %166 = arith.mulf %22, %165 : vector<64x128xf32>
    %167 = arith.subf %163, %166 : vector<64x128xf32>
    %168 = vector.shape_cast %159 : vector<128xf32> to vector<1x128xf32>
    %169 = vector.broadcast %168 : vector<1x128xf32> to vector<64x128xf32>
    %170 = arith.mulf %22, %169 : vector<64x128xf32>
    %171 = vector.shape_cast %160 : vector<128xf32> to vector<1x128xf32>
    %172 = vector.broadcast %171 : vector<1x128xf32> to vector<64x128xf32>
    %173 = arith.mulf %21, %172 : vector<64x128xf32>
    %174 = arith.addf %170, %173 : vector<64x128xf32>
    %175 = arith.addf %155, %167 : vector<64x128xf32>
    %176 = arith.addf %156, %174 : vector<64x128xf32>
    %177 = vector.extract_strided_slice %1 {offsets = [8, 0], sizes = [1, 256], strides = [1, 1]} : vector<16x256xf32> to vector<1x256xf32>
    %178 = vector.shape_cast %177 : vector<1x256xf32> to vector<256xf32>
    %179 = vector.extract_strided_slice %178 {offsets = [0], sizes = [128], strides = [1]} : vector<256xf32> to vector<128xf32>
    %180 = vector.extract_strided_slice %178 {offsets = [128], sizes = [128], strides = [1]} : vector<256xf32> to vector<128xf32>
    %181 = vector.shape_cast %179 : vector<128xf32> to vector<1x128xf32>
    %182 = vector.broadcast %181 : vector<1x128xf32> to vector<64x128xf32>
    %183 = arith.mulf %54, %182 : vector<64x128xf32>
    %184 = vector.shape_cast %180 : vector<128xf32> to vector<1x128xf32>
    %185 = vector.broadcast %184 : vector<1x128xf32> to vector<64x128xf32>
    %186 = arith.mulf %60, %185 : vector<64x128xf32>
    %187 = arith.subf %183, %186 : vector<64x128xf32>
    %188 = vector.shape_cast %179 : vector<128xf32> to vector<1x128xf32>
    %189 = vector.broadcast %188 : vector<1x128xf32> to vector<64x128xf32>
    %190 = arith.mulf %60, %189 : vector<64x128xf32>
    %191 = vector.shape_cast %180 : vector<128xf32> to vector<1x128xf32>
    %192 = vector.broadcast %191 : vector<1x128xf32> to vector<64x128xf32>
    %193 = arith.mulf %54, %192 : vector<64x128xf32>
    %194 = arith.addf %190, %193 : vector<64x128xf32>
    %195 = arith.addf %175, %187 : vector<64x128xf32>
    %196 = arith.addf %176, %194 : vector<64x128xf32>
    %c63_i32 = arith.constant 63 : i32
    %197 = tpu.dynamic_rotate %51 by %c63_i32 dim 0 : vector<64x128xf32>, i32 -> vector<64x128xf32>
    %cst_32 = arith.constant 0.000000e+00 : f32
    %198 = vector.broadcast %cst_32 : f32 to vector<64x128xf32>
    %199 = arith.select %44, %197, %198 : vector<64x128xi1>, vector<64x128xf32>
    %c63_i32_33 = arith.constant 63 : i32
    %200 = tpu.dynamic_rotate %57 by %c63_i32_33 dim 0 : vector<64x128xf32>, i32 -> vector<64x128xf32>
    %cst_34 = arith.constant 0.000000e+00 : f32
    %201 = vector.broadcast %cst_34 : f32 to vector<64x128xf32>
    %202 = arith.select %44, %200, %201 : vector<64x128xi1>, vector<64x128xf32>
    %203 = vector.extract_strided_slice %1 {offsets = [9, 0], sizes = [1, 256], strides = [1, 1]} : vector<16x256xf32> to vector<1x256xf32>
    %204 = vector.shape_cast %203 : vector<1x256xf32> to vector<256xf32>
    %205 = vector.extract_strided_slice %204 {offsets = [0], sizes = [128], strides = [1]} : vector<256xf32> to vector<128xf32>
    %206 = vector.extract_strided_slice %204 {offsets = [128], sizes = [128], strides = [1]} : vector<256xf32> to vector<128xf32>
    %207 = vector.shape_cast %205 : vector<128xf32> to vector<1x128xf32>
    %208 = vector.broadcast %207 : vector<1x128xf32> to vector<64x128xf32>
    %209 = arith.mulf %199, %208 : vector<64x128xf32>
    %210 = vector.shape_cast %206 : vector<128xf32> to vector<1x128xf32>
    %211 = vector.broadcast %210 : vector<1x128xf32> to vector<64x128xf32>
    %212 = arith.mulf %202, %211 : vector<64x128xf32>
    %213 = arith.subf %209, %212 : vector<64x128xf32>
    %214 = vector.shape_cast %205 : vector<128xf32> to vector<1x128xf32>
    %215 = vector.broadcast %214 : vector<1x128xf32> to vector<64x128xf32>
    %216 = arith.mulf %202, %215 : vector<64x128xf32>
    %217 = vector.shape_cast %206 : vector<128xf32> to vector<1x128xf32>
    %218 = vector.broadcast %217 : vector<1x128xf32> to vector<64x128xf32>
    %219 = arith.mulf %199, %218 : vector<64x128xf32>
    %220 = arith.addf %216, %219 : vector<64x128xf32>
    %221 = arith.addf %195, %213 : vector<64x128xf32>
    %222 = arith.addf %196, %220 : vector<64x128xf32>
    %c63_i32_35 = arith.constant 63 : i32
    %223 = tpu.dynamic_rotate %21 by %c63_i32_35 dim 0 : vector<64x128xf32>, i32 -> vector<64x128xf32>
    %cst_36 = arith.constant 0.000000e+00 : f32
    %224 = vector.broadcast %cst_36 : f32 to vector<64x128xf32>
    %225 = arith.select %44, %223, %224 : vector<64x128xi1>, vector<64x128xf32>
    %c63_i32_37 = arith.constant 63 : i32
    %226 = tpu.dynamic_rotate %22 by %c63_i32_37 dim 0 : vector<64x128xf32>, i32 -> vector<64x128xf32>
    %cst_38 = arith.constant 0.000000e+00 : f32
    %227 = vector.broadcast %cst_38 : f32 to vector<64x128xf32>
    %228 = arith.select %44, %226, %227 : vector<64x128xi1>, vector<64x128xf32>
    %229 = vector.extract_strided_slice %1 {offsets = [10, 0], sizes = [1, 256], strides = [1, 1]} : vector<16x256xf32> to vector<1x256xf32>
    %230 = vector.shape_cast %229 : vector<1x256xf32> to vector<256xf32>
    %231 = vector.extract_strided_slice %230 {offsets = [0], sizes = [128], strides = [1]} : vector<256xf32> to vector<128xf32>
    %232 = vector.extract_strided_slice %230 {offsets = [128], sizes = [128], strides = [1]} : vector<256xf32> to vector<128xf32>
    %233 = vector.shape_cast %231 : vector<128xf32> to vector<1x128xf32>
    %234 = vector.broadcast %233 : vector<1x128xf32> to vector<64x128xf32>
    %235 = arith.mulf %225, %234 : vector<64x128xf32>
    %236 = vector.shape_cast %232 : vector<128xf32> to vector<1x128xf32>
    %237 = vector.broadcast %236 : vector<1x128xf32> to vector<64x128xf32>
    %238 = arith.mulf %228, %237 : vector<64x128xf32>
    %239 = arith.subf %235, %238 : vector<64x128xf32>
    %240 = vector.shape_cast %231 : vector<128xf32> to vector<1x128xf32>
    %241 = vector.broadcast %240 : vector<1x128xf32> to vector<64x128xf32>
    %242 = arith.mulf %228, %241 : vector<64x128xf32>
    %243 = vector.shape_cast %232 : vector<128xf32> to vector<1x128xf32>
    %244 = vector.broadcast %243 : vector<1x128xf32> to vector<64x128xf32>
    %245 = arith.mulf %225, %244 : vector<64x128xf32>
    %246 = arith.addf %242, %245 : vector<64x128xf32>
    %247 = arith.addf %221, %239 : vector<64x128xf32>
    %248 = arith.addf %222, %246 : vector<64x128xf32>
    %c63_i32_39 = arith.constant 63 : i32
    %249 = tpu.dynamic_rotate %54 by %c63_i32_39 dim 0 : vector<64x128xf32>, i32 -> vector<64x128xf32>
    %cst_40 = arith.constant 0.000000e+00 : f32
    %250 = vector.broadcast %cst_40 : f32 to vector<64x128xf32>
    %251 = arith.select %44, %249, %250 : vector<64x128xi1>, vector<64x128xf32>
    %c63_i32_41 = arith.constant 63 : i32
    %252 = tpu.dynamic_rotate %60 by %c63_i32_41 dim 0 : vector<64x128xf32>, i32 -> vector<64x128xf32>
    %cst_42 = arith.constant 0.000000e+00 : f32
    %253 = vector.broadcast %cst_42 : f32 to vector<64x128xf32>
    %254 = arith.select %44, %252, %253 : vector<64x128xi1>, vector<64x128xf32>
    %255 = vector.extract_strided_slice %1 {offsets = [11, 0], sizes = [1, 256], strides = [1, 1]} : vector<16x256xf32> to vector<1x256xf32>
    %256 = vector.shape_cast %255 : vector<1x256xf32> to vector<256xf32>
    %257 = vector.extract_strided_slice %256 {offsets = [0], sizes = [128], strides = [1]} : vector<256xf32> to vector<128xf32>
    %258 = vector.extract_strided_slice %256 {offsets = [128], sizes = [128], strides = [1]} : vector<256xf32> to vector<128xf32>
    %259 = vector.shape_cast %257 : vector<128xf32> to vector<1x128xf32>
    %260 = vector.broadcast %259 : vector<1x128xf32> to vector<64x128xf32>
    %261 = arith.mulf %251, %260 : vector<64x128xf32>
    %262 = vector.shape_cast %258 : vector<128xf32> to vector<1x128xf32>
    %263 = vector.broadcast %262 : vector<1x128xf32> to vector<64x128xf32>
    %264 = arith.mulf %254, %263 : vector<64x128xf32>
    %265 = arith.subf %261, %264 : vector<64x128xf32>
    %266 = vector.shape_cast %257 : vector<128xf32> to vector<1x128xf32>
    %267 = vector.broadcast %266 : vector<1x128xf32> to vector<64x128xf32>
    %268 = arith.mulf %254, %267 : vector<64x128xf32>
    %269 = vector.shape_cast %258 : vector<128xf32> to vector<1x128xf32>
    %270 = vector.broadcast %269 : vector<1x128xf32> to vector<64x128xf32>
    %271 = arith.mulf %251, %270 : vector<64x128xf32>
    %272 = arith.addf %268, %271 : vector<64x128xf32>
    %273 = arith.addf %247, %265 : vector<64x128xf32>
    %274 = arith.addf %248, %272 : vector<64x128xf32>
    %cst_43 = arith.constant 0.000000e+00 : f32
    %275 = vector.broadcast %cst_43 : f32 to vector<64x128xf32>
    %276 = arith.cmpf ogt, %273, %275 : vector<64x128xf32>
    %277 = math.exp %273 : vector<64x128xf32>
    %cst_44 = arith.constant 1.000000e+00 : f32
    %278 = vector.broadcast %cst_44 : f32 to vector<64x128xf32>
    %279 = arith.subf %277, %278 : vector<64x128xf32>
    %280 = arith.select %276, %273, %279 : vector<64x128xi1>, vector<64x128xf32>
    %281 = arith.truncf %280 : vector<64x128xf32> to vector<64x128xbf16>
    %cst_45 = arith.constant 0.000000e+00 : f32
    %282 = vector.broadcast %cst_45 : f32 to vector<64x128xf32>
    %283 = arith.cmpf ogt, %274, %282 : vector<64x128xf32>
    %284 = math.exp %274 : vector<64x128xf32>
    %cst_46 = arith.constant 1.000000e+00 : f32
    %285 = vector.broadcast %cst_46 : f32 to vector<64x128xf32>
    %286 = arith.subf %284, %285 : vector<64x128xf32>
    %287 = arith.select %283, %274, %286 : vector<64x128xi1>, vector<64x128xf32>
    %288 = arith.truncf %287 : vector<64x128xf32> to vector<64x128xbf16>
    %c1 = arith.constant 1 : index
    %c0_47 = arith.constant 0 : index
    %c0_48 = arith.constant 0 : index
    %289 = vector.load %arg2[%c1, %c0_47, %c0_48] : memref<2x256x256xbf16, #tpu.memory_space<vmem>>, vector<1x128x256xbf16>
    %290 = vector.shape_cast %289 : vector<1x128x256xbf16> to vector<128x256xbf16>
    %cst_49 = arith.constant dense<0.000000e+00> : vector<64x256xf32>
    %291 = tpu.matmul %281, %290, %cst_49 {dimension_numbers = #tpu.dot_dimension_numbers<[1], [0], [0], [1], [0, 0, 1, 1], [], []>} : vector<64x128xbf16>, vector<128x256xbf16>, vector<64x256xf32> -> vector<64x256xf32>
    %c1_50 = arith.constant 1 : index
    %c128 = arith.constant 128 : index
    %c0_51 = arith.constant 0 : index
    %292 = vector.load %arg2[%c1_50, %c128, %c0_51] : memref<2x256x256xbf16, #tpu.memory_space<vmem>>, vector<1x128x256xbf16>
    %293 = vector.shape_cast %292 : vector<1x128x256xbf16> to vector<128x256xbf16>
    %cst_52 = arith.constant dense<0.000000e+00> : vector<64x256xf32>
    %294 = tpu.matmul %288, %293, %cst_52 {dimension_numbers = #tpu.dot_dimension_numbers<[1], [0], [0], [1], [0, 0, 1, 1], [], []>} : vector<64x128xbf16>, vector<128x256xbf16>, vector<64x256xf32> -> vector<64x256xf32>
    %295 = arith.addf %291, %294 : vector<64x256xf32>
    %296 = vector.shape_cast %5 : vector<256xf32> to vector<1x256xf32>
    %297 = vector.broadcast %296 : vector<1x256xf32> to vector<64x256xf32>
    %298 = arith.addf %295, %297 : vector<64x256xf32>
    %cst_53 = arith.constant 0.000000e+00 : f32
    %299 = vector.broadcast %cst_53 : f32 to vector<64x256xf32>
    %300 = arith.cmpf ogt, %298, %299 : vector<64x256xf32>
    %301 = math.exp %298 : vector<64x256xf32>
    %cst_54 = arith.constant 1.000000e+00 : f32
    %302 = vector.broadcast %cst_54 : f32 to vector<64x256xf32>
    %303 = arith.subf %301, %302 : vector<64x256xf32>
    %304 = arith.select %300, %298, %303 : vector<64x256xi1>, vector<64x256xf32>
    %305 = vector.shape_cast %7 : vector<256xf32> to vector<1x256xf32>
    %306 = vector.broadcast %305 : vector<1x256xf32> to vector<64x256xf32>
    %307 = arith.mulf %306, %304 : vector<64x256xf32>
    %308 = arith.addf %307, %0 : vector<64x256xf32>
    %c0_55 = arith.constant 0 : index
    %c0_56 = arith.constant 0 : index
    %309 = vector.load %arg4[%c0_55, %c0_56] : memref<64x256xf32, #tpu.memory_space<vmem>>, vector<64x256xf32>
    tpu.vector_store %arg4[%c0_55, %c0_56], %308 {strides = array<i32>} : memref<64x256xf32, #tpu.memory_space<vmem>>, vector<64x256xf32>,
    return
  }
  func.func @transform_0(%arg0: i32) -> (i32, i32) {
    %c0_i32 = arith.constant 0 : i32
    %c0_i32_0 = arith.constant 0 : i32
    return %arg0, %c0_i32 : i32, i32
  }
  func.func @transform_1(%arg0: i32) -> (i32, i32, i32) {
    %c0_i32 = arith.constant 0 : i32
    %c0_i32_0 = arith.constant 0 : i32
    %c0_i32_1 = arith.constant 0 : i32
    %c0_i32_2 = arith.constant 0 : i32
    return %c0_i32, %c0_i32_0, %c0_i32_1 : i32, i32, i32
  }
  func.func @transform_2(%arg0: i32) -> (i32, i32) {
    %c0_i32 = arith.constant 0 : i32
    %c0_i32_0 = arith.constant 0 : i32
    %c0_i32_1 = arith.constant 0 : i32
    return %c0_i32, %c0_i32_0 : i32, i32
  }
  func.func @transform_3(%arg0: i32) -> (i32, i32) {
    %c0_i32 = arith.constant 0 : i32
    %c0_i32_0 = arith.constant 0 : i32
    return %arg0, %c0_i32 : i32, i32
  }
}

</mosaic_0001>

<bundles_post_ra>
// kernel: frequency_block_pallas.1
= control target key start
LH: loop header
LB: loop body
LE: loop exit
PB: predicated region body
PF: predicated region fallthrough
CT: control target
= control target key end

     0   :  { %s2776_s12 = smov 0   ;;  %s5510_s0 = inlined_call_operand.vmem [shape: f32[128,256], index: 0, kind: input, shape index: {}]   ;;  %s5511_s1 = inlined_call_operand.vmem [shape: bf16[2,256,256], index: 1, kind: input, shape index: {}]   ;;  %s5512_s2 = inlined_call_operand.vmem [shape: f32[16,256], index: 2, kind: input, shape index: {}]   ;;  %s5513_s3 = inlined_call_operand.vmem [shape: f32[128,256], index: 3, kind: output, shape index: {}]  }
   0x1 LB: > { %s2349_s13 = sadd.s32 4294967295, %s2751_s12   ;;  %p2353_p0 = scmp.ge.s32.totalorder %s2751_s12, 1  ;;  %s2751_s12 = sphi %s2776_s12, %s13_s12  }
   0x2   : > { %p139_p1 = scmp.lt.s32.totalorder %s2751_s12, 3 }
   0x4   : > { %p140_p2 = pnand %p2353_p0, %p139_p1 }
   0x6   : > { %143 = sbr.rel (%p140_p2) target bundleno = 898 (0x382), region = 32 }
   0xd   : > { %v2535_v0 = vld [vmem:[%s5511_s1 + $0x4] ss:$8 sps:$4 sm:$0xff]   ;;  %v2537_v1 = vld [vmem:[%s5511_s1] ss:$8 sps:$4 sm:$0xff]   ;;  %v2538_v2 = vld [vmem:[%s5511_s1 + $0x14] ss:$8 sps:$4 sm:$0xff]   ;;  %v5514_v56 = vlaneseq }
   0xe   : > { %408 = vmatprep.subr.bf16.mxu0 %v2535_v0  ;;  %v2540_v3 = vld [vmem:[%s5511_s1 + $0x10] ss:$8 sps:$4 sm:$0xff]   ;;  %v2541_v4 = vld [vmem:[%s5511_s1 + $0x24] ss:$8 sps:$4 sm:$0xff]   ;;  %s2354_s24 = sshll.u32 %s2349_s13, 3  ;;  %s2753_s19 = smov 8  }
   0xf   : > { %409 = vmatpush1.bf16.msra.mxu0 %v2537_v1  ;;  %v2543_v5 = vld [vmem:[%s5511_s1 + $0x20] ss:$8 sps:$4 sm:$0xff]   ;;  %p166_p3 = scmp.lt.s32.totalorder %s2354_s24, 15  ;;  %v2544_v6 = vld [vmem:[%s5511_s1 + $0x34] ss:$8 sps:$4 sm:$0xff]   ;;  %v2907_v57 = vshrl.u32 %v5514_v56, 7 }
  0x10   : > { %410 = vmatprep.subr.bf16.mxu0 %v2538_v2  ;;  %v2546_v7 = vld [vmem:[%s5511_s1 + $0x30] ss:$8 sps:$4 sm:$0xff]   ;;  %v2547_v8 = vld [vmem:[%s5511_s1 + $0x44] ss:$8 sps:$4 sm:$0xff]   ;;  %v2549_v9 = vld [vmem:[%s5511_s1 + $0x40] ss:$8 sps:$4 sm:$0xff]  }
  0x11   : > { %s6076_s24 = smov (!%p166_p3, %s2354_s24), 15  ;;  %v2550_v10 = vld [vmem:[%s5511_s1 + $0x54] ss:$8 sps:$4 sm:$0xff]   ;;  %v2552_v11 = vld [vmem:[%s5511_s1 + $0x50] ss:$8 sps:$4 sm:$0xff]   ;;  %v2910_v58 = vsub.s32 0, %v2907_v57 }
  0x12   : > { %s2506_s8 = sshll.u32 %s6076_s24, 4  ;;  %v2553_v12 = vld [vmem:[%s5511_s1 + $0x64] ss:$8 sps:$4 sm:$0xff]   ;;  %v2555_v16 = vld [vmem:[%s5511_s1 + $0x60] ss:$8 sps:$4 sm:$0xff]   ;;  %vm790_vm0 = vcmp.lt.s32.totalorder %v2907_v57, 1 }
  0x13   : > { %411 = vmatpush1.bf16.msra.mxu0 %v2540_v3  ;;  %s2825_s14 = scalar_lea.vmem %s5510_s0, %s2506_s8  ;;  %v2556_v17 = vld [vmem:[%s5511_s1 + $0x74] ss:$8 sps:$4 sm:$0xff]   ;;  %v2558_v18 = vld [vmem:[%s5511_s1 + $0x70] ss:$8 sps:$4 sm:$0xff]   ;;  %v2559_v19 = vld [vmem:[%s5511_s1 + $0x84] ss:$8 sps:$4 sm:$0xff]   ;;  %s5402_s22 = scalar_lea.vmem %s5513_s3, %s2506_s8 }
  0x14   : > { %412 = vmatprep.subr.bf16.mxu0 %v2541_v4  ;;  %v181_v13 = vld [vmem:[%s2825_s14 + $0x8] sm:$0xff]  ;;  %v183_v14 = vld [vmem:[%s2825_s14 + $0x18] sm:$0xff]  ;;  %v180_v35 = vld [vmem:[%s2825_s14] sm:$0xff]  ;;  %5646 = vst [vmem:[#allocation2_spill] sm:$0xff] %v2910_v58  ;;  %vm1351_vm4 = vcmp.lt.s32.totalorder %v2907_v57, 7  ;;  %s2754_s20 = smov 120  }
  0x15   : > { %v201_v15 = vpack.c.bf16 %v183_v14, %v181_v13  ;;  %v2561_v20 = vld [vmem:[%s5511_s1 + $0x80] ss:$8 sps:$4 sm:$0xff]   ;;  %v2562_v21 = vld [vmem:[%s5511_s1 + $0x94] ss:$8 sps:$4 sm:$0xff]   ;;  %v2564_v22 = vld [vmem:[%s5511_s1 + $0x90] ss:$8 sps:$4 sm:$0xff]  }
  0x16   : > { %v2565_v23 = vld [vmem:[%s5511_s1 + $0xa4] ss:$8 sps:$4 sm:$0xff]   ;;  %v2567_v24 = vld [vmem:[%s5511_s1 + $0xa0] ss:$8 sps:$4 sm:$0xff]   ;;  %v2568_v25 = vld [vmem:[%s5511_s1 + $0xb4] ss:$8 sps:$4 sm:$0xff]  }
  0x17   : > { %413 = vmatpush1.bf16.msra.mxu0 %v2543_v5  ;;  %440 = vmatprep.mubr.bf16.mxu0 %v201_v15  ;;  %v2570_v26 = vld [vmem:[%s5511_s1 + $0xb0] ss:$8 sps:$4 sm:$0xff]   ;;  %v2571_v27 = vld [vmem:[%s5511_s1 + $0xc4] ss:$8 sps:$4 sm:$0xff]   ;;  %v2573_v28 = vld [vmem:[%s5511_s1 + $0xc0] ss:$8 sps:$4 sm:$0xff]  }
  0x18   : > { %414 = vmatprep.subr.bf16.mxu0 %v2544_v6  ;;  %v2574_v29 = vld [vmem:[%s5511_s1 + $0xd4] ss:$8 sps:$4 sm:$0xff]   ;;  %v2576_v30 = vld [vmem:[%s5511_s1 + $0xd0] ss:$8 sps:$4 sm:$0xff]   ;;  %v2577_v31 = vld [vmem:[%s5511_s1 + $0xe4] ss:$8 sps:$4 sm:$0xff]  }
  0x19   : > { %v2579_v32 = vld [vmem:[%s5511_s1 + $0xe0] ss:$8 sps:$4 sm:$0xff]   ;;  %v2580_v33 = vld [vmem:[%s5511_s1 + $0xf4] ss:$8 sps:$4 sm:$0xff]   ;;  %v2582_v34 = vld [vmem:[%s5511_s1 + $0xf0] ss:$8 sps:$4 sm:$0xff]  }
  0x1a   : > { %v182_v36 = vld [vmem:[%s2825_s14 + $0x10] sm:$0xff]  ;;  %v185_v37 = vld [vmem:[%s2825_s14 + $0x28] sm:$0xff]  ;;  %v187_v38 = vld [vmem:[%s2825_s14 + $0x38] sm:$0xff]  ;;  %v2951_v14 = vsub.s32 2, %v2907_v57 }
  0x1b   : > { %415 = vmatpush1.bf16.msra.mxu0 %v2546_v7  ;;  %v200_v39 = vpack.c.bf16 %v182_v36, %v180_v35  ;;  %v203_v40 = vpack.c.bf16 %v187_v38, %v185_v37  ;;  %v184_v41 = vld [vmem:[%s2825_s14 + $0x20] sm:$0xff]  ;;  %v186_v42 = vld [vmem:[%s2825_s14 + $0x30] sm:$0xff]  ;;  %v189_v43 = vld [vmem:[%s2825_s14 + $0x48] sm:$0xff] }
  0x1c   : > { %416 = vmatprep.subr.bf16.mxu0 %v2547_v8  ;;  %v191_v44 = vld [vmem:[%s2825_s14 + $0x58] sm:$0xff]  ;;  %v202_v45 = vpack.c.bf16 %v186_v42, %v184_v41  ;;  %v188_v47 = vld [vmem:[%s2825_s14 + $0x40] sm:$0xff]  ;;  %v190_v48 = vld [vmem:[%s2825_s14 + $0x50] sm:$0xff]  ;;  %5649 = vst [vmem:[#allocation5_spill] sm:$0xff] %v2951_v14 }
  0x1d   : > { %v205_v46 = vpack.c.bf16 %v191_v44, %v189_v43  ;;  %v193_v49 = vld [vmem:[%s2825_s14 + $0x68] sm:$0xff]  ;;  %v195_v50 = vld [vmem:[%s2825_s14 + $0x78] sm:$0xff]  ;;  %v204_v51 = vpack.c.bf16 %v190_v48, %v188_v47  ;;  %v192_v53 = vld [vmem:[%s2825_s14 + $0x60] sm:$0xff]  ;;  %v3013_v44 = vadd.s32 56, %v2907_v57 }
  0x1e   : > { %v207_v52 = vpack.c.bf16 %v195_v50, %v193_v49  ;;  %v194_v54 = vld [vmem:[%s2825_s14 + $0x70] sm:$0xff]  ;;  %v2915_v59 = vld [vmem:[%s5512_s2] sm:$0xff]  ;;  %v2920_v60 = vld [vmem:[%s5512_s2 + $0x8] sm:$0xff]  ;;  %v3019_v50 = vadd.s32 40, %v2907_v57 }
  0x1f   : > { %417 = vmatpush1.bf16.msra.mxu0 %v2549_v9  ;;  %v206_v55 = vpack.c.bf16 %v194_v54, %v192_v53  ;;  %5647 = vst [vmem:[#allocation3_spill] sm:$0xff] %v2915_v59  ;;  %5648 = vst [vmem:[#allocation4_spill] sm:$0xff] %v2920_v60  ;;  %v2924_v61 = vrot.slane %v2915_v59, %v2910_v58  ;;  %v2928_v62 = vrot.slane %v2920_v60, %v2910_v58 }
  0x20   : > { %418 = vmatprep.subr.bf16.mxu0 %v2550_v10  ;;  %v1201_v10 = vsub.s32 7, %v2907_v57 }
  0x23   : > { %419 = vmatpush1.bf16.msra.mxu0 %v2552_v11 }
  0x24   : > { %420 = vmatprep.subr.bf16.mxu0 %v2553_v12 }
  0x27   : > { %421 = vmatpush1.bf16.msra.mxu0 %v2555_v16  ;;  %v2956_v16 = vld [vmem:[%s5512_s2 + $0x10] sm:$0xff] }
  0x28   : > { %422 = vmatprep.subr.bf16.mxu0 %v2556_v17  ;;  %5650 = vst [vmem:[#allocation6_spill] sm:$0xff] %v2956_v16  ;;  %v2959_v17 = vrot.slane %v2915_v59, %v1201_v10 }
  0x2b   : > { %423 = vmatpush1.bf16.msra.mxu0 %v2558_v18  ;;  %v2962_v18 = vadd.s32 8, %v2907_v57 }
  0x2c   : > { %424 = vmatprep.subr.bf16.mxu0 %v2559_v19 }
  0x2f   : > { %425 = vmatpush1.bf16.msra.mxu0 %v2561_v20 }
  0x30   : > { %426 = vmatprep.subr.bf16.mxu0 %v2562_v21  ;;  %v2970_v21 = vld [vmem:[%s5512_s2 + $0x18] sm:$0xff] }
  0x31   : > { %5651 = vst [vmem:[#allocation7_spill] sm:$0xff] %v2970_v21  ;;  %v3002_v35 = vrot.slane %v2970_v21, %v2951_v14 }
  0x33   : > { %427 = vmatpush1.bf16.msra.mxu0 %v2564_v22 }
  0x34   : > { %428 = vmatprep.subr.bf16.mxu0 %v2565_v23 }
  0x37   : > { %429 = vmatpush1.bf16.msra.mxu0 %v2567_v24 }
  0x38   : > { %430 = vmatprep.subr.bf16.mxu0 %v2568_v25  ;;  %v937_v25 = vsub.s32 4, %v2907_v57 }
  0x3a   : > { %v3006_v38 = vrot.slane %v2915_v59, %v937_v25 }
  0x3b   : > { %431 = vmatpush1.bf16.msra.mxu0 %v2570_v26  ;;  %v2978_v26 = vadd.s32 16, %v2907_v57 }
  0x3c   : > { %432 = vmatprep.subr.bf16.mxu0 %v2571_v27  ;;  %v2981_v27 = vrot.slane %v2920_v60, %v1201_v10 }
  0x3f   : > { %433 = vmatpush1.bf16.msra.mxu0 %v2573_v28 }
  0x40   : > { %434 = vmatprep.subr.bf16.mxu0 %v2574_v29 }
  0x43   : > { %435 = vmatpush1.bf16.msra.mxu0 %v2576_v30  ;;  %v2988_v30 = vadd.s32 24, %v2907_v57 }
  0x44   : > { %436 = vmatprep.subr.bf16.mxu0 %v2577_v31  ;;  %v2993_v31 = vrot.slane %v2956_v16, %v2951_v14 }
  0x47   : > { %437 = vmatpush1.bf16.msra.mxu0 %v2579_v32 }
  0x48   : > { %438 = vmatprep.subr.bf16.mxu0 %v2580_v33  ;;  %v2997_v33 = vadd.s32 32, %v2907_v57 }
  0x4b   : > { %439 = vmatpush1.bf16.msra.mxu0 %v2582_v34  ;;  %v581_v34 = vand.u32 15, %v2962_v18 }
  0x4d   : > { %vm3073_vm6 = vcmp.lt.s32.totalorder %v581_v34, 15 }
  0x4e   : > { %441 = vmatmul.mubr.bf16.vlgmr.msra.gmra.mrb[0].mxu0 %v200_v39  ;;  %v3009_v39 = vrot.slane %v2920_v60, %v937_v25 }
  0x4f   : > { %450 = vmatprep.mubr.bf16.mxu0 %v203_v40 }
  0x56   : > { %451 = vmatmul.mubr.bf16.gmra.mrb[4].mxu0 %v202_v45 }
  0x57   : > { %460 = vmatprep.mubr.bf16.mxu0 %v205_v46 }
  0x5e   : > { %461 = vmatmul.mubr.bf16.gmra.mrb[8].mxu0 %v204_v51 }
  0x5f   : > { %470 = vmatprep.mubr.bf16.mxu0 %v207_v52 }
  0x66   : > { %471 = vmatmul.mubr.bf16.gmra.mrb[12].mxu0 %v206_v55  ;;  %v3028_v55 = vadd.s32 48, %v2907_v57 }
 0x121   : > { %v442_v63 = vpop.f32.mrb[0].mxu0 }
 0x122   : > { %v2931_v0 = vadd.f32 %v442_v63, %v2924_v61  ;;  %v444_v1 = vpop.f32.mrb[1].mxu0 }
 0x123   : > { %v2934_v2 = vadd.f32 %v444_v1, %v2928_v62  ;;  %v446_v3 = vpop.f32.mrb[2].mxu0 }
 0x124   : > { %v497_v4 = vmul.f32 1.442695, %v2931_v0  ;;  %v2938_v5 = vadd.f32 %v446_v3, %v2924_v61  ;;  %v448_v6 = vpop.f32.mrb[3].mxu0  ;;  %vm481_vm1 = vcmp.gt.f32.partialorder %v2931_v0, 0.0 }
 0x125   : > { %v499_v7 = vmul.f32 1.442695, %v2934_v2  ;;  %v2942_v8 = vadd.f32 %v448_v6, %v2928_v62  ;;  %vm482_vm2 = vcmp.gt.f32.partialorder %v2934_v2, 0.0 }
 0x126   : > { %2631 = vpow2.f32 %v497_v4  ;;  %v501_v9 = vmul.f32 1.442695, %v2938_v5  ;;  %vm483_vm3 = vcmp.gt.f32.partialorder %v2938_v5, 0.0 }
 0x127   : > { %2633 = vpow2.f32 %v499_v7  ;;  %v503_v11 = vmul.f32 1.442695, %v2942_v8  ;;  %vm484_vm5 = vcmp.gt.f32.partialorder %v2942_v8, 0.0 }
 0x128   : > { %2635 = vpow2.f32 %v501_v9 }
 0x129   : > { %2637 = vpow2.f32 %v503_v11  ;;  %v452_v12 = vpop.f32.mrb[4].mxu0 }
 0x12a   : > { %v2948_v13 = vadd.f32 %v452_v12, %v2924_v61  ;;  %v454_v15 = vpop.f32.mrb[5].mxu0 }
 0x12b   : > { %v2965_v19 = vadd.f32 %v454_v15, %v2928_v62  ;;  %v456_v20 = vpop.f32.mrb[6].mxu0 }
 0x12c   : > { %v505_v22 = vmul.f32 1.442695, %v2948_v13  ;;  %v2974_v23 = vadd.f32 %v456_v20, %v2924_v61  ;;  %v458_v24 = vpop.f32.mrb[7].mxu0  ;;  %vm485_vm7 = vcmp.gt.f32.partialorder %v2948_v13, 0.0 }
 0x12d   : > { %v507_v28 = vmul.f32 1.442695, %v2965_v19  ;;  %v2985_v29 = vadd.f32 %v458_v24, %v2928_v62  ;;  %vm486_vm8 = vcmp.gt.f32.partialorder %v2965_v19, 0.0 }
 0x12e   : > { %2639 = vpow2.f32 %v505_v22  ;;  %v509_v32 = vmul.f32 1.442695, %v2974_v23  ;;  %vm487_vm9 = vcmp.gt.f32.partialorder %v2974_v23, 0.0 }
 0x12f   : > { %2641 = vpow2.f32 %v507_v28  ;;  %v511_v36 = vmul.f32 1.442695, %v2985_v29  ;;  %v5655_v28 = vmov 0  ;;  %vm488_vm10 = vcmp.gt.f32.partialorder %v2985_v29, 0.0 }
 0x130   : > { %v2632_v37 = vpop.eup %2631  ;;  %2643 = vpow2.f32 %v509_v32  ;;  %v5656_v28 = vsel %vm3073_vm6, 4294967295, %v5655_v28 }
 0x131   : > { %v2634_v41 = vpop.eup %2633  ;;  %v2392_v42 = vadd.f32 -1.0, %v2632_v37  ;;  %2645 = vpow2.f32 %v511_v36  ;;  %v462_v43 = vpop.f32.mrb[8].mxu0  ;;  %5657 = vst [vmem:[#allocation11_spill] sm:$0xff] %v5656_v28 }
 0x132   : > { %v2636_v46 = vpop.eup %2635  ;;  %v2393_v47 = vadd.f32 -1.0, %v2634_v41  ;;  %v464_v48 = vpop.f32.mrb[9].mxu0 }
 0x133   : > { %v2638_v51 = vpop.eup %2637  ;;  %v3022_v52 = vsel %vm481_vm1, %v2931_v0, %v2392_v42  ;;  %v2394_v53 = vadd.f32 -1.0, %v2636_v46  ;;  %v3025_v54 = vpop.f32.mrb[10].mxu0  ;;  %v3038_v0 = vadd.f32 %v462_v43, %v2924_v61 }
 0x134   : > { %v3032_v63 = vmul.f32 %v2959_v17, %v3022_v52  ;;  %v1239_v1 = vmul.f32 %v2981_v27, %v3022_v52  ;;  %v3040_v3 = vpop.f32.mrb[11].mxu0  ;;  %686 = vrot.lane.b32.xlu0 %v3022_v52, %s2753_s19  ;;  %v3045_v4 = vsel %vm482_vm2, %v2934_v2, %v2393_v47  ;;  %v2395_v7 = vadd.f32 -1.0, %v2638_v51 }
 0x135   : > { %v3048_v6 = vsel %vm483_vm3, %v2938_v5, %v2394_v53  ;;  %v3053_v10 = vmul.f32 %v2981_v27, %v3045_v4  ;;  %v1231_v11 = vmul.f32 %v2959_v17, %v3045_v4  ;;  %734 = vrot.lane.b32.xlu1 %v3045_v4, %s2753_s19  ;;  %v5520_v12 = vrot.slane %v3022_v52, 7 }
 0x136   : > { %5652 = vst [vmem:[#allocation8_spill] sm:$0xff] %v3032_v63  ;;  %v888_v15 = vrot.slane %v3048_v6, 7  ;;  %v3071_v25 = vsel %vm484_vm5, %v2942_v8, %v2395_v7  ;;  %v513_v32 = vmul.f32 1.442695, %v3038_v0  ;;  %v5519_v37 = vrot.slane %v3045_v4, 7 }
 0x137   : > { %5653 = vst [vmem:[#allocation9_spill] sm:$0xff] %v3053_v10  ;;  %v3068_v24 = vadd.f32 %v1239_v1, %v1231_v11  ;;  %v912_v8 = vrot.slane %v3071_v25, 7  ;;  %v3090_v47 = vadd.f32 %v464_v48, %v2928_v62  ;;  %v5516_v56 = vrot.slane %v3048_v6, 1 }
 0x138   : > { %v2640_v20 = vpop.eup %2639  ;;  %710 = vrot.lane.b32.xlu0 %v3022_v52, %s2754_s20  ;;  %v3085_v41 = vsel %vm790_vm0, %v5520_v12, %v888_v15  ;;  %2647 = vpow2.f32 %v513_v32  ;;  %vm489_vm11 = vcmp.gt.f32.partialorder %v3038_v0, 0.0  ;;  %v3206_v40 = vadd.f32 %v3040_v3, %v2928_v62 }
 0x139   : > { %5654 = vst [vmem:[#allocation10_spill] sm:$0xff] %v3068_v24  ;;  %v2642_v36 = vpop.eup %2641  ;;  %v472_v34 = vpop.f32.mrb[12].mxu0  ;;  %v2396_v43 = vadd.f32 -1.0, %v2640_v20  ;;  %736 = vrot.lane.b32.xlu1 %v3071_v25, %s2753_s19  ;;  %v3098_v1 = vsel %vm790_vm0, %v5519_v37, %v912_v8  ;;  %vm490_vm13 = vcmp.gt.f32.partialorder %v3090_v47, 0.0 }
 0x13a   : > { %v2644_v42 = vpop.eup %2643  ;;  %v2397_v46 = vadd.f32 -1.0, %v2642_v36  ;;  %v474_v51 = vpop.f32.mrb[13].mxu0  ;;  %v3217_v14 = vadd.f32 %v472_v34, %v2924_v61  ;;  %vm492_vm15 = vcmp.gt.f32.partialorder %v3206_v40, 0.0 }
 0x13b   : > { %v2646_v53 = vpop.eup %2645  ;;  %v2398_v7 = vadd.f32 -1.0, %v2644_v42  ;;  %v476_v11 = vpop.f32.mrb[14].mxu0  ;;  %v3103_v48 = vsel %vm485_vm7, %v2948_v13, %v2396_v43  ;;  %v5518_v13 = vrot.slane %v3071_v25, 1 }
 0x13c   : > { %5658 = vst [vmem:[#allocation12_spill] sm:$0xff] %v3103_v48  ;;  %v3106_v20 = vsel %vm486_vm8, %v2965_v19, %v2397_v46  ;;  %v2399_v32 = vadd.f32 -1.0, %v2646_v53  ;;  %v478_v36 = vpop.f32.mrb[15].mxu0  ;;  %758 = vrot.lane.b32.xlu0 %v3045_v4, %s2754_s20  ;;  %v889_v42 = vrot.slane %v3103_v48, 7  ;;  %v5515_v2 = vrot.slane %v3103_v48, 1 }
 0x13d   : > { %5659 = vst [vmem:[#allocation13_spill] sm:$0xff] %v3106_v20  ;;  %v913_v19 = vrot.slane %v3106_v20, 7  ;;  %v5517_v43 = vrot.slane %v3106_v20, 1  ;;  %v515_v46 = vmul.f32 1.442695, %v3090_v47  ;;  %760 = vrot.lane.b32.xlu1 %v3071_v25, %s2754_s20  ;;  %v3134_v5 = vsel %vm487_vm9, %v2974_v23, %v2398_v7 }
 0x13e   : > { %v3123_v53 = vsel %vm790_vm0, %v888_v15, %v889_v42  ;;  %v1477_v22 = vsel %vm1351_vm4, %v5516_v56, %v5515_v2  ;;  %v3139_v45 = vsel %vm488_vm10, %v2985_v29, %v2399_v32  ;;  %v890_v56 = vrot.slane %v3134_v5, 7 }
 0x13f   : > { %5660 = vst [vmem:[#allocation14_spill] sm:$0xff] %v3139_v45  ;;  %v3143_v15 = vsel %vm790_vm0, %v912_v8, %v913_v19  ;;  %v1501_v2 = vsel %vm1351_vm4, %v5518_v13, %v5517_v43  ;;  %v3154_v23 = vadd.f32 %v3025_v54, %v2924_v61  ;;  %v3161_v8 = vmul.f32 %v2959_v17, %v3048_v6 }
 0x140   : > { %688 = vrot.lane.b32.xlu0 %v3048_v6, %s2753_s19  ;;  %v3165_v7 = vmul.f32 %v2981_v27, %v3048_v6  ;;  %v3170_v32 = vmul.f32 %v2981_v27, %v3071_v25  ;;  %v1232_v54 = vmul.f32 %v2959_v17, %v3071_v25  ;;  %v3176_v43 = vsel %vm790_vm0, %v889_v42, %v890_v56 }
 0x141   : > { %5661 = vst [vmem:[#allocation15_spill] sm:$0xff] %v3161_v8  ;;  %v5523_v29 = vrot.slane %v3139_v45, 7  ;;  %738 = vrot.lane.b32.xlu1 %v3106_v20, %s2753_s19  ;;  %v3183_v13 = vmul.f32 %v2959_v17, %v3103_v48  ;;  %v3187_v37 = vmul.f32 %v2981_v27, %v3103_v48  ;;  %v3191_v12 = vsel %vm3073_vm6, %v1477_v22, 0.0 }
 0x142   : > { %5662 = vst [vmem:[#allocation16_spill] sm:$0xff] %v3170_v32  ;;  %2649 = vpow2.f32 %v515_v46  ;;  %v2648_v42 = vpop.eup %2647  ;;  %v3195_v18 = vsel %vm3073_vm6, %v1501_v2, 0.0  ;;  %v517_v9 = vmul.f32 1.442695, %v3154_v23  ;;  %v5664_v22 = vand.u32 15, %v2978_v26 }
 0x143   : > { %5663 = vst [vmem:[#allocation17_spill] sm:$0xff] %v3183_v13  ;;  %v3201_v49 = vsel %vm790_vm0, %v913_v19, %v5523_v29  ;;  %v5665_v2 = vmov 0  ;;  %v2400_v46 = vadd.f32 -1.0, %v2648_v42  ;;  %v3220_v19 = vadd.f32 %v474_v51, %v2928_v62 }
 0x144   : > { %712 = vrot.lane.b32.xlu0 %v3048_v6, %s2754_s20  ;;  %vm3212_vm12 = vcmp.ge.s32.totalorder %v5664_v22, 1  ;;  %v3223_v29 = vadd.f32 %v476_v11, %v2924_v61  ;;  %v3227_v3 = vmul.f32 %v2981_v27, %v3106_v20  ;;  %2651 = vpow2.f32 %v517_v9 }
 0x145   : > { %v5666_v2 = vsel %vm3212_vm12, 4294967295, %v5665_v2  ;;  %v519_v26 = vmul.f32 1.442695, %v3206_v40  ;;  %v3231_v22 = vadd.f32 %v478_v36, %v2928_v62  ;;  %762 = vrot.lane.b32.xlu1 %v3106_v20, %s2754_s20  ;;  %v3237_v34 = vmul.f32 %v2993_v31, %v3191_v12 }
 0x146   : > { %5667 = vst [vmem:[#allocation18_spill] sm:$0xff] %v5666_v2  ;;  %5668 = vst [vmem:[#allocation19_spill] sm:$0xff] %v3227_v3  ;;  %v1233_v61 = vmul.f32 %v2959_v17, %v3106_v20  ;;  %v3244_v51 = vsel %vm489_vm11, %v3038_v0, %v2400_v46  ;;  %v521_v62 = vmul.f32 1.442695, %v3217_v14  ;;  %v3250_v9 = vmul.f32 %v3002_v35, %v3195_v18 }
 0x147   : > { %5669 = vst [vmem:[#allocation20_spill] sm:$0xff] %v3237_v34  ;;  %v3254_v11 = vmul.f32 %v2959_v17, %v3134_v5  ;;  %v3258_v36 = vmul.f32 %v2981_v27, %v3134_v5  ;;  %v5528_v42 = vrot.slane %v3244_v51, 7  ;;  %2653 = vpow2.f32 %v519_v26 }
 0x148   : > { %5670 = vst [vmem:[#allocation21_spill] sm:$0xff] %v3250_v9  ;;  %690 = vrot.lane.b32.xlu0 %v3103_v48, %s2753_s19  ;;  %v523_v46 = vmul.f32 1.442695, %v3220_v19  ;;  %v525_v24 = vmul.f32 1.442695, %v3223_v29  ;;  %v3268_v10 = vmul.f32 %v2981_v27, %v3139_v45  ;;  %2655 = vpow2.f32 %v521_v62 }
 0x149   : > { %5671 = vst [vmem:[#allocation22_spill] sm:$0xff] %v3254_v11  ;;  %v3274_v63 = vsel %vm790_vm0, %v890_v56, %v5528_v42  ;;  %v527_v28 = vmul.f32 1.442695, %v3231_v22  ;;  %740 = vrot.lane.b32.xlu1 %v3139_v45, %s2753_s19  ;;  %v3281_v26 = vmul.f32 %v2959_v17, %v3139_v45  ;;  %vm491_vm14 = vcmp.gt.f32.partialorder %v3154_v23, 0.0 }
 0x14a   : > { %5672 = vst [vmem:[#allocation23_spill] sm:$0xff] %v3268_v10  ;;  %2657 = vpow2.f32 %v523_v46  ;;  %v3289_v56 = vmul.f32 %v3009_v39, %v3098_v1  ;;  %v968_v62 = vmul.f32 %v3006_v38, %v3098_v1  ;;  %v3295_v42 = vmul.f32 %v3006_v38, %v3085_v41 }
 0x14b   : > { %2659 = vpow2.f32 %v525_v24  ;;  %v3299_v0 = vmul.f32 %v2959_v17, %v3244_v51  ;;  %v976_v24 = vmul.f32 %v3009_v39, %v3085_v41  ;;  %v3311_v58 = vadd.f32 %v3165_v7, %v1232_v54 }
 0x14c   : > { %714 = vrot.lane.b32.xlu0 %v3103_v48, %s2754_s20  ;;  %5673 = vst [vmem:[#allocation24_spill] sm:$0xff] %v3289_v56  ;;  %5674 = vst [vmem:[#allocation25_spill] sm:$0xff] %v3295_v42  ;;  %v2650_v21 = vpop.eup %2649  ;;  %2661 = vpow2.f32 %v527_v28  ;;  %vm493_vm1 = vcmp.gt.f32.partialorder %v3217_v14, 0.0  ;;  %vm494_vm2 = vcmp.gt.f32.partialorder %v3220_v19, 0.0  ;;  %v929_v41 = vsel %vm3212_vm12, %v3143_v15, 0.0 }
 0x14d   : > { %5675 = vst [vmem:[#allocation26_spill] sm:$0xff] %v3299_v0  ;;  %v2401_v46 = vadd.f32 -1.0, %v2650_v21  ;;  %764 = vrot.lane.b32.xlu1 %v3139_v45, %s2754_s20  ;;  %5676 = vst [vmem:[#allocation27_spill] sm:$0xff] %v3311_v58  ;;  %v3315_v28 = vadd.f32 %v976_v24, %v968_v62  ;;  %v905_v21 = vsel %vm3212_vm12, %v3123_v53, 0.0  ;;  %v3336_v53 = vmul.f32 %v3009_v39, %v929_v41 }
 0x14e   : > { %v2652_v1 = vpop.eup %2651  ;;  %v3333_v54 = vmul.f32 %v3006_v38, %v905_v21  ;;  %v969_v15 = vmul.f32 %v3006_v38, %v929_v41  ;;  %v3341_v62 = vmul.f32 %v2981_v27, %v3244_v51  ;;  %vm495_vm3 = vcmp.gt.f32.partialorder %v3223_v29, 0.0 }
 0x14f   : > { %5677 = vst [vmem:[#allocation28_spill] sm:$0xff] %v3315_v28  ;;  %v3328_v7 = vsel %vm490_vm13, %v3090_v47, %v2401_v46  ;;  %5679 = vst [vmem:[#allocation30_spill] sm:$0xff] %v3336_v53  ;;  %v2402_v16 = vadd.f32 -1.0, %v2652_v1  ;;  %v977_v41 = vmul.f32 %v3009_v39, %v905_v21  ;;  %v3354_v13 = vadd.f32 %v3187_v37, %v1233_v61 }
 0x150   : > { %692 = vrot.lane.b32.xlu0 %v3134_v5, %s2753_s19  ;;  %5678 = vst [vmem:[#allocation29_spill] sm:$0xff] %v3333_v54  ;;  %v915_v47 = vrot.slane %v3328_v7, 7  ;;  %v3347_v46 = vmul.f32 %v2981_v27, %v3328_v7  ;;  %v5682_v24 = vrot.slane %v3139_v45, 7  ;;  %v3366_v8 = vmul.f32 %v3006_v38, %v3176_v43 }
 0x151   : > { %5681 = vst [vmem:[#allocation32_spill] sm:$0xff] %v3354_v13  ;;  %v2654_v58 = vpop.eup %2653  ;;  %v3370_v21 = vmul.f32 %v3009_v39, %v3201_v49  ;;  %v3374_v61 = vmul.f32 %v2959_v17, %v3328_v7  ;;  %vm496_vm5 = vcmp.gt.f32.partialorder %v3231_v22, 0.0  ;;  %v3382_v1 = vadd.f32 %v977_v41, %v969_v15 }
 0x152   : > { %5680 = vst [vmem:[#allocation31_spill] sm:$0xff] %v3347_v46  ;;  %v3360_v32 = vsel %vm790_vm0, %v5682_v24, %v915_v47  ;;  %5683 = vst [vmem:[#allocation33_spill] sm:$0xff] %v3366_v8  ;;  %v2656_v37 = vpop.eup %2655  ;;  %v3379_v24 = vsel %vm491_vm14, %v3154_v23, %v2402_v16  ;;  %v2403_v3 = vadd.f32 -1.0, %v2654_v58  ;;  %v5686_v13 = vand.u32 15, %v2907_v57 }
 0x153   : > { %5684 = vst [vmem:[#allocation34_spill] sm:$0xff] %v3370_v21  ;;  %5685 = vst [vmem:[#allocation35_spill] sm:$0xff] %v3382_v1  ;;  %v892_v54 = vrot.slane %v3379_v24, 7  ;;  %v3394_v16 = vmul.f32 %v2959_v17, %v3379_v24  ;;  %v970_v58 = vmul.f32 %v3006_v38, %v3201_v49  ;;  %v5690_v23 = vand.u32 15, %v2997_v33 }
 0x154   : > { %vm3386_vm7 = vcmp.ge.s32.totalorder %v5686_v13, 1  ;;  %v2658_v34 = vpop.eup %2657  ;;  %v5691_v15 = vmov 0  ;;  %v3407_v41 = vsel %vm492_vm15, %v3206_v40, %v2403_v3  ;;  %v2404_v53 = vadd.f32 -1.0, %v2656_v37 }
 0x155   : > { %5689 = vst [vmem:[#allocation36_spill] sm:$0xff] %v3394_v16  ;;  %vm3400_vm8 = vcmp.ge.s32.totalorder %v5690_v23, 1  ;;  %v2660_v13 = vpop.eup %2659  ;;  %v2405_v1 = vadd.f32 -1.0, %v2658_v34  ;;  %v5694_v49 = vrot.slane %v3244_v51, 7  ;;  %v3419_v23 = vmul.f32 %v2981_v27, %v3379_v24 }
 0x156   : > { %v5692_v15 = vsel %vm3400_vm8, 4294967295, %v5691_v15  ;;  %v2662_v28 = vpop.eup %2661  ;;  %v916_v40 = vrot.slane %v3407_v41, 7  ;;  %v3425_v3 = vmul.f32 %v2981_v27, %v3407_v41  ;;  %v3430_v34 = vsel %vm493_vm1, %v3217_v14, %v2404_v53 }
 0x157   : > { %5693 = vst [vmem:[#allocation37_spill] sm:$0xff] %v5692_v15  ;;  %v3415_v33 = vsel %vm790_vm0, %v5694_v49, %v892_v54  ;;  %5696 = vst [vmem:[#allocation39_spill] sm:$0xff] %v3430_v34  ;;  %v3435_v37 = vsel %vm494_vm2, %v3220_v19, %v2405_v1  ;;  %v2406_v49 = vadd.f32 -1.0, %v2660_v13  ;;  %v3441_v56 = vmul.f32 %v2959_v17, %v3407_v41  ;;  %v5827_v15 = vld [vmem:[#allocation16_spill] sm:$0xff] }
 0x158   : > { %5695 = vst [vmem:[#allocation38_spill] sm:$0xff] %v3425_v3  ;;  %v921_v2 = vsel %vm790_vm0, %v915_v47, %v916_v40  ;;  %v893_v8 = vrot.slane %v3430_v34, 7  ;;  %v5697_v14 = vand.u32 15, %v3028_v55  ;;  %v5698_v53 = vmov 0 }
 0x159   : > { %v3453_v19 = vmul.f32 %v2959_v17, %v3430_v34  ;;  %v3457_v47 = vmul.f32 %v2981_v27, %v3430_v34  ;;  %v917_v13 = vrot.slane %v3435_v37, 7  ;;  %v3465_v55 = vmul.f32 %v2981_v27, %v3435_v37 }
 0x15a   : > { %vm3447_vm9 = vcmp.ge.s32.totalorder %v5697_v14, 1  ;;  %v896_v21 = vsel %vm790_vm0, %v892_v54, %v893_v8  ;;  %v3470_v14 = vsel %vm495_vm3, %v3223_v29, %v2406_v49  ;;  %v2407_v42 = vadd.f32 -1.0, %v2662_v28 }
 0x15b   : > { %v5699_v53 = vsel %vm3447_vm9, 4294967295, %v5698_v53  ;;  %5701 = vst [vmem:[#allocation41_spill] sm:$0xff] %v3453_v19  ;;  %5702 = vst [vmem:[#allocation42_spill] sm:$0xff] %v3465_v55  ;;  %v920_v60 = vsel %vm790_vm0, %v916_v40, %v917_v13  ;;  %v3476_v1 = vmul.f32 %v2959_v17, %v3435_v37  ;;  %v894_v59 = vrot.slane %v3470_v14, 7  ;;  %724 = vrot.lane.b32.xlu1 %v3470_v14, %s2754_s20 }
 0x15c   : > { %5700 = vst [vmem:[#allocation40_spill] sm:$0xff] %v5699_v53  ;;  %v3481_v54 = vmul.f32 %v2959_v17, %v3470_v14  ;;  %700 = vrot.lane.b32.xlu0 %v3470_v14, %s2753_s19  ;;  %v1246_v29 = vmul.f32 %v2981_v27, %v3470_v14  ;;  %v3492_v28 = vsel %vm496_vm5, %v3231_v22, %v2407_v42  ;;  %v5704_v20 = vrot.slane %v3022_v52, 7 }
 0x15d   : > { %v978_v40 = vmul.f32 %v3009_v39, %v3176_v43  ;;  %v895_v34 = vsel %vm790_vm0, %v893_v8, %v894_v59  ;;  %v918_v48 = vrot.slane %v3492_v28, 7  ;;  %v3507_v22 = vmul.f32 %v2981_v27, %v3492_v28 }
 0x15e   : > { %5703 = vst [vmem:[#allocation43_spill] sm:$0xff] %v3481_v54  ;;  %v902_v45 = vsel %vm790_vm0, %v894_v59, %v5704_v20  ;;  %v1238_v43 = vmul.f32 %v2959_v17, %v3492_v28  ;;  %v5706_v59 = vrot.slane %v3045_v4, 7  ;;  %v907_v17 = vsel %vm3400_vm8, %v3274_v63, 0.0  ;;  %v5744_v54 = vld [vmem:[#allocation12_spill] sm:$0xff] }
 0x15f   : > { %5705 = vst [vmem:[#allocation44_spill] sm:$0xff] %v3507_v22  ;;  %v3512_v49 = vadd.f32 %v978_v40, %v970_v58  ;;  %v903_v8 = vsel %vm3386_vm7, %v902_v45, 0.0  ;;  %v919_v10 = vsel %vm790_vm0, %v917_v13, %v918_v48  ;;  %748 = vrot.lane.b32.xlu1 %v3492_v28, %s2753_s19  ;;  %v3545_v27 = vadd.f32 %v3258_v36, %v3281_v26 }
 0x160   : > { %v926_v20 = vsel %vm790_vm0, %v918_v48, %v5706_v59  ;;  %716 = vrot.lane.b32.xlu0 %v3134_v5, %s2754_s20  ;;  %v3531_v45 = vadd.f32 %v1246_v29, %v1238_v43  ;;  %v3536_v48 = vmul.f32 %v3006_v38, %v903_v8  ;;  %v975_v13 = vmul.f32 %v3009_v39, %v903_v8 }
 0x161   : > { %v927_v58 = vsel %vm3386_vm7, %v926_v20, 0.0  ;;  %5708 = vst [vmem:[#allocation46_spill] sm:$0xff] %v3545_v27  ;;  %v931_v63 = vsel %vm3400_vm8, %v3360_v32, 0.0  ;;  %v3551_v29 = vmul.f32 %v3006_v38, %v907_v17  ;;  %v979_v20 = vmul.f32 %v3009_v39, %v907_v17 }
 0x162   : > { %5707 = vst [vmem:[#allocation45_spill] sm:$0xff] %v3531_v45  ;;  %v3540_v40 = vmul.f32 %v3009_v39, %v927_v58  ;;  %v967_v59 = vmul.f32 %v3006_v38, %v927_v58  ;;  %v3554_v43 = vmul.f32 %v3009_v39, %v931_v63  ;;  %v971_v8 = vmul.f32 %v3006_v38, %v931_v63 }
 0x163   : > { %5709 = vst [vmem:[#allocation47_spill] sm:$0xff] %v3551_v29  ;;  %772 = vrot.lane.b32.xlu1 %v3492_v28, %s2754_s20  ;;  %v5711_v26 = vand.u32 15, %v2988_v30  ;;  %v5712_v58 = vmov 0  ;;  %v3574_v17 = vmul.f32 %v3006_v38, %v3415_v33  ;;  %v909_v63 = vsel %vm3447_vm9, %v896_v21, 0.0  ;;  %v2609_v29 = vld [vmem:[%s5511_s1 + $0x104] ss:$8 sps:$4 sm:$0xff]  }
 0x164   : > { %5710 = vst [vmem:[#allocation48_spill] sm:$0xff] %v3554_v43  ;;  %694 = vrot.lane.b32.xlu0 %v3244_v51, %s2753_s19  ;;  %v3564_v32 = vadd.f32 %v975_v13, %v967_v59  ;;  %v3580_v22 = vadd.f32 %v979_v20, %v971_v8  ;;  %v3583_v13 = vmul.f32 %v3009_v39, %v921_v2  ;;  %v1471_v21 = vrot.slane %v3470_v14, 1 }
 0x165   : > { %vm3568_vm10 = vcmp.lt.s32.totalorder %v5711_v26, 15  ;;  %5715 = vst [vmem:[#allocation50_spill] sm:$0xff] %v3574_v17  ;;  %v972_v30 = vmul.f32 %v3006_v38, %v921_v2  ;;  %v980_v59 = vmul.f32 %v3009_v39, %v3415_v33  ;;  %v3592_v36 = vadd.f32 %v3341_v62, %v3374_v61 }
 0x166   : > { %v5713_v58 = vsel %vm3568_vm10, 4294967295, %v5712_v58  ;;  %5716 = vst [vmem:[#allocation51_spill] sm:$0xff] %v3580_v22  ;;  %5717 = vst [vmem:[#allocation52_spill] sm:$0xff] %v3583_v13  ;;  %v3600_v20 = vadd.f32 %v3419_v23, %v3441_v56  ;;  %v5720_v2 = vand.u32 15, %v3019_v50  ;;  %v5721_v33 = vmov 0 }
 0x167   : > { %5714 = vst [vmem:[#allocation49_spill] sm:$0xff] %v5713_v58  ;;  %5718 = vst [vmem:[#allocation53_spill] sm:$0xff] %v3592_v36  ;;  %v933_v62 = vsel %vm3447_vm9, %v920_v60, 0.0  ;;  %v3611_v61 = vmul.f32 %v3006_v38, %v909_v63  ;;  %742 = vrot.lane.b32.xlu1 %v3328_v7, %s2753_s19  ;;  %v3618_v56 = vadd.f32 %v980_v59, %v972_v30  ;;  %v5729_v8 = vand.u32 15, %v3013_v44 }
 0x168   : > { %5719 = vst [vmem:[#allocation54_spill] sm:$0xff] %v3600_v20  ;;  %vm3604_vm11 = vcmp.lt.s32.totalorder %v5720_v2, 15  ;;  %696 = vrot.lane.b32.xlu0 %v3379_v24, %s2753_s19  ;;  %v3621_v50 = vmul.f32 %v3006_v38, %v895_v34  ;;  %v3624_v23 = vmul.f32 %v3009_v39, %v933_v62  ;;  %v3627_v60 = vmul.f32 %v3009_v39, %v919_v10 }
 0x169   : > { %v5722_v33 = vsel %vm3604_vm11, 4294967295, %v5721_v33  ;;  %5724 = vst [vmem:[#allocation56_spill] sm:$0xff] %v3611_v61  ;;  %5725 = vst [vmem:[#allocation57_spill] sm:$0xff] %v3618_v56  ;;  %v973_v2 = vmul.f32 %v3006_v38, %v933_v62  ;;  %v974_v14 = vmul.f32 %v3006_v38, %v919_v10  ;;  %v981_v26 = vmul.f32 %v3009_v39, %v909_v63 }
 0x16a   : > { %5723 = vst [vmem:[#allocation55_spill] sm:$0xff] %v5722_v33  ;;  %5726 = vst [vmem:[#allocation58_spill] sm:$0xff] %v3621_v50  ;;  %vm3634_vm13 = vcmp.lt.s32.totalorder %v5729_v8, 15  ;;  %v982_v42 = vmul.f32 %v3009_v39, %v895_v34  ;;  %v3645_v62 = vadd.f32 %v3457_v47, %v3476_v1  ;;  %v5734_v10 = vrot.slane %v3048_v6, 1 }
 0x16b   : > { %5727 = vst [vmem:[#allocation59_spill] sm:$0xff] %v3624_v23  ;;  %5728 = vst [vmem:[#allocation60_spill] sm:$0xff] %v3627_v60  ;;  %v3649_v44 = vadd.f32 %v981_v26, %v973_v2  ;;  %v5735_v63 = vrot.slane %v3022_v52, 1  ;;  %v5736_v39 = vrot.slane %v3071_v25, 1  ;;  %v5737_v34 = vrot.slane %v3045_v4, 1  ;;  %744 = vrot.lane.b32.xlu1 %v3407_v41, %s2753_s19 }
 0x16c   : > { %5732 = vst [vmem:[#allocation61_spill] sm:$0xff] %v3645_v62  ;;  %v1495_v1 = vrot.slane %v3492_v28, 1  ;;  %718 = vrot.lane.b32.xlu0 %v3244_v51, %s2754_s20  ;;  %v3668_v6 = vadd.f32 %v982_v42, %v974_v14  ;;  %v5741_v14 = vrot.slane %v3244_v51, 1  ;;  %v5745_v59 = vrot.slane %v5744_v54, 1  ;;  %v5752_v54 = vld [vmem:[#allocation13_spill] sm:$0xff] }
 0x16d   : > { %5733 = vst [vmem:[#allocation62_spill] sm:$0xff] %v3649_v44  ;;  %v1478_v8 = vsel %vm1351_vm4, %v5735_v63, %v5734_v10  ;;  %v1502_v47 = vsel %vm1351_vm4, %v5737_v34, %v5736_v39  ;;  %v1545_v10 = vmul.f32 %v2993_v31, %v3195_v18  ;;  %v1553_v63 = vmul.f32 %v3002_v35, %v3191_v12  ;;  %v5747_v12 = vld [vmem:[#allocation14_spill] sm:$0xff] }
 0x16e   : > { %5738 = vst [vmem:[#allocation63_spill] sm:$0xff] %v3668_v6  ;;  %v3671_v26 = vmul.f32 %v2993_v31, %v1478_v8  ;;  %v3674_v25 = vmul.f32 %v3002_v35, %v1502_v47  ;;  %v1544_v2 = vmul.f32 %v2993_v31, %v1502_v47  ;;  %v1552_v28 = vmul.f32 %v3002_v35, %v1478_v8  ;;  %v2603_v23 = vld [vmem:[%s5511_s1 + $0x1e0] ss:$8 sps:$4 sm:$0xff]  }
 0x16f   : > { %v5742_v39 = vrot.slane %v3134_v5, 1  ;;  %v5746_v8 = vrot.slane %v3328_v7, 1  ;;  %v5748_v38 = vrot.slane %v5747_v12, 1  ;;  %766 = vrot.lane.b32.xlu1 %v3328_v7, %s2754_s20  ;;  %v5760_v45 = vrot.slane %v3407_v41, 1 }
 0x170   : > { %5739 = vst [vmem:[#allocation64_spill] sm:$0xff] %v3671_v26  ;;  %5740 = vst [vmem:[#allocation65_spill] sm:$0xff] %v3674_v25  ;;  %v3702_v25 = vadd.f32 %v1552_v28, %v1544_v2  ;;  %v3704_v26 = vadd.f32 %v1553_v63, %v1545_v10  ;;  %720 = vrot.lane.b32.xlu0 %v3379_v24, %s2754_s20 }
 0x171   : > { %v1475_v34 = vsel %vm1351_vm4, %v5742_v39, %v5741_v14  ;;  %v5743_v47 = vmov %v5742_v39  ;;  %v1499_v42 = vsel %vm1351_vm4, %v5748_v38, %v5746_v8  ;;  %v5751_v5 = vmov %v5748_v38 }
 0x172   : > { %v1476_v18 = vsel %vm1351_vm4, %v5745_v59, %v5743_v47  ;;  %5749 = vst [vmem:[#allocation12_spill] sm:$0xff] %v3702_v25  ;;  %5750 = vst [vmem:[#allocation14_spill] sm:$0xff] %v3704_v26  ;;  %v1483_v14 = vsel %vm3568_vm10, %v1475_v34, 0.0  ;;  %v5753_v39 = vrot.slane %v5752_v54, 1  ;;  %v1507_v38 = vsel %vm3568_vm10, %v1499_v42, 0.0  ;;  %v5754_v34 = vld [vmem:[#allocation39_spill] sm:$0xff] }
 0x173   : > { %v1554_v10 = vmul.f32 %v3002_v35, %v1476_v18  ;;  %v1555_v28 = vmul.f32 %v3002_v35, %v1483_v14  ;;  %v1547_v63 = vmul.f32 %v2993_v31, %v1507_v38  ;;  %v5755_v47 = vrot.slane %v5754_v34, 1  ;;  %768 = vrot.lane.b32.xlu1 %v3407_v41, %s2754_s20 }
 0x174   : > { %v1500_v59 = vsel %vm1351_vm4, %v5753_v39, %v5751_v5  ;;  %v5756_v8 = vrot.slane %v3379_v24, 1  ;;  %v5758_v54 = vrot.slane %v3244_v51, 1  ;;  %v5759_v39 = vrot.slane %v3435_v37, 1  ;;  %698 = vrot.lane.b32.xlu0 %v5754_v34, %s2753_s19 }
 0x175   : > { %v1546_v2 = vmul.f32 %v2993_v31, %v1500_v59  ;;  %v5763_v24 = vrot.slane %v3328_v7, 1 }
 0x176   : > { %v1473_v12 = vsel %vm1351_vm4, %v5756_v8, %v5755_v47  ;;  %v5757_v5 = vmov %v5756_v8  ;;  %v1497_v62 = vsel %vm1351_vm4, %v5760_v45, %v5759_v39  ;;  %v5762_v47 = vmov %v5760_v45 }
 0x177   : > { %v1474_v42 = vsel %vm1351_vm4, %v5758_v54, %v5757_v5  ;;  %v3742_v55 = vadd.f32 %v1554_v10, %v1546_v2  ;;  %v1485_v19 = vsel %vm3604_vm11, %v1473_v12, 0.0  ;;  %v1498_v51 = vsel %vm1351_vm4, %v5763_v24, %v5762_v47  ;;  %746 = vrot.lane.b32.xlu1 %v3435_v37, %s2753_s19 }
 0x178   : > { %v1509_v8 = vsel %vm3604_vm11, %v1497_v62, 0.0  ;;  %v3754_v5 = vadd.f32 %v1555_v28, %v1547_v63  ;;  %v1548_v54 = vmul.f32 %v2993_v31, %v1498_v51  ;;  %v1556_v2 = vmul.f32 %v3002_v35, %v1474_v42  ;;  %722 = vrot.lane.b32.xlu0 %v5754_v34, %s2754_s20 }
 0x179   : > { %5761 = vst [vmem:[#allocation13_spill] sm:$0xff] %v3742_v55  ;;  %v1549_v45 = vmul.f32 %v2993_v31, %v1509_v8  ;;  %v1557_v7 = vmul.f32 %v3002_v35, %v1485_v19  ;;  %v5765_v10 = vrot.slane %v5754_v34, 1  ;;  %v5766_v28 = vrot.slane %v3022_v52, 1  ;;  %v5789_v34 = vld [vmem:[#allocation6_spill] sm:$0xff] }
 0x17a   : > { %5764 = vst [vmem:[#allocation39_spill] sm:$0xff] %v3754_v5  ;;  %v3772_v12 = vadd.f32 %v1556_v2, %v1548_v54  ;;  %v1496_v47 = vsel %vm1351_vm4, %v5759_v39, %v1495_v1  ;;  %v5768_v24 = vrot.slane %v3045_v4, 1  ;;  %v3796_v4 = vmul.f32 %v2993_v31, %v1483_v14 }
 0x17b   : > { %v1472_v62 = vsel %vm1351_vm4, %v5765_v10, %v1471_v21  ;;  %v1479_v63 = vsel %vm1351_vm4, %v1471_v21, %v5766_v28  ;;  %v3784_v5 = vadd.f32 %v1557_v7, %v1549_v45  ;;  %v1550_v21 = vmul.f32 %v2993_v31, %v1496_v47  ;;  %770 = vrot.lane.b32.xlu1 %v3435_v37, %s2754_s20  ;;  %v2586_v37 = vld [vmem:[%s5511_s1 + $0x194] ss:$8 sps:$4 sm:$0xff]  }
 0x17c   : > { %5767 = vst [vmem:[#allocation66_spill] sm:$0xff] %v3772_v12  ;;  %v1487_v41 = vsel %vm3634_vm13, %v1479_v63, 0.0  ;;  %v1503_v10 = vsel %vm1351_vm4, %v1495_v1, %v5768_v24  ;;  %v1558_v54 = vmul.f32 %v3002_v35, %v1472_v62  ;;  %v3793_v63 = vmul.f32 %v2993_v31, %v1476_v18  ;;  %5771 = vst [vmem:[#allocation69_spill] sm:$0xff] %v3796_v4  ;;  %v2597_v4 = vld [vmem:[%s5511_s1 + $0x1c0] ss:$8 sps:$4 sm:$0xff]  }
 0x17d   : > { %5769 = vst [vmem:[#allocation67_spill] sm:$0xff] %v3784_v5  ;;  %v1511_v52 = vsel %vm3634_vm13, %v1503_v10, 0.0  ;;  %v1559_v28 = vmul.f32 %v3002_v35, %v1487_v41  ;;  %v3805_v45 = vmul.f32 %v3002_v35, %v1500_v59  ;;  %v3808_v7 = vmul.f32 %v3002_v35, %v1507_v38  ;;  %v5788_v59 = vld [vmem:[#allocation2_spill] sm:$0xff]  ;;  %v2598_v12 = vld [vmem:[%s5511_s1 + $0x1d4] ss:$8 sps:$4 sm:$0xff]  }
 0x17e   : > { %v1551_v2 = vmul.f32 %v2993_v31, %v1511_v52  ;;  %5770 = vst [vmem:[#allocation68_spill] sm:$0xff] %v3793_v63  ;;  %v3802_v1 = vadd.f32 %v1558_v54, %v1550_v21  ;;  %v3813_v18 = vmul.f32 %v2993_v31, %v1474_v42  ;;  %v3816_v14 = vmul.f32 %v2993_v31, %v1485_v19 }
 0x17f   : > { %5773 = vst [vmem:[#allocation71_spill] sm:$0xff] %v3805_v45  ;;  %5774 = vst [vmem:[#allocation72_spill] sm:$0xff] %v3808_v7  ;;  %v3819_v24 = vmul.f32 %v3002_v35, %v1498_v51  ;;  %v3826_v38 = vmul.f32 %v3002_v35, %v1509_v8  ;;  %v3829_v10 = vmul.f32 %v2993_v31, %v1472_v62  ;;  %v5786_v62 = vld [vmem:[#allocation4_spill] sm:$0xff] }
 0x180   : > { %5772 = vst [vmem:[#allocation70_spill] sm:$0xff] %v3802_v1  ;;  %v3810_v39 = vadd.f32 %v1559_v28, %v1551_v2  ;;  %5776 = vst [vmem:[#allocation74_spill] sm:$0xff] %v3813_v18  ;;  %v3834_v19 = vmul.f32 %v2993_v31, %v1487_v41  ;;  %v3837_v51 = vmul.f32 %v3002_v35, %v1496_v47  ;;  %v2583_v31 = vld [vmem:[%s5511_s1 + $0x184] ss:$8 sps:$4 sm:$0xff]   ;;  %v2588_v41 = vld [vmem:[%s5511_s1 + $0x190] ss:$8 sps:$4 sm:$0xff]  }
 0x181   : > { %5777 = vst [vmem:[#allocation75_spill] sm:$0xff] %v3816_v14  ;;  %5778 = vst [vmem:[#allocation76_spill] sm:$0xff] %v3819_v24  ;;  %v3840_v21 = vmul.f32 %v3002_v35, %v1511_v52  ;;  %v2585_v35 = vld [vmem:[%s5511_s1 + $0x180] ss:$8 sps:$4 sm:$0xff]   ;;  %1905 = vmatprep.subr.bf16.mxu1 %v2583_v31  ;;  %v2589_v47 = vld [vmem:[%s5511_s1 + $0x1a4] ss:$8 sps:$4 sm:$0xff]   ;;  %v5784_v31 = vlaneseq }
 0x182   : > { %5775 = vst [vmem:[#allocation73_spill] sm:$0xff] %v3810_v39  ;;  %5779 = vst [vmem:[#allocation77_spill] sm:$0xff] %v3826_v38  ;;  %1906 = vmatpush1.bf16.msra.mxu1 %v2585_v35  ;;  %v2591_v52 = vld [vmem:[%s5511_s1 + $0x1a0] ss:$8 sps:$4 sm:$0xff]   ;;  %v2592_v2 = vld [vmem:[%s5511_s1 + $0x1b4] ss:$8 sps:$4 sm:$0xff]  }
 0x183   : > { %5780 = vst [vmem:[#allocation78_spill] sm:$0xff] %v3829_v10  ;;  %5781 = vst [vmem:[#allocation79_spill] sm:$0xff] %v3834_v19  ;;  %1907 = vmatprep.subr.bf16.mxu1 %v2586_v37  ;;  %v2594_v28 = vld [vmem:[%s5511_s1 + $0x1b0] ss:$8 sps:$4 sm:$0xff]   ;;  %v3875_v35 = vand.u32 127, %v5784_v31  ;;  %v1129_v37 = vsub.s32 6, %v2907_v57 }
 0x184   : > { %5782 = vst [vmem:[#allocation80_spill] sm:$0xff] %v3837_v51  ;;  %5783 = vst [vmem:[#allocation81_spill] sm:$0xff] %v3840_v21  ;;  %v3899_v21 = vrot.slane %v5789_v34, %v5788_v59  ;;  %v5790_v19 = vld [vmem:[#allocation7_spill] sm:$0xff] }
 0x185   : > { %vm684_vm14 = vcmp.ge.s32.totalorder %v3875_v35, 8  ;;  %v3884_v8 = vrot.slane %v5786_v62, %v1129_v37  ;;  %vm685_vm15 = vcmp.lt.s32.totalorder %v3875_v35, 120  ;;  %v2595_v38 = vld [vmem:[%s5511_s1 + $0x1c4] ss:$8 sps:$4 sm:$0xff]  }
 0x186   : > { %1908 = vmatpush1.bf16.msra.mxu1 %v2588_v41  ;;  %v5980_v35 = vld [vmem:[#allocation10_spill] sm:$0xff] }
 0x187   : > { %1909 = vmatprep.subr.bf16.mxu1 %v2589_v47  ;;  %v833_v47 = vsub.s32 3, %v2907_v57 }
 0x189   : > { %v3944_v1 = vrot.slane %v5789_v34, %v833_v47  ;;  %v3953_v25 = vrot.slane %v5790_v19, %v833_v47 }
 0x18a   : > { %1910 = vmatpush1.bf16.msra.mxu1 %v2591_v52  ;;  %v5785_v52 = vld [vmem:[#allocation3_spill] sm:$0xff] }
 0x18b   : > { %1911 = vmatprep.subr.bf16.mxu1 %v2592_v2  ;;  %v3881_v54 = vrot.slane %v5785_v52, %v1129_v37  ;;  %v3887_v2 = vsub.s32 1, %v2907_v57  ;;  %v3903_v37 = vrot.slane %v5790_v19, %v5788_v59  ;;  %v3907_v10 = vrot.slane %v5785_v52, %v833_v47 }
 0x18d   : > { %5787 = vst [vmem:[#allocation3_spill] sm:$0xff] %v3887_v2  ;;  %v3926_v24 = vrot.slane %v5789_v34, %v3887_v2  ;;  %v3930_v18 = vrot.slane %v5790_v19, %v3887_v2 }
 0x18e   : > { %1912 = vmatpush1.bf16.msra.mxu1 %v2594_v28 }
 0x18f   : > { %1913 = vmatprep.subr.bf16.mxu1 %v2595_v38 }
 0x192   : > { %1914 = vmatpush1.bf16.msra.mxu1 %v2597_v4 }
 0x193   : > { %1915 = vmatprep.subr.bf16.mxu1 %v2598_v12 }
 0x1a6   : > { %v687_v41 = vpop.permute.xlu0 %686 }
 0x1a7   : > { %v735_v42 = vpop.permute.xlu1 %734  ;;  %v3891_v28 = vsel %vm684_vm14, %v687_v41, 0.0  ;;  %v3910_v41 = vrot.slane %v5786_v62, %v833_v47 }
 0x1a8   : > { %v3895_v31 = vsel %vm684_vm14, %v735_v42, 0.0  ;;  %v1057_v42 = vsub.s32 5, %v2907_v57  ;;  %v3918_v14 = vmul.f32 %v3881_v54, %v3891_v28  ;;  %v1167_v45 = vmul.f32 %v3884_v8, %v3891_v28 }
 0x1a9   : > { %v3922_v59 = vmul.f32 %v3884_v8, %v3895_v31  ;;  %v1159_v63 = vmul.f32 %v3881_v54, %v3895_v31  ;;  %v5796_v19 = vrot.slane %v3895_v31, 7  ;;  %v5807_v13 = vrot.slane %v3891_v28, 1 }
 0x1aa   : > { %v711_v51 = vpop.permute.xlu0 %710  ;;  %5791 = vst [vmem:[#allocation4_spill] sm:$0xff] %v3918_v14  ;;  %v3961_v38 = vrot.slane %v5785_v52, %v1057_v42  ;;  %v2600_v52 = vld [vmem:[%s5511_s1 + $0x1d0] ss:$8 sps:$4 sm:$0xff]  }
 0x1ab   : > { %5792 = vst [vmem:[#allocation2_spill] sm:$0xff] %v3922_v59  ;;  %v737_v7 = vpop.permute.xlu1 %736  ;;  %v3948_v2 = vsel %vm685_vm15, %v711_v51, 0.0  ;;  %v3964_v51 = vrot.slane %v5786_v62, %v1057_v42  ;;  %v3977_v62 = vadd.f32 %v1167_v45, %v1159_v63  ;;  %v5798_v45 = vrot.slane %v3895_v31, 1  ;;  %1916 = vmatpush1.bf16.msra.mxu1 %v2600_v52 }
 0x1ac   : > { %v3941_v39 = vsel %vm684_vm14, %v737_v7, 0.0  ;;  %v3982_v5 = vmul.f32 %v3899_v21, %v3948_v2 }
 0x1ad   : > { %5793 = vst [vmem:[#allocation6_spill] sm:$0xff] %v3977_v62  ;;  %v5795_v4 = vrot.slane %v3941_v39, 7  ;;  %v5797_v63 = vrot.slane %v3941_v39, 1  ;;  %v1160_v52 = vmul.f32 %v3881_v54, %v3941_v39 }
 0x1ae   : > { %v759_v55 = vpop.permute.xlu0 %758  ;;  %5794 = vst [vmem:[#allocation7_spill] sm:$0xff] %v3982_v5 }
 0x1af   : > { %v3958_v34 = vsel %vm685_vm15, %v759_v55, 0.0  ;;  %v761_v7 = vpop.permute.xlu1 %760  ;;  %v821_v47 = vsel %vm790_vm0, %v5796_v19, %v5795_v4  ;;  %v1311_v55 = vmul.f32 %v3903_v37, %v3948_v2  ;;  %v1382_v42 = vsel %vm1351_vm4, %v5798_v45, %v5797_v63  ;;  %v2601_v45 = vld [vmem:[%s5511_s1 + $0x1e4] ss:$8 sps:$4 sm:$0xff]  }
 0x1b0   : > { %v4000_v26 = vmul.f32 %v3903_v37, %v3958_v34  ;;  %v4004_v44 = vsel %vm685_vm15, %v761_v7, 0.0  ;;  %v4009_v4 = vmul.f32 %v3884_v8, %v3941_v39  ;;  %v848_v61 = vmul.f32 %v3910_v41, %v821_v47  ;;  %1917 = vmatprep.subr.bf16.mxu1 %v2601_v45 }
 0x1b1   : > { %v864_v7 = vmul.f32 %v3907_v10, %v821_v47  ;;  %v4028_v63 = vmul.f32 %v3930_v18, %v1382_v42  ;;  %v1424_v33 = vmul.f32 %v3926_v24, %v1382_v42  ;;  %v1303_v20 = vmul.f32 %v3899_v21, %v3958_v34  ;;  %1918 = vmatpush1.bf16.msra.mxu1 %v2603_v23  ;;  %v2604_v23 = vld [vmem:[%s5511_s1 + $0x1f4] ss:$8 sps:$4 sm:$0xff]  }
 0x1b2   : > { %5799 = vst [vmem:[#allocation82_spill] sm:$0xff] %v4000_v26  ;;  %v689_v19 = vpop.permute.xlu0 %688  ;;  %v4040_v3 = vmul.f32 %v3903_v37, %v4004_v44  ;;  %v5801_v6 = vrot.slane %v4004_v44, 7  ;;  %v5802_v60 = vrot.slane %v3958_v34, 7  ;;  %v5803_v42 = vrot.slane %v3891_v28, 7  ;;  %1919 = vmatprep.subr.bf16.mxu1 %v2604_v23 }
 0x1b3   : > { %v4022_v12 = vsel %vm684_vm14, %v689_v19, 0.0  ;;  %5800 = vst [vmem:[#allocation83_spill] sm:$0xff] %v4028_v63  ;;  %v739_v50 = vpop.permute.xlu1 %738  ;;  %v5804_v36 = vrot.slane %v4004_v44, 1  ;;  %v5805_v0 = vrot.slane %v3958_v34, 1  ;;  %v4088_v22 = vadd.f32 %v1311_v55, %v1303_v20 }
 0x1b4   : > { %v5591_v47 = vrot.slane %v4022_v12, 7  ;;  %v1045_v45 = vsel %vm790_vm0, %v5802_v60, %v5801_v6  ;;  %v1132_v53 = vmul.f32 %v3881_v54, %v4022_v12  ;;  %v4064_v6 = vsel %vm684_vm14, %v739_v50, 0.0 }
 0x1b5   : > { %v1622_v56 = vsel %vm1351_vm4, %v5805_v0, %v5804_v36  ;;  %v5806_v50 = vrot.slane %v4022_v12, 1  ;;  %v5599_v17 = vrot.slane %v4064_v6, 7  ;;  %5808 = vst [vmem:[#allocation84_spill] sm:$0xff] %v4088_v22  ;;  %v1072_v43 = vmul.f32 %v3964_v51, %v1045_v45 }
 0x1b6   : > { %v713_v16 = vpop.permute.xlu0 %712  ;;  %v797_v19 = vsel %vm790_vm0, %v5803_v42, %v5591_v47  ;;  %v2606_v47 = vld [vmem:[%s5511_s1 + $0x1f0] ss:$8 sps:$4 sm:$0xff]   ;;  %v1304_v0 = vmul.f32 %v3899_v21, %v4004_v44  ;;  %v1088_v55 = vmul.f32 %v3961_v38, %v1045_v45  ;;  %v4103_v23 = vmul.f32 %v3953_v25, %v1622_v56 }
 0x1b7   : > { %v836_v46 = vmul.f32 %v3907_v10, %v797_v19  ;;  %v872_v60 = vmul.f32 %v3910_v41, %v797_v19  ;;  %v4068_v42 = vsel %vm685_vm15, %v713_v16, 0.0  ;;  %v1168_v19 = vmul.f32 %v3884_v8, %v4022_v12  ;;  %1920 = vmatpush1.bf16.msra.mxu1 %v2606_v47 }
 0x1b8   : > { %v1358_v16 = vsel %vm1351_vm4, %v5807_v13, %v5806_v50  ;;  %v5600_v20 = vrot.slane %v4068_v42, 7  ;;  %5810 = vst [vmem:[#allocation86_spill] sm:$0xff] %v4103_v23  ;;  %2058 = vmatprep.subr.bf16.mxu1 %v2609_v29  ;;  %v5813_v45 = vrot.slane %v3948_v2, 7  ;;  %v763_v13 = vpop.permute.xlu1 %762  ;;  %v5815_v29 = vld [vmem:[#allocation24_spill] sm:$0xff]  ;;  %v5604_v58 = vrot.slane %v4068_v42, 1 }
 0x1b9   : > { %v856_v36 = vsub.f32 %v836_v46, %v848_v61  ;;  %v880_v26 = vadd.f32 %v872_v60, %v864_v7  ;;  %v4097_v5 = vmul.f32 %v3926_v24, %v1358_v16  ;;  %v4106_v46 = vmul.f32 %v3944_v1, %v1622_v56 }
 0x1ba   : > { %v1152_v61 = vsub.f32 %v1132_v53, %v4009_v4  ;;  %v1176_v47 = vadd.f32 %v1168_v19, %v1160_v52  ;;  %v1432_v7 = vmul.f32 %v3930_v18, %v1358_v16  ;;  %v5812_v60 = vrot.slane %v3941_v39, 7  ;;  %v5814_v53 = vld [vmem:[#allocation25_spill] sm:$0xff] }
 0x1bb   : > { %5809 = vst [vmem:[#allocation85_spill] sm:$0xff] %v4097_v5  ;;  %5811 = vst [vmem:[#allocation87_spill] sm:$0xff] %v4106_v46  ;;  %v1021_v56 = vsel %vm790_vm0, %v5813_v45, %v5600_v20  ;;  %v5816_v4 = vsub.f32 %v5814_v53, %v5815_v29  ;;  %v4127_v19 = vmul.f32 %v3884_v8, %v4064_v6  ;;  %v5818_v20 = vrot.slane %v4064_v6, 1 }
 0x1bc   : > { %v820_v50 = vsel %vm790_vm0, %v5812_v60, %v5599_v17  ;;  %v4131_v16 = vmul.f32 %v3881_v54, %v4064_v6  ;;  %v1060_v60 = vmul.f32 %v3961_v38, %v1021_v56  ;;  %v5817_v17 = vld [vmem:[#allocation28_spill] sm:$0xff]  ;;  %v5819_v53 = vrot.slane %v3941_v39, 1 }
 0x1bd   : > { %v992_v52 = vadd.f32 %v5816_v4, %v856_v36  ;;  %v1000_v46 = vadd.f32 %v5817_v17, %v880_v26  ;;  %v1096_v29 = vmul.f32 %v3964_v51, %v1021_v56  ;;  %v825_v22 = vsel %vm3212_vm12, %v820_v50, 0.0 }
 0x1be   : > { %v1381_v36 = vsel %vm1351_vm4, %v5819_v53, %v5818_v20  ;;  %v1080_v62 = vsub.f32 %v1060_v60, %v1072_v43  ;;  %v4149_v17 = vsel %vm685_vm15, %v763_v13, 0.0  ;;  %v4151_v26 = vadd.f32 %v1432_v7, %v1424_v33  ;;  %v691_v53 = vpop.permute.xlu0 %690 }
 0x1bf   : > { %v1104_v45 = vadd.f32 %v1096_v29, %v1088_v55  ;;  %v1276_v39 = vmul.f32 %v3899_v21, %v4068_v42  ;;  %v5608_v20 = vrot.slane %v4149_v17, 7  ;;  %v1385_v63 = vsel %vm3073_vm6, %v1381_v36, 0.0 }
 0x1c0   : > { %5821 = vst [vmem:[#allocation25_spill] sm:$0xff] %v4151_v26  ;;  %v1112_v50 = vadd.f32 %v1080_v62, %v992_v52  ;;  %v5823_v43 = vrot.slane %v3948_v2, 1  ;;  %v849_v55 = vmul.f32 %v3910_v41, %v825_v22  ;;  %v1312_v60 = vmul.f32 %v3903_v37, %v4068_v42  ;;  %v5826_v26 = vld [vmem:[#allocation15_spill] sm:$0xff] }
 0x1c1   : > { %v1120_v7 = vadd.f32 %v1104_v45, %v1000_v46  ;;  %v5824_v36 = vrot.slane %v4004_v44, 7  ;;  %v865_v52 = vmul.f32 %v3907_v10, %v825_v22  ;;  %v1409_v46 = vmul.f32 %v3930_v18, %v1385_v63 }
 0x1c2   : > { %v1598_v13 = vsel %vm1351_vm4, %v5823_v43, %v5604_v58  ;;  %v1184_v29 = vadd.f32 %v1152_v61, %v1112_v50  ;;  %v4180_v58 = vsel %vm684_vm14, %v691_v53, 0.0  ;;  %v1425_v45 = vmul.f32 %v3926_v24, %v1385_v63  ;;  %v741_v63 = vpop.permute.xlu1 %740 }
 0x1c3   : > { %v1044_v62 = vsel %vm790_vm0, %v5824_v36, %v5608_v20  ;;  %v4176_v43 = vmul.f32 %v3944_v1, %v1598_v13  ;;  %v1192_v33 = vadd.f32 %v1176_v47, %v1120_v7  ;;  %v1296_v5 = vsub.f32 %v1276_v39, %v4040_v3  ;;  %v5831_v47 = vld [vmem:[#allocation27_spill] sm:$0xff] }
 0x1c4   : > { %v5828_v36 = vsub.f32 %v5826_v26, %v5827_v15  ;;  %v1049_v22 = vsel %vm3212_vm12, %v1044_v62, 0.0  ;;  %v5829_v61 = vrot.slane %v4149_v17, 1  ;;  %v5830_v50 = vrot.slane %v4004_v44, 1 }
 0x1c5   : > { %5825 = vst [vmem:[#allocation24_spill] sm:$0xff] %v4176_v43  ;;  %v5610_v59 = vrot.slane %v4180_v58, 7  ;;  %v1264_v7 = vadd.f32 %v5831_v47, %v1192_v33  ;;  %v1320_v3 = vadd.f32 %v1312_v60, %v1304_v0  ;;  %v4200_v15 = vmul.f32 %v3903_v37, %v4149_v17 }
 0x1c6   : > { %v1256_v20 = vadd.f32 %v5828_v36, %v1184_v29  ;;  %v1621_v53 = vsel %vm1351_vm4, %v5830_v50, %v5829_v61  ;;  %v4204_v26 = vmul.f32 %v3899_v21, %v4149_v17  ;;  %v4209_v39 = vmul.f32 %v3953_v25, %v1598_v13  ;;  %v765_v27 = vpop.permute.xlu1 %764 }
 0x1c7   : > { %v5833_v62 = vrot.slane %v4022_v12, 7  ;;  %v5614_v33 = vrot.slane %v4180_v58, 1  ;;  %v4219_v60 = vmul.f32 %v3964_v51, %v1049_v22  ;;  %v1625_v29 = vsel %vm3073_vm6, %v1621_v53, 0.0 }
 0x1c8   : > { %5832 = vst [vmem:[#allocation28_spill] sm:$0xff] %v4209_v39  ;;  %v4227_v13 = vsel %vm684_vm14, %v741_v63, 0.0  ;;  %v4233_v47 = vmul.f32 %v3881_v54, %v4180_v58  ;;  %v1089_v44 = vmul.f32 %v3961_v38, %v1049_v22  ;;  %v1169_v63 = vmul.f32 %v3884_v8, %v4180_v58 }
 0x1c9   : > { %v796_v0 = vsel %vm790_vm0, %v5833_v62, %v5610_v59  ;;  %v5834_v62 = vrot.slane %v4022_v12, 1  ;;  %v5616_v59 = vrot.slane %v4227_v13, 7  ;;  %v1328_v23 = vadd.f32 %v1296_v5, %v1256_v20 }
 0x1ca   : > { %v801_v36 = vsel %vm3212_vm12, %v796_v0, 0.0  ;;  %v715_v0 = vpop.permute.xlu0 %714  ;;  %v1649_v43 = vmul.f32 %v3953_v25, %v1625_v29  ;;  %v4255_v11 = vadd.f32 %v1320_v3, %v1264_v7  ;;  %v1153_v5 = vsub.f32 %v4233_v47, %v4127_v19  ;;  %v5842_v47 = vld [vmem:[#allocation30_spill] sm:$0xff] }
 0x1cb   : > { %v837_v61 = vmul.f32 %v3907_v10, %v801_v36  ;;  %v873_v50 = vmul.f32 %v3910_v41, %v801_v36  ;;  %v1357_v53 = vsel %vm1351_vm4, %v5834_v62, %v5614_v33  ;;  %v4253_v22 = vsel %vm685_vm15, %v715_v0, 0.0 }
 0x1cc   : > { %v1361_v36 = vsel %vm3073_vm6, %v1357_v53, 0.0  ;;  %5835 = vst [vmem:[#allocation18_spill] sm:$0xff] %v4255_v11  ;;  %v4258_v53 = vmul.f32 %v3944_v1, %v1625_v29  ;;  %v1177_v12 = vadd.f32 %v1169_v63, %v4131_v16  ;;  %v4271_v7 = vmul.f32 %v3884_v8, %v4227_v13 }
 0x1cd   : > { %v1397_v39 = vmul.f32 %v3926_v24, %v1361_v36  ;;  %v857_v14 = vsub.f32 %v837_v61, %v849_v55  ;;  %v881_v62 = vadd.f32 %v873_v50, %v865_v52  ;;  %v1433_v33 = vmul.f32 %v3930_v18, %v1361_v36  ;;  %v5841_v50 = vld [vmem:[#allocation29_spill] sm:$0xff]  ;;  %v5844_v36 = vld [vmem:[#allocation35_spill] sm:$0xff] }
 0x1ce   : > { %5836 = vst [vmem:[#allocation11_spill] sm:$0xff] %v4258_v53  ;;  %v5837_v55 = vrot.slane %v4064_v6, 7  ;;  %v4275_v3 = vmul.f32 %v3881_v54, %v4227_v13  ;;  %v5838_v19 = vrot.slane %v4227_v13, 1  ;;  %v5839_v16 = vrot.slane %v4064_v6, 1 }
 0x1cf   : > { %v1417_v20 = vsub.f32 %v1397_v39, %v1409_v46  ;;  %v5618_v39 = vrot.slane %v4253_v22, 7  ;;  %v4286_v61 = vsel %vm685_vm15, %v765_v27, 0.0  ;;  %v5843_v0 = vsub.f32 %v5841_v50, %v5842_v47  ;;  %v5847_v50 = vld [vmem:[#allocation20_spill] sm:$0xff] }
 0x1d0   : > { %v819_v52 = vsel %vm790_vm0, %v5837_v55, %v5616_v59  ;;  %v1380_v46 = vsel %vm1351_vm4, %v5839_v16, %v5838_v19  ;;  %5840 = vst [vmem:[#allocation15_spill] sm:$0xff] %v4286_v61  ;;  %v1001_v55 = vadd.f32 %v5844_v36, %v881_v62  ;;  %v5846_v27 = vrot.slane %v4068_v42, 7  ;;  %v5994_v57 = vld [vmem:[#allocation28_spill] sm:$0xff] }
 0x1d1   : > { %v1449_v29 = vadd.f32 %v1417_v20, %v1328_v23  ;;  %v993_v63 = vadd.f32 %v5843_v0, %v857_v14  ;;  %v4292_v23 = vadd.f32 %v1433_v33, %v1425_v45  ;;  %v5617_v20 = vrot.slane %v4253_v22, 1  ;;  %v5848_v14 = vld [vmem:[#allocation21_spill] sm:$0xff] }
 0x1d2   : > { %v4296_v6 = vmul.f32 %v3910_v41, %v819_v52  ;;  %v866_v19 = vmul.f32 %v3907_v10, %v819_v52  ;;  %v1020_v16 = vsel %vm790_vm0, %v5846_v27, %v5618_v39  ;;  %v5849_v47 = vsub.f32 %v5847_v50, %v5848_v14  ;;  %v725_v14 = vpop.permute.xlu1 %724 }
 0x1d3   : > { %5845 = vst [vmem:[#allocation16_spill] sm:$0xff] %v4292_v23  ;;  %v4309_v45 = vmul.f32 %v3930_v18, %v1380_v46  ;;  %v1025_v33 = vsel %vm3212_vm12, %v1020_v16, 0.0  ;;  %v1277_v52 = vmul.f32 %v3899_v21, %v4253_v22  ;;  %v5851_v0 = vrot.slane %v4068_v42, 1  ;;  %v693_v16 = vpop.permute.xlu0 %692 }
 0x1d4   : > { %v1569_v62 = vadd.f32 %v5849_v47, %v1449_v29  ;;  %v1061_v27 = vmul.f32 %v3961_v38, %v1025_v33  ;;  %v1097_v29 = vmul.f32 %v3964_v51, %v1025_v33  ;;  %v4327_v47 = vmul.f32 %v3926_v24, %v1380_v46 }
 0x1d5   : > { %5850 = vst [vmem:[#allocation27_spill] sm:$0xff] %v4309_v45  ;;  %v1597_v36 = vsel %vm1351_vm4, %v5851_v0, %v5617_v20  ;;  %v1313_v42 = vmul.f32 %v3903_v37, %v4253_v22  ;;  %v4336_v56 = vmul.f32 %v3903_v37, %v4286_v61  ;;  %v1297_v46 = vsub.f32 %v1277_v52, %v4200_v15 }
 0x1d6   : > { %v1601_v50 = vsel %vm3073_vm6, %v1597_v36, 0.0  ;;  %v1081_v20 = vsub.f32 %v1061_v27, %v4219_v60  ;;  %v1105_v33 = vadd.f32 %v1097_v29, %v1089_v44  ;;  %v4340_v36 = vmul.f32 %v3899_v21, %v4286_v61 }
 0x1d7   : > { %v1637_v59 = vmul.f32 %v3944_v1, %v1601_v50  ;;  %v4345_v4 = vsel %vm684_vm14, %v693_v16, 0.0  ;;  %v4349_v0 = vsel %vm685_vm15, %v725_v14, 0.0  ;;  %v5852_v27 = vrot.slane %v4286_v61, 7 }
 0x1d8   : > { %v1113_v44 = vadd.f32 %v1081_v20, %v993_v63  ;;  %v1121_v60 = vadd.f32 %v1105_v33, %v1001_v55  ;;  %v5853_v29 = vrot.slane %v4149_v17, 7  ;;  %v5619_v15 = vrot.slane %v4345_v4, 7  ;;  %v5861_v55 = vld [vmem:[#allocation32_spill] sm:$0xff] }
 0x1d9   : > { %v1657_v39 = vsub.f32 %v1637_v59, %v1649_v43  ;;  %v5855_v43 = vrot.slane %v4286_v61, 1  ;;  %v5856_v52 = vrot.slane %v4149_v17, 1  ;;  %v4368_v63 = vmul.f32 %v3881_v54, %v4345_v4  ;;  %v749_v17 = vpop.permute.xlu1 %748 }
 0x1da   : > { %v1043_v53 = vsel %vm790_vm0, %v5853_v29, %v5852_v27  ;;  %v1185_v20 = vadd.f32 %v1153_v5, %v1113_v44  ;;  %v1193_v14 = vadd.f32 %v1177_v12, %v1121_v60  ;;  %v701_v5 = vpop.permute.xlu0 %700  ;;  %v5858_v12 = vld [vmem:[#allocation17_spill] sm:$0xff]  ;;  %v5859_v44 = vld [vmem:[#allocation19_spill] sm:$0xff]  ;;  %v5863_v61 = vrot.slane %v4345_v4, 1 }
 0x1db   : > { %v4358_v59 = vadd.f32 %v1657_v39, %v1569_v62  ;;  %v1620_v16 = vsel %vm1351_vm4, %v5856_v52, %v5855_v43  ;;  %v5857_v39 = vrot.slane %v4180_v58, 7  ;;  %v1170_v43 = vmul.f32 %v3884_v8, %v4345_v4 }
 0x1dc   : > { %v5860_v60 = vsub.f32 %v5858_v12, %v5859_v44  ;;  %v1265_v23 = vadd.f32 %v5861_v55, %v1193_v14  ;;  %v5866_v14 = vrot.slane %v3948_v2, 7  ;;  %v5872_v44 = vld [vmem:[#allocation33_spill] sm:$0xff] }
 0x1dd   : > { %5854 = vst [vmem:[#allocation29_spill] sm:$0xff] %v4358_v59  ;;  %v795_v62 = vsel %vm790_vm0, %v5857_v39, %v5619_v15  ;;  %v1714_v33 = vmul.f32 1.442695, %v4358_v59  ;;  %v1321_v39 = vadd.f32 %v1313_v42, %v4204_v26  ;;  %v4389_v15 = vmul.f32 %v3964_v51, %v1043_v53 }
 0x1de   : > { %v838_v27 = vmul.f32 %v3907_v10, %v795_v62  ;;  %v874_v29 = vmul.f32 %v3910_v41, %v795_v62  ;;  %v1257_v52 = vadd.f32 %v5860_v60, %v1185_v20  ;;  %v4392_v59 = vmul.f32 %v3953_v25, %v1601_v50 }
 0x1df   : > { %v4395_v62 = vmul.f32 %v3961_v38, %v1043_v53  ;;  %v5864_v20 = vrot.slane %v4180_v58, 1  ;;  %v4405_v26 = vmul.f32 %v3953_v25, %v1620_v16  ;;  %v5867_v50 = vrot.slane %v4349_v0, 7 }
 0x1e0   : > { %5862 = vst [vmem:[#allocation30_spill] sm:$0xff] %v4392_v59  ;;  %v858_v11 = vsub.f32 %v838_v27, %v4296_v6  ;;  %v882_v42 = vadd.f32 %v874_v29, %v866_v19  ;;  %v4415_v6 = vsel %vm684_vm14, %v701_v5, 0.0  ;;  %2663 = vpow2.f32 %v1714_v33  ;;  %v5873_v33 = vld [vmem:[#allocation34_spill] sm:$0xff] }
 0x1e1   : > { %v1356_v55 = vsel %vm1351_vm4, %v5864_v20, %v5863_v61  ;;  %5865 = vst [vmem:[#allocation35_spill] sm:$0xff] %v4405_v26  ;;  %v1022_v53 = vsel %vm790_vm0, %v5867_v50, %v5866_v14  ;;  %v4418_v58 = vmul.f32 %v3944_v1, %v1620_v16  ;;  %v4423_v19 = vadd.f32 %v1170_v43, %v4275_v3 }
 0x1e2   : > { %v4425_v27 = vadd.f32 %v1297_v46, %v1257_v52  ;;  %v4427_v29 = vadd.f32 %v1321_v39, %v1265_v23  ;;  %v4430_v12 = vmul.f32 %v3926_v24, %v1356_v55  ;;  %v1434_v5 = vmul.f32 %v3930_v18, %v1356_v55  ;;  %v773_v39 = vpop.permute.xlu1 %772 }
 0x1e3   : > { %5868 = vst [vmem:[#allocation20_spill] sm:$0xff] %v4418_v58  ;;  %v5874_v60 = vsub.f32 %v5872_v44, %v5873_v33  ;;  %v1023_v20 = vsel %vm3386_vm7, %v1022_v53, 0.0  ;;  %v5624_v14 = vrot.slane %v4349_v0, 1  ;;  %v5625_v3 = vrot.slane %v4415_v6, 7 }
 0x1e4   : > { %5869 = vst [vmem:[#allocation21_spill] sm:$0xff] %v4425_v27  ;;  %5870 = vst [vmem:[#allocation17_spill] sm:$0xff] %v4427_v29  ;;  %v1002_v46 = vadd.f32 %v3512_v49, %v882_v42  ;;  %v4443_v23 = vmul.f32 %v3881_v54, %v4415_v6  ;;  %v5626_v43 = vrot.slane %v4415_v6, 1  ;;  %v4448_v52 = vsel %vm684_vm14, %v749_v17, 0.0 }
 0x1e5   : > { %5871 = vst [vmem:[#allocation19_spill] sm:$0xff] %v4430_v12  ;;  %v994_v16 = vadd.f32 %v5874_v60, %v858_v11  ;;  %v717_v11 = vpop.permute.xlu0 %716  ;;  %v5876_v55 = vrot.slane %v3948_v2, 1  ;;  %v5877_v49 = vrot.slane %v3891_v28, 7  ;;  %v5627_v53 = vrot.slane %v4448_v52, 7 }
 0x1e6   : > { %5875 = vst [vmem:[#allocation32_spill] sm:$0xff] %v4443_v23  ;;  %v4465_v17 = vmul.f32 %v3884_v8, %v4448_v52  ;;  %v4470_v44 = vadd.f32 %v1434_v5, %v4327_v47  ;;  %v4473_v33 = vmul.f32 %v3961_v38, %v1023_v20  ;;  %v4486_v2 = vsel %vm685_vm15, %v773_v39, 0.0 }
 0x1e7   : > { %v1599_v50 = vsel %vm1351_vm4, %v5624_v14, %v5876_v55  ;;  %v798_v42 = vsel %vm790_vm0, %v5625_v3, %v5877_v49  ;;  %v1095_v55 = vmul.f32 %v3964_v51, %v1023_v20  ;;  %v1174_v49 = vmul.f32 %v3884_v8, %v4415_v6 }
 0x1e8   : > { %5878 = vst [vmem:[#allocation33_spill] sm:$0xff] %v4465_v17  ;;  %5879 = vst [vmem:[#allocation34_spill] sm:$0xff] %v4470_v44  ;;  %v799_v60 = vsel %vm3386_vm7, %v798_v42, 0.0  ;;  %v4482_v14 = vsel %vm685_vm15, %v717_v11, 0.0  ;;  %v1607_v47 = vsel %vm3634_vm13, %v1599_v50, 0.0  ;;  %v5880_v5 = vrot.slane %v3891_v28, 1 }
 0x1e9   : > { %v5881_v42 = vrot.slane %v3895_v31, 7  ;;  %v835_v3 = vmul.f32 %v3907_v10, %v799_v60  ;;  %v1166_v50 = vmul.f32 %v3881_v54, %v4448_v52  ;;  %v4518_v39 = vmul.f32 %v3899_v21, %v4349_v0 }
 0x1ea   : > { %v1359_v20 = vsel %vm1351_vm4, %v5626_v43, %v5880_v5  ;;  %v871_v43 = vmul.f32 %v3910_v41, %v799_v60  ;;  %v5884_v60 = vrot.slane %v3895_v31, 1  ;;  %v5885_v45 = vrot.slane %v4448_v52, 1 }
 0x1eb   : > { %v822_v11 = vsel %vm790_vm0, %v5627_v53, %v5881_v42  ;;  %v4514_v53 = vpop.eup %2663  ;;  %5883 = vst [vmem:[#allocation89_spill] sm:$0xff] %v4518_v39  ;;  %v1367_v5 = vsel %vm3634_vm13, %v1359_v20, 0.0  ;;  %v4531_v42 = vmul.f32 %v3944_v1, %v1607_v47  ;;  %v5888_v12 = vrot.slane %v4482_v14, 7 }
 0x1ec   : > { %v823_v28 = vsel %vm3386_vm7, %v822_v11, 0.0  ;;  %5882 = vst [vmem:[#allocation88_spill] sm:$0xff] %v4514_v53  ;;  %v1318_v11 = vmul.f32 %v3903_v37, %v4349_v0  ;;  %v4534_v53 = vmul.f32 %v3953_v25, %v1607_v47  ;;  %v5889_v27 = vrot.slane %v4253_v22, 7 }
 0x1ed   : > { %v847_v61 = vmul.f32 %v3910_v41, %v823_v28  ;;  %v863_v26 = vmul.f32 %v3907_v10, %v823_v28  ;;  %v1383_v28 = vsel %vm1351_vm4, %v5885_v45, %v5884_v60  ;;  %5886 = vst [vmem:[#allocation90_spill] sm:$0xff] %v4531_v42  ;;  %v5630_v31 = vrot.slane %v4486_v2, 7 }
 0x1ee   : > { %5887 = vst [vmem:[#allocation91_spill] sm:$0xff] %v4534_v53  ;;  %v1019_v20 = vsel %vm790_vm0, %v5889_v27, %v5888_v12  ;;  %v1391_v44 = vsel %vm3634_vm13, %v1383_v28, 0.0  ;;  %v4548_v47 = vmul.f32 %v3926_v24, %v1367_v5  ;;  %v1439_v42 = vmul.f32 %v3930_v18, %v1367_v5 }
 0x1ef   : > { %v855_v58 = vsub.f32 %v835_v3, %v847_v61  ;;  %v1062_v45 = vmul.f32 %v3961_v38, %v1019_v20  ;;  %v1098_v60 = vmul.f32 %v3964_v51, %v1019_v20  ;;  %v879_v53 = vadd.f32 %v871_v43, %v863_v26 }
 0x1f0   : > { %5890 = vst [vmem:[#allocation92_spill] sm:$0xff] %v4548_v47  ;;  %v4551_v29 = vadd.f32 %v1174_v49, %v1166_v50  ;;  %v1278_v61 = vmul.f32 %v3899_v21, %v4482_v14  ;;  %v1314_v3 = vmul.f32 %v3903_v37, %v4482_v14  ;;  %v4560_v28 = vmul.f32 %v3930_v18, %v1391_v44 }
 0x1f1   : > { %v1082_v27 = vsub.f32 %v1062_v45, %v4389_v15  ;;  %v1106_v12 = vadd.f32 %v1098_v60, %v4395_v62  ;;  %v5893_v5 = vrot.slane %v3958_v34, 7  ;;  %v4571_v62 = vmul.f32 %v3903_v37, %v4486_v2  ;;  %v695_v60 = vpop.permute.xlu0 %694 }
 0x1f2   : > { %5891 = vst [vmem:[#allocation93_spill] sm:$0xff] %v4551_v29  ;;  %5892 = vst [vmem:[#allocation94_spill] sm:$0xff] %v4560_v28  ;;  %v5895_v26 = vsub.f32 %v3536_v48, %v3540_v40  ;;  %v1431_v49 = vmul.f32 %v3926_v24, %v1391_v44  ;;  %v999_v20 = vadd.f32 %v3564_v32, %v879_v53  ;;  %v5897_v9 = vrot.slane %v4482_v14, 1 }
 0x1f3   : > { %v1046_v15 = vsel %vm790_vm0, %v5630_v31, %v5893_v5  ;;  %5894 = vst [vmem:[#allocation95_spill] sm:$0xff] %v4571_v62  ;;  %v1114_v50 = vadd.f32 %v1082_v27, %v994_v16  ;;  %v1122_v45 = vadd.f32 %v1106_v12, %v1002_v46  ;;  %v5631_v31 = vrot.slane %v4486_v2, 1  ;;  %v743_v46 = vpop.permute.xlu1 %742  ;;  %v5902_v12 = vld [vmem:[#allocation46_spill] sm:$0xff]  ;;  %v5926_v5 = vld [vmem:[#allocation7_spill] sm:$0xff]  ;;  %v5932_v62 = vld [vmem:[#allocation48_spill] sm:$0xff] }
 0x1f4   : > { %v991_v43 = vadd.f32 %v5895_v26, %v855_v58  ;;  %v1047_v29 = vsel %vm3386_vm7, %v1046_v15, 0.0  ;;  %v5896_v59 = vsub.f32 %v4368_v63, %v4271_v7  ;;  %v1298_v32 = vsub.f32 %v1278_v61, %v4336_v56  ;;  %v5899_v63 = vld [vmem:[#allocation22_spill] sm:$0xff] }
 0x1f5   : > { %v1194_v40 = vadd.f32 %v4423_v19, %v1122_v45  ;;  %v1071_v58 = vmul.f32 %v3964_v51, %v1047_v29  ;;  %v1087_v16 = vmul.f32 %v3961_v38, %v1047_v29  ;;  %v5898_v53 = vrot.slane %v4253_v22, 1  ;;  %v5900_v19 = vld [vmem:[#allocation23_spill] sm:$0xff] }
 0x1f6   : > { %v1186_v48 = vadd.f32 %v5896_v59, %v1114_v50  ;;  %v1310_v7 = vmul.f32 %v3899_v21, %v4486_v2  ;;  %v4600_v59 = vsel %vm684_vm14, %v695_v60, 0.0  ;;  %v5901_v29 = vsub.f32 %v5899_v63, %v5900_v19 }
 0x1f7   : > { %v1596_v44 = vsel %vm1351_vm4, %v5898_v53, %v5897_v9  ;;  %v1266_v56 = vadd.f32 %v5902_v12, %v1194_v40  ;;  %v1079_v61 = vsub.f32 %v4473_v33, %v1071_v58  ;;  %v1103_v15 = vadd.f32 %v1095_v55, %v1087_v16  ;;  %v697_v55 = vpop.permute.xlu0 %696 }
 0x1f8   : > { %v1258_v27 = vadd.f32 %v5901_v29, %v1186_v48  ;;  %v1322_v22 = vadd.f32 %v1314_v3, %v4340_v36  ;;  %v5903_v26 = vrot.slane %v3958_v34, 1  ;;  %v786_v45 = vrot.slane %v4600_v59, 7 }
 0x1f9   : > { %v4617_v60 = vsel %vm684_vm14, %v743_v46, 0.0  ;;  %v4621_v33 = vadd.f32 %v1439_v42, %v1431_v49  ;;  %v4624_v36 = vmul.f32 %v3944_v1, %v1596_v44  ;;  %v1111_v34 = vadd.f32 %v1079_v61, %v991_v43  ;;  %v5909_v42 = vld [vmem:[#allocation4_spill] sm:$0xff]  ;;  %v5910_v49 = vld [vmem:[#allocation2_spill] sm:$0xff] }
 0x1fa   : > { %v1623_v50 = vsel %vm1351_vm4, %v5631_v31, %v5903_v26  ;;  %v4627_v3 = vmul.f32 %v3953_v25, %v1596_v44  ;;  %v4629_v40 = vadd.f32 %v1318_v11, %v1310_v7  ;;  %v5908_v58 = vrot.slane %v4345_v4, 7  ;;  %v5915_v61 = vld [vmem:[#allocation8_spill] sm:$0xff] }
 0x1fb   : > { %5904 = vst [vmem:[#allocation22_spill] sm:$0xff] %v4621_v33  ;;  %5905 = vst [vmem:[#allocation23_spill] sm:$0xff] %v4624_v36  ;;  %v1347_v46 = vrot.slane %v4600_v59, 1  ;;  %v1119_v9 = vadd.f32 %v1103_v15, %v999_v20  ;;  %v5911_v53 = vsub.f32 %v5909_v42, %v5910_v49  ;;  %v1631_v43 = vsel %vm3634_vm13, %v1623_v50, 0.0  ;;  %v5916_v15 = vld [vmem:[#allocation9_spill] sm:$0xff]  ;;  %v745_v49 = vpop.permute.xlu1 %744  ;;  %v5942_v33 = vld [vmem:[#allocation15_spill] sm:$0xff] }
 0x1fc   : > { %5906 = vst [vmem:[#allocation46_spill] sm:$0xff] %v4627_v3  ;;  %5907 = vst [vmem:[#allocation96_spill] sm:$0xff] %v4629_v40  ;;  %v794_v16 = vsel %vm790_vm0, %v5908_v58, %v786_v45  ;;  %v811_v44 = vrot.slane %v4617_v60, 7  ;;  %v4646_v7 = vmul.f32 %v3881_v54, %v4600_v59  ;;  %v5913_v29 = vrot.slane %v4345_v4, 1 }
 0x1fd   : > { %v1183_v63 = vadd.f32 %v5911_v53, %v1111_v34  ;;  %v803_v11 = vsel %vm3400_vm8, %v794_v16, 0.0  ;;  %v4654_v12 = vsel %vm684_vm14, %v697_v55, 0.0  ;;  %v4656_v30 = vadd.f32 %v1298_v32, %v1258_v27  ;;  %v5922_v53 = vld [vmem:[#allocation6_spill] sm:$0xff] }
 0x1fe   : > { %v1355_v20 = vsel %vm1351_vm4, %v5913_v29, %v1347_v46  ;;  %v5917_v26 = vsub.f32 %v5915_v61, %v5916_v15  ;;  %v1171_v34 = vmul.f32 %v3884_v8, %v4600_v59  ;;  %v5918_v58 = vrot.slane %v4227_v13, 7 }
 0x1ff   : > { %5914 = vst [vmem:[#allocation4_spill] sm:$0xff] %v4656_v30  ;;  %v4667_v16 = vadd.f32 %v1322_v22, %v1266_v56  ;;  %v4670_v42 = vmul.f32 %v3953_v25, %v1631_v43  ;;  %v1363_v32 = vsel %vm3568_vm10, %v1355_v20, 0.0  ;;  %v4680_v59 = vmul.f32 %v3944_v1, %v1631_v43 }
 0x200   : > { %v1255_v50 = vadd.f32 %v5917_v26, %v1183_v63  ;;  %v818_v4 = vsel %vm790_vm0, %v5918_v58, %v811_v44  ;;  %v4677_v63 = vadd.f32 %v5922_v53, %v1119_v9  ;;  %v839_v29 = vmul.f32 %v3907_v10, %v803_v11 }
 0x201   : > { %5919 = vst [vmem:[#allocation2_spill] sm:$0xff] %v4667_v16  ;;  %5920 = vst [vmem:[#allocation37_spill] sm:$0xff] %v4670_v42  ;;  %v827_v27 = vsel %vm3400_vm8, %v818_v4, 0.0  ;;  %v4685_v56 = vmul.f32 %v3884_v8, %v4617_v60  ;;  %v1163_v20 = vmul.f32 %v3881_v54, %v4617_v60  ;;  %v1372_v61 = vrot.slane %v4617_v60, 1 }
 0x202   : > { %5923 = vst [vmem:[#allocation8_spill] sm:$0xff] %v4680_v59  ;;  %v851_v22 = vmul.f32 %v3910_v41, %v827_v27  ;;  %v5635_v15 = vrot.slane %v4654_v12, 7  ;;  %v875_v9 = vmul.f32 %v3910_v41, %v803_v11  ;;  %v4694_v43 = vmul.f32 %v3926_v24, %v1363_v32 }
 0x203   : > { %v867_v26 = vmul.f32 %v3907_v10, %v827_v27  ;;  %v4699_v58 = vsel %vm684_vm14, %v745_v49, 0.0  ;;  %v5925_v4 = vrot.slane %v4227_v13, 1  ;;  %v5638_v11 = vrot.slane %v4654_v12, 1  ;;  %v5927_v27 = vld [vmem:[#allocation82_spill] sm:$0xff]  ;;  %v5931_v13 = vld [vmem:[#allocation47_spill] sm:$0xff] }
 0x204   : > { %5924 = vst [vmem:[#allocation9_spill] sm:$0xff] %v4694_v43  ;;  %v793_v60 = vsel %vm790_vm0, %v786_v45, %v5635_v15  ;;  %v5634_v48 = vrot.slane %v4699_v58, 7  ;;  %v5928_v31 = vsub.f32 %v5926_v5, %v5927_v27  ;;  %v1435_v49 = vmul.f32 %v3930_v18, %v1363_v32 }
 0x205   : > { %v1379_v53 = vsel %vm1351_vm4, %v5925_v4, %v1372_v61  ;;  %v859_v28 = vsub.f32 %v839_v29, %v851_v22  ;;  %v4721_v47 = vadd.f32 %v1171_v34, %v1163_v20  ;;  %v4725_v45 = vmul.f32 %v3881_v54, %v4654_v12  ;;  %v767_v29 = vpop.permute.xlu1 %766 }
 0x206   : > { %v4714_v42 = vadd.f32 %v5928_v31, %v1255_v50  ;;  %v1387_v4 = vsel %vm3568_vm10, %v1379_v53, 0.0  ;;  %v1172_v5 = vmul.f32 %v3884_v8, %v4654_v12  ;;  %v719_v31 = vpop.permute.xlu0 %718  ;;  %v883_v50 = vadd.f32 %v875_v9, %v867_v26 }
 0x207   : > { %v840_v32 = vmul.f32 %v3907_v10, %v793_v60  ;;  %v817_v27 = vsel %vm790_vm0, %v811_v44, %v5634_v48  ;;  %v4736_v34 = vmul.f32 %v3884_v8, %v4699_v58  ;;  %v4739_v22 = vmul.f32 %v3930_v18, %v1387_v4 }
 0x208   : > { %5929 = vst [vmem:[#allocation49_spill] sm:$0xff] %v4714_v42  ;;  %v1427_v20 = vmul.f32 %v3926_v24, %v1387_v4  ;;  %v1354_v9 = vsel %vm1351_vm4, %v1347_v46, %v5638_v11  ;;  %v852_v26 = vmul.f32 %v3910_v41, %v817_v27  ;;  %v876_v53 = vmul.f32 %v3910_v41, %v793_v60 }
 0x209   : > { %5930 = vst [vmem:[#allocation6_spill] sm:$0xff] %v4739_v22  ;;  %v868_v44 = vmul.f32 %v3907_v10, %v817_v27  ;;  %v4752_v15 = vsel %vm685_vm15, %v719_v31, 0.0  ;;  %v5933_v4 = vsub.f32 %v5931_v13, %v5932_v62  ;;  %v1164_v36 = vmul.f32 %v3881_v54, %v4699_v58  ;;  %v5934_v27 = vld [vmem:[#allocation51_spill] sm:$0xff] }
 0x20a   : > { %v1011_v46 = vrot.slane %v4752_v15, 7  ;;  %v4762_v60 = vsel %vm685_vm15, %v767_v29, 0.0  ;;  %v1003_v11 = vadd.f32 %v5934_v27, %v883_v50  ;;  %v4766_v48 = vmul.f32 %v3926_v24, %v1354_v9  ;;  %v721_v22 = vpop.permute.xlu0 %720 }
 0x20b   : > { %v995_v39 = vadd.f32 %v5933_v4, %v859_v28  ;;  %v860_v31 = vsub.f32 %v840_v32, %v852_v26  ;;  %v1588_v59 = vrot.slane %v4752_v15, 1  ;;  %v1436_v62 = vmul.f32 %v3930_v18, %v1354_v9 }
 0x20c   : > { %v5935_v4 = vrot.slane %v4699_v58, 1  ;;  %v4778_v50 = vadd.f32 %v1435_v49, %v1427_v20  ;;  %v884_v27 = vadd.f32 %v876_v53, %v868_v44  ;;  %v5937_v32 = vrot.slane %v4482_v14, 7  ;;  %v5939_v20 = vld [vmem:[#allocation50_spill] sm:$0xff]  ;;  %v5940_v53 = vld [vmem:[#allocation52_spill] sm:$0xff] }
 0x20d   : > { %v1035_v28 = vrot.slane %v4762_v60, 7  ;;  %v4785_v9 = vadd.f32 %v1172_v5, %v1164_v36  ;;  %v4791_v43 = vmul.f32 %v3899_v21, %v4752_v15  ;;  %v5941_v44 = vsub.f32 %v5939_v20, %v5940_v53  ;;  %v5944_v20 = vld [vmem:[#allocation57_spill] sm:$0xff] }
 0x20e   : > { %v1378_v29 = vsel %vm1351_vm4, %v1372_v61, %v5935_v4  ;;  %5936 = vst [vmem:[#allocation7_spill] sm:$0xff] %v4778_v50  ;;  %v1018_v26 = vsel %vm790_vm0, %v5937_v32, %v1011_v46  ;;  %v5938_v61 = vrot.slane %v4482_v14, 1  ;;  %v1315_v5 = vmul.f32 %v3903_v37, %v4752_v15 }
 0x20f   : > { %v1027_v13 = vsel %vm3400_vm8, %v1018_v26, 0.0  ;;  %v996_v4 = vadd.f32 %v5941_v44, %v860_v31  ;;  %v4801_v32 = vmul.f32 %v3930_v18, %v1378_v29  ;;  %v1428_v36 = vmul.f32 %v3926_v24, %v1378_v29  ;;  %v769_v26 = vpop.permute.xlu1 %768 }
 0x210   : > { %v1595_v49 = vsel %vm1351_vm4, %v5938_v61, %v1588_v59  ;;  %v1063_v30 = vmul.f32 %v3961_v38, %v1027_v13  ;;  %v1099_v14 = vmul.f32 %v3964_v51, %v1027_v13  ;;  %v5943_v40 = vrot.slane %v5942_v33, 7 }
 0x211   : > { %v1612_v31 = vrot.slane %v4762_v60, 1  ;;  %v1004_v53 = vadd.f32 %v5944_v20, %v884_v27  ;;  %v1603_v29 = vsel %vm3568_vm10, %v1595_v49, 0.0  ;;  %v4820_v44 = vsel %vm685_vm15, %v721_v22, 0.0 }
 0x212   : > { %v1042_v61 = vsel %vm790_vm0, %v5943_v40, %v1035_v28  ;;  %v1291_v40 = vmul.f32 %v3903_v37, %v4762_v60  ;;  %v4828_v27 = vsel %vm685_vm15, %v769_v26, 0.0  ;;  %v4832_v19 = vadd.f32 %v1436_v62, %v1428_v36 }
 0x213   : > { %v1051_v15 = vsel %vm3400_vm8, %v1042_v61, 0.0  ;;  %v5945_v61 = vrot.slane %v5942_v33, 1  ;;  %v5643_v20 = vrot.slane %v4820_v44, 7  ;;  %v4840_v3 = vmul.f32 %v3944_v1, %v1603_v29 }
 0x214   : > { %v1075_v13 = vmul.f32 %v3964_v51, %v1051_v15  ;;  %v1091_v42 = vmul.f32 %v3961_v38, %v1051_v15  ;;  %v699_v15 = vpop.permute.xlu0 %698  ;;  %v4843_v50 = vmul.f32 %v3953_v25, %v1603_v29  ;;  %v1307_v62 = vmul.f32 %v3899_v21, %v4762_v60 }
 0x215   : > { %v1619_v22 = vsel %vm1351_vm4, %v5945_v61, %v1612_v31  ;;  %5946 = vst [vmem:[#allocation82_spill] sm:$0xff] %v4840_v3  ;;  %v1017_v33 = vsel %vm790_vm0, %v1011_v46, %v5643_v20  ;;  %v5644_v36 = vrot.slane %v4820_v44, 1  ;;  %v5642_v61 = vrot.slane %v4828_v27, 7 }
 0x216   : > { %5947 = vst [vmem:[#allocation47_spill] sm:$0xff] %v4843_v50  ;;  %v1083_v26 = vsub.f32 %v1063_v30, %v1075_v13  ;;  %v1107_v16 = vadd.f32 %v1099_v14, %v1091_v42  ;;  %v1627_v29 = vsel %vm3568_vm10, %v1619_v22, 0.0  ;;  %v708_v30 = vsel %vm684_vm14, %v699_v15, 0.0 }
 0x217   : > { %v1064_v42 = vmul.f32 %v3961_v38, %v1017_v33  ;;  %v1100_v60 = vmul.f32 %v3964_v51, %v1017_v33  ;;  %v4861_v14 = vmul.f32 %v3899_v21, %v4820_v44  ;;  %v1316_v46 = vmul.f32 %v3903_v37, %v4820_v44 }
 0x218   : > { %v1115_v49 = vadd.f32 %v1083_v26, %v995_v39  ;;  %v1123_v17 = vadd.f32 %v1107_v16, %v1003_v11  ;;  %v1041_v39 = vsel %vm790_vm0, %v1035_v28, %v5642_v61  ;;  %v5948_v16 = vsub.f32 %v4646_v7, %v4685_v56  ;;  %v5949_v56 = vld [vmem:[#allocation26_spill] sm:$0xff]  ;;  %v5952_v26 = vld [vmem:[#allocation53_spill] sm:$0xff] }
 0x219   : > { %v1292_v13 = vmul.f32 %v3903_v37, %v4828_v27  ;;  %v1594_v22 = vsel %vm1351_vm4, %v1588_v59, %v5644_v36  ;;  %v1076_v15 = vmul.f32 %v3964_v51, %v1041_v39  ;;  %v1092_v28 = vmul.f32 %v3961_v38, %v1041_v39 }
 0x21a   : > { %v1187_v55 = vadd.f32 %v5948_v16, %v1115_v49  ;;  %v1195_v11 = vadd.f32 %v4721_v47, %v1123_v17  ;;  %v1308_v7 = vmul.f32 %v3899_v21, %v4828_v27  ;;  %v5950_v17 = vld [vmem:[#allocation31_spill] sm:$0xff]  ;;  %v1613_v16 = vrot.slane %v4828_v27, 1 }
 0x21b   : > { %v5951_v47 = vsub.f32 %v5949_v56, %v5950_v17  ;;  %v788_v61 = vrot.slane %v708_v30, 7  ;;  %v1299_v20 = vsub.f32 %v4791_v43, %v1291_v40  ;;  %v1323_v3 = vadd.f32 %v1315_v5, %v1307_v62  ;;  %v747_v40 = vpop.permute.xlu1 %746 }
 0x21c   : > { %v1267_v33 = vadd.f32 %v5952_v26, %v1195_v11  ;;  %v1084_v59 = vsub.f32 %v1064_v42, %v1076_v15  ;;  %v1108_v36 = vadd.f32 %v1100_v60, %v1092_v28  ;;  %v4890_v50 = vmul.f32 %v3953_v25, %v1627_v29  ;;  %v5958_v15 = vld [vmem:[#allocation38_spill] sm:$0xff] }
 0x21d   : > { %v1259_v49 = vadd.f32 %v5951_v47, %v1187_v55  ;;  %v4893_v39 = vmul.f32 %v3944_v1, %v1627_v29  ;;  %v4896_v23 = vmul.f32 %v3944_v1, %v1594_v22  ;;  %v1300_v55 = vsub.f32 %v4861_v14, %v1292_v13 }
 0x21e   : > { %v4900_v11 = vmul.f32 %v3953_v25, %v1594_v22  ;;  %v1116_v56 = vadd.f32 %v1084_v59, %v996_v4  ;;  %v1124_v17 = vadd.f32 %v1108_v36, %v1004_v53  ;;  %v5953_v43 = vrot.slane %v4654_v12, 7 }
 0x21f   : > { %v1331_v62 = vadd.f32 %v1299_v20, %v1259_v49  ;;  %v1339_v42 = vadd.f32 %v1323_v3, %v1267_v33  ;;  %v1324_v29 = vadd.f32 %v1316_v46, %v1308_v7  ;;  %v1618_v60 = vsel %vm1351_vm4, %v1612_v31, %v1613_v16  ;;  %v5960_v7 = vld [vmem:[#allocation54_spill] sm:$0xff]  ;;  %v723_v33 = vpop.permute.xlu0 %722 }
 0x220   : > { %v792_v5 = vsel %vm790_vm0, %v5953_v43, %v788_v61  ;;  %v5954_v14 = vsub.f32 %v4725_v45, %v4736_v34  ;;  %v1196_v4 = vadd.f32 %v4785_v9, %v1124_v17  ;;  %v4915_v53 = vmul.f32 %v3881_v54, %v708_v30  ;;  %v5957_v34 = vld [vmem:[#allocation36_spill] sm:$0xff] }
 0x221   : > { %v1173_v36 = vmul.f32 %v3884_v8, %v708_v30  ;;  %v5955_v20 = vrot.slane %v4415_v6, 7  ;;  %v805_v22 = vsel %vm3447_vm9, %v792_v5, 0.0  ;;  %v1349_v31 = vrot.slane %v708_v30, 1 }
 0x222   : > { %v1188_v13 = vadd.f32 %v5954_v14, %v1116_v56  ;;  %v756_v45 = vsel %vm684_vm14, %v747_v40, 0.0  ;;  %v5959_v9 = vsub.f32 %v5957_v34, %v5958_v15  ;;  %v1268_v47 = vadd.f32 %v5960_v7, %v1196_v4 }
 0x223   : > { %v791_v3 = vsel %vm790_vm0, %v788_v61, %v5955_v20  ;;  %v4931_v49 = vmul.f32 %v3953_v25, %v1618_v60  ;;  %v813_v26 = vrot.slane %v756_v45, 7  ;;  %v5961_v61 = vsub.f32 %v4766_v48, %v4801_v32 }
 0x224   : > { %v1260_v28 = vadd.f32 %v5959_v9, %v1188_v13  ;;  %v4939_v30 = vadd.f32 %v4832_v19, %v1339_v42  ;;  %v4942_v56 = vmul.f32 %v3944_v1, %v1618_v60  ;;  %v1374_v17 = vrot.slane %v756_v45, 1 }
 0x225   : > { %v4936_v59 = vadd.f32 %v5961_v61, %v1331_v62  ;;  %v841_v43 = vmul.f32 %v3907_v10, %v805_v22  ;;  %v842_v5 = vmul.f32 %v3907_v10, %v791_v3  ;;  %v877_v40 = vmul.f32 %v3910_v41, %v805_v22 }
 0x226   : > { %v878_v14 = vmul.f32 %v3910_v41, %v791_v3  ;;  %v5962_v13 = vrot.slane %v4654_v12, 1  ;;  %v5963_v32 = vrot.slane %v4448_v52, 7  ;;  %v4957_v62 = vmul.f32 %v3884_v8, %v756_v45 }
 0x227   : > { %v732_v42 = vsel %vm685_vm15, %v723_v33, 0.0  ;;  %v5964_v60 = vrot.slane %v4415_v6, 1  ;;  %v5965_v12 = vrot.slane %v4699_v58, 7  ;;  %v1165_v34 = vmul.f32 %v3881_v54, %v756_v45 }
 0x228   : > { %v1353_v48 = vsel %vm1351_vm4, %v5962_v13, %v1349_v31  ;;  %v815_v19 = vsel %vm790_vm0, %v813_v26, %v5963_v32  ;;  %v5966_v15 = vrot.slane %v4448_v52, 1  ;;  %v4982_v7 = vadd.f32 %v1300_v55, %v1260_v28 }
 0x229   : > { %v1352_v4 = vsel %vm1351_vm4, %v1349_v31, %v5964_v60  ;;  %v816_v20 = vsel %vm790_vm0, %v5965_v12, %v813_v26  ;;  %v854_v3 = vmul.f32 %v3910_v41, %v815_v19  ;;  %v870_v22 = vmul.f32 %v3907_v10, %v815_v19  ;;  %v5996_v26 = vld [vmem:[#allocation30_spill] sm:$0xff] }
 0x22a   : > { %v829_v8 = vsel %vm3447_vm9, %v816_v20, 0.0  ;;  %v1376_v6 = vsel %vm1351_vm4, %v1374_v17, %v5966_v15  ;;  %v5967_v31 = vrot.slane %v4699_v58, 1  ;;  %v1365_v33 = vsel %vm3604_vm11, %v1353_v48, 0.0  ;;  %v771_v20 = vpop.permute.xlu1 %770 }
 0x22b   : > { %v853_v61 = vmul.f32 %v3910_v41, %v829_v8  ;;  %v869_v13 = vmul.f32 %v3907_v10, %v829_v8  ;;  %v862_v54 = vsub.f32 %v842_v5, %v854_v3  ;;  %v886_v45 = vadd.f32 %v878_v14, %v870_v22  ;;  %v5973_v8 = vld [vmem:[#allocation63_spill] sm:$0xff] }
 0x22c   : > { %v1377_v9 = vsel %vm1351_vm4, %v5967_v31, %v1374_v17  ;;  %v1013_v32 = vrot.slane %v732_v42, 7  ;;  %v4991_v58 = vmul.f32 %v3926_v24, %v1352_v4  ;;  %v1438_v17 = vmul.f32 %v3930_v18, %v1352_v4 }
 0x22d   : > { %v1389_v52 = vsel %vm3604_vm11, %v1377_v9, 0.0  ;;  %v4995_v55 = vmul.f32 %v3930_v18, %v1376_v6  ;;  %v1430_v28 = vmul.f32 %v3926_v24, %v1376_v6  ;;  %v4998_v48 = vadd.f32 %v1324_v29, %v1268_v47  ;;  %v5970_v29 = vld [vmem:[#allocation58_spill] sm:$0xff]  ;;  %v5971_v47 = vld [vmem:[#allocation60_spill] sm:$0xff] }
 0x22e   : > { %v5001_v10 = vmul.f32 %v3926_v24, %v1365_v33  ;;  %v1437_v41 = vmul.f32 %v3930_v18, %v1365_v33  ;;  %v861_v5 = vsub.f32 %v841_v43, %v853_v61  ;;  %v885_v14 = vadd.f32 %v877_v40, %v869_v13  ;;  %v5975_v9 = vld [vmem:[#allocation56_spill] sm:$0xff]  ;;  %v5976_v33 = vld [vmem:[#allocation59_spill] sm:$0xff] }
 0x22f   : > { %v1157_v19 = vsub.f32 %v4915_v53, %v4957_v62  ;;  %v1429_v60 = vmul.f32 %v3926_v24, %v1389_v52  ;;  %v5969_v4 = vrot.slane %v4820_v44, 7  ;;  %v5972_v3 = vsub.f32 %v5970_v29, %v5971_v47 }
 0x230   : > { %v1006_v15 = vadd.f32 %v5973_v8, %v886_v45  ;;  %v1181_v6 = vadd.f32 %v1173_v36, %v1165_v34  ;;  %v5974_v43 = vrot.slane %v4349_v0, 7  ;;  %v5020_v24 = vmul.f32 %v3930_v18, %v1389_v52 }
 0x231   : > { %v1016_v12 = vsel %vm790_vm0, %v5969_v4, %v1013_v32  ;;  %v998_v22 = vadd.f32 %v5972_v3, %v862_v54  ;;  %v1422_v40 = vsub.f32 %v4991_v58, %v4995_v55  ;;  %v5024_v62 = vadd.f32 %v1438_v17, %v1430_v28  ;;  %v5978_v54 = vld [vmem:[#allocation62_spill] sm:$0xff] }
 0x232   : > { %v1015_v53 = vsel %vm790_vm0, %v1013_v32, %v5974_v43  ;;  %v1029_v31 = vsel %vm3447_vm9, %v1016_v12, 0.0  ;;  %v5977_v61 = vsub.f32 %v5975_v9, %v5976_v33  ;;  %v1590_v34 = vrot.slane %v732_v42, 1 }
 0x233   : > { %v780_v13 = vsel %vm685_vm15, %v771_v20, 0.0  ;;  %v1005_v45 = vadd.f32 %v5978_v54, %v885_v14  ;;  %v1445_v18 = vadd.f32 %v1437_v41, %v1429_v60  ;;  %v1066_v52 = vmul.f32 %v3961_v38, %v1015_v53  ;;  %v5984_v54 = vld [vmem:[#allocation18_spill] sm:$0xff] }
 0x234   : > { %v997_v36 = vadd.f32 %v5977_v61, %v861_v5  ;;  %v1037_v32 = vrot.slane %v780_v13, 7  ;;  %v2755_v4 = vmov 0   ;;  %v1065_v17 = vmul.f32 %v3961_v38, %v1029_v31 }
 0x235   : > { %1937 = vmatprep.mubr.bf16.mxu1 %v2755_v4  ;;  %v1101_v28 = vmul.f32 %v3964_v51, %v1029_v31  ;;  %v5979_v12 = vrot.slane %v4820_v44, 1  ;;  %v1263_v20 = vadd.f32 %v5980_v35, %v4677_v63  ;;  %v1102_v41 = vmul.f32 %v3964_v51, %v1015_v53 }
 0x236   : > { %v5046_v14 = vmul.f32 %v3899_v21, %v732_v42  ;;  %v5981_v60 = vrot.slane %v4486_v2, 7  ;;  %v1614_v47 = vrot.slane %v780_v13, 1  ;;  %v1317_v3 = vmul.f32 %v3903_v37, %v732_v42 }
 0x237   : > { %v1593_v5 = vsel %vm1351_vm4, %v5979_v12, %v1590_v34  ;;  %v5982_v44 = vrot.slane %v4349_v0, 1  ;;  %v5983_v63 = vrot.slane %v4828_v27, 7  ;;  %v1309_v0 = vmul.f32 %v3899_v21, %v780_v13 }
 0x238   : > { %v1039_v29 = vsel %vm790_vm0, %v1037_v32, %v5981_v60  ;;  %v5064_v31 = vsel %vm3604_vm11, %v1593_v5, 0.0  ;;  %v1293_v5 = vmul.f32 %v3903_v37, %v780_v13  ;;  %v1617_v46 = vsel %vm1351_vm4, %v1613_v16, %v1614_v47  ;;  %v5987_v13 = vld [vmem:[#allocation84_spill] sm:$0xff] }
 0x239   : > { %v1592_v8 = vsel %vm1351_vm4, %v1590_v34, %v5982_v44  ;;  %v1040_v43 = vsel %vm790_vm0, %v5983_v63, %v1037_v32  ;;  %v1078_v53 = vmul.f32 %v3964_v51, %v1039_v29  ;;  %v1094_v42 = vmul.f32 %v3961_v38, %v1039_v29  ;;  %v5985_v32 = vld [vmem:[#allocation16_spill] sm:$0xff] }
 0x23a   : > { %v1053_v9 = vsel %vm3447_vm9, %v1040_v43, 0.0  ;;  %v1457_v12 = vadd.f32 %v5985_v32, %v5984_v54  ;;  %v1678_v35 = vmul.f32 %v3953_v25, %v1592_v8  ;;  %v1677_v21 = vmul.f32 %v3953_v25, %v5064_v31  ;;  %v5988_v16 = vld [vmem:[#allocation32_spill] sm:$0xff]  ;;  %v5999_v32 = vld [vmem:[#allocation2_spill] sm:$0xff] }
 0x23b   : > { %v1077_v33 = vmul.f32 %v3964_v51, %v1053_v9  ;;  %v1086_v61 = vsub.f32 %v1066_v52, %v1078_v53  ;;  %v1093_v34 = vmul.f32 %v3961_v38, %v1053_v9  ;;  %v1110_v60 = vadd.f32 %v1102_v41, %v1094_v42  ;;  %v5989_v53 = vld [vmem:[#allocation33_spill] sm:$0xff] }
 0x23c   : > { %v1325_v38 = vadd.f32 %v1317_v3, %v1309_v0  ;;  %v5986_v44 = vrot.slane %v4486_v2, 1  ;;  %v1629_v37 = vsel %vm3604_vm11, %v1617_v46, 0.0  ;;  %v1335_v27 = vadd.f32 %v5987_v13, %v1263_v20  ;;  %v5992_v3 = vld [vmem:[#allocation25_spill] sm:$0xff]  ;;  %v5993_v0 = vld [vmem:[#allocation87_spill] sm:$0xff] }
 0x23d   : > { %v1085_v51 = vsub.f32 %v1065_v17, %v1077_v33  ;;  %v1109_v52 = vadd.f32 %v1101_v28, %v1093_v34  ;;  %v1118_v29 = vadd.f32 %v1086_v61, %v998_v22  ;;  %v5990_v9 = vsub.f32 %v5988_v16, %v5989_v53  ;;  %v5991_v17 = vld [vmem:[#allocation14_spill] sm:$0xff]  ;;  %v5995_v33 = vld [vmem:[#allocation11_spill] sm:$0xff]  ;;  %v6005_v16 = vld [vmem:[#allocation41_spill] sm:$0xff] }
 0x23e   : > { %v1616_v63 = vsel %vm1351_vm4, %v1614_v47, %v5986_v44  ;;  %v1577_v22 = vadd.f32 %v5991_v17, %v1457_v12  ;;  %v1126_v28 = vadd.f32 %v1110_v60, %v1006_v15  ;;  %v1456_v2 = vadd.f32 %v5992_v3, %v1335_v27  ;;  %v6000_v46 = vld [vmem:[#allocation7_spill] sm:$0xff]  ;;  %v6002_v15 = vld [vmem:[#allocation20_spill] sm:$0xff]  ;;  %v6003_v60 = vld [vmem:[#allocation46_spill] sm:$0xff] }
 0x23f   : > { %v1117_v41 = vadd.f32 %v1085_v51, %v997_v36  ;;  %v1125_v43 = vadd.f32 %v1109_v52, %v1005_v45  ;;  %v5092_v42 = vadd.f32 %v5990_v9, %v1118_v29  ;;  %v1680_v47 = vadd.f32 %v5994_v57, %v5993_v0  ;;  %v5997_v36 = vld [vmem:[#allocation17_spill] sm:$0xff]  ;;  %v5998_v45 = vld [vmem:[#allocation34_spill] sm:$0xff]  ;;  %v6001_v52 = vld [vmem:[#allocation12_spill] sm:$0xff] }
 0x240   : > { %v1681_v61 = vadd.f32 %v5996_v26, %v5995_v33  ;;  %v1458_v54 = vadd.f32 %v5998_v45, %v5997_v36  ;;  %v1459_v51 = vadd.f32 %v6000_v46, %v5999_v32  ;;  %v1576_v29 = vadd.f32 %v6001_v52, %v1456_v2  ;;  %v6004_v13 = vld [vmem:[#allocation47_spill] sm:$0xff]  ;;  %v6006_v53 = vld [vmem:[#allocation42_spill] sm:$0xff]  ;;  %v6009_v9 = vld [vmem:[#allocation13_spill] sm:$0xff] }
 0x241   : > { %v1189_v34 = vadd.f32 %v1157_v19, %v1117_v41  ;;  %v1197_v20 = vadd.f32 %v1181_v6, %v1125_v43  ;;  %v1682_v44 = vadd.f32 %v6003_v60, %v6002_v15  ;;  %v1683_v27 = vadd.f32 %v6004_v13, %v4893_v39  ;;  %v6008_v41 = vld [vmem:[#allocation61_spill] sm:$0xff]  ;;  %v6010_v3 = vld [vmem:[#allocation39_spill] sm:$0xff] }
 0x242   : > { %v5105_v12 = vadd.f32 %v1681_v61, %v1577_v22  ;;  %v6007_v19 = vsub.f32 %v6005_v16, %v6006_v53  ;;  %v1578_v17 = vadd.f32 %v6009_v9, %v1458_v54  ;;  %v1579_v0 = vadd.f32 %v6010_v3, %v1459_v51  ;;  %v6011_v26 = vld [vmem:[#allocation93_spill] sm:$0xff]  ;;  %v6012_v54 = vld [vmem:[#allocation66_spill] sm:$0xff]  ;;  %v6013_v51 = vld [vmem:[#allocation67_spill] sm:$0xff] }
 0x243   : > { %v1269_v43 = vadd.f32 %v6008_v41, %v1197_v20  ;;  %v1669_v2 = vmul.f32 %v3944_v1, %v1629_v37  ;;  %v5118_v22 = vadd.f32 %v1680_v47, %v1576_v29  ;;  %v1461_v33 = vadd.f32 %v1445_v18, %v4998_v48  ;;  %v6014_v15 = vld [vmem:[#allocation45_spill] sm:$0xff] }
 0x244   : > { %v1261_v6 = vadd.f32 %v6007_v19, %v1189_v34  ;;  %v1758_v57 = vmul.f32 1.442695, %v5105_v12  ;;  %v1198_v39 = vadd.f32 %v6011_v26, %v1126_v28  ;;  %v5123_v36 = vadd.f32 %v1682_v44, %v1578_v17  ;;  %v6018_v44 = vld [vmem:[#allocation83_spill] sm:$0xff]  ;;  %v6020_v19 = vld [vmem:[#allocation96_spill] sm:$0xff]  ;;  %v6022_v41 = vld [vmem:[#allocation65_spill] sm:$0xff] }
 0x245   : > { %v1341_v61 = vadd.f32 %v1325_v38, %v1269_v43  ;;  %v5125_v34 = vadd.f32 %v1683_v27, %v1579_v0  ;;  %v1670_v20 = vmul.f32 %v3944_v1, %v1616_v63  ;;  %v1756_v45 = vmul.f32 1.442695, %v5118_v22 }
 0x246   : > { %2665 = vpow2.f32 %v1758_v57  ;;  %v1580_v47 = vadd.f32 %v6012_v54, %v4939_v30  ;;  %v1421_v32 = vsub.f32 %v5001_v10, %v5020_v24  ;;  %v5134_v48 = vmul.f32 %v3944_v1, %v1592_v8  ;;  %v6015_v24 = vld [vmem:[#allocation70_spill] sm:$0xff]  ;;  %v6032_v54 = vld [vmem:[#allocation4_spill] sm:$0xff] }
 0x247   : > { %v1301_v18 = vsub.f32 %v5046_v14, %v1293_v5  ;;  %v1462_v38 = vadd.f32 %v5024_v62, %v1341_v61  ;;  %2667 = vpow2.f32 %v1756_v45  ;;  %v1760_v28 = vmul.f32 1.442695, %v5123_v36  ;;  %v6016_v5 = vld [vmem:[#allocation49_spill] sm:$0xff]  ;;  %v6026_v57 = vld [vmem:[#allocation86_spill] sm:$0xff]  ;;  %v6030_v61 = vld [vmem:[#allocation27_spill] sm:$0xff] }
 0x248   : > { %v1762_v46 = vmul.f32 1.442695, %v5125_v34  ;;  %v1581_v52 = vadd.f32 %v6013_v51, %v1461_v33  ;;  %v1684_v30 = vadd.f32 %v4900_v11, %v4942_v56  ;;  %v1685_v29 = vadd.f32 %v1677_v21, %v1669_v2  ;;  %v6017_v62 = vld [vmem:[#allocation85_spill] sm:$0xff]  ;;  %v6025_v2 = vld [vmem:[#allocation24_spill] sm:$0xff] }
 0x249   : > { %v1270_v10 = vadd.f32 %v6014_v15, %v1198_v39  ;;  %v1582_v8 = vadd.f32 %v6015_v24, %v1462_v38  ;;  %v1333_v60 = vadd.f32 %v1301_v18, %v1261_v6  ;;  %2669 = vpow2.f32 %v1760_v28  ;;  %v6021_v6 = vld [vmem:[#allocation64_spill] sm:$0xff]  ;;  %v6029_v39 = vld [vmem:[#allocation19_spill] sm:$0xff]  ;;  %v6034_v18 = vld [vmem:[#allocation6_spill] sm:$0xff] }
 0x24a   : > { %v1686_v14 = vadd.f32 %v1678_v35, %v1670_v20  ;;  %v6019_v13 = vsub.f32 %v6017_v62, %v6018_v44  ;;  %2671 = vpow2.f32 %v1762_v46  ;;  %v5149_v16 = vadd.f32 %v1684_v30, %v1580_v47  ;;  %v6033_v47 = vld [vmem:[#allocation9_spill] sm:$0xff]  ;;  %v6037_v30 = vld [vmem:[#allocation8_spill] sm:$0xff] }
 0x24b   : > { %v5151_v53 = vadd.f32 %v1685_v29, %v1581_v52  ;;  %v1342_v11 = vadd.f32 %v6020_v19, %v1270_v10  ;;  %v5156_v56 = vmul.f32 %v3944_v1, %v5064_v31  ;;  %v5159_v21 = vmul.f32 %v3953_v25, %v1616_v63  ;;  %v6024_v1 = vld [vmem:[#allocation22_spill] sm:$0xff]  ;;  %v6036_v51 = vld [vmem:[#allocation73_spill] sm:$0xff]  ;;  %v6038_v29 = vld [vmem:[#allocation91_spill] sm:$0xff] }
 0x24c   : > { %v1448_v27 = vadd.f32 %v6019_v13, %v6016_v5  ;;  %v5161_v35 = vadd.f32 %v1686_v14, %v1582_v8  ;;  %v6023_v43 = vsub.f32 %v6021_v6, %v6022_v41  ;;  %v5167_v17 = vmul.f32 %v3953_v25, %v1629_v37  ;;  %v6028_v37 = vld [vmem:[#allocation21_spill] sm:$0xff]  ;;  %v6040_v10 = vld [vmem:[#allocation71_spill] sm:$0xff]  ;;  %v6043_v14 = vld [vmem:[#allocation72_spill] sm:$0xff] }
 0x24d   : > { %vm1749_vm0 = vcmp.gt.f32.partialorder %v5105_v12, 0.0  ;;  %v1764_v3 = vmul.f32 1.442695, %v5149_v16  ;;  %v1766_v0 = vmul.f32 1.442695, %v5151_v53  ;;  %vm1748_vm4 = vcmp.gt.f32.partialorder %v5118_v22, 0.0 }
 0x24e   : > { %v1568_v9 = vadd.f32 %v6023_v43, %v1448_v27  ;;  %v1463_v31 = vadd.f32 %v6024_v1, %v1342_v11  ;;  %v1768_v63 = vmul.f32 1.442695, %v5161_v35  ;;  %v6027_v33 = vsub.f32 %v6025_v2, %v6026_v57  ;;  %v6045_v27 = vld [vmem:[#allocation35_spill] sm:$0xff]  ;;  %v6047_v6 = vld [vmem:[#allocation82_spill] sm:$0xff] }
 0x24f   : > { %v1454_v25 = vadd.f32 %v1422_v40, %v1333_v60  ;;  %2673 = vpow2.f32 %v1764_v3  ;;  %v6031_v20 = vsub.f32 %v6029_v39, %v6030_v61  ;;  %v6035_v38 = vsub.f32 %v6033_v47, %v6034_v18  ;;  %v6039_v40 = vld [vmem:[#allocation68_spill] sm:$0xff]  ;;  %v6042_v60 = vld [vmem:[#allocation69_spill] sm:$0xff]  ;;  %v6046_v19 = vld [vmem:[#allocation23_spill] sm:$0xff] }
 0x250   : > { %v5178_v26 = vadd.f32 %v6027_v33, %v1568_v9  ;;  %v2666_v46 = vpop.eup %2665  ;;  %2675 = vpow2.f32 %v1766_v0  ;;  %v1583_v52 = vadd.f32 %v6036_v51, %v1463_v31  ;;  %v1687_v15 = vadd.f32 %v6038_v29, %v6037_v30  ;;  %v6048_v3 = vld [vmem:[#allocation74_spill] sm:$0xff]  ;;  %v6049_v0 = vld [vmem:[#allocation76_spill] sm:$0xff]  ;;  %v6051_v39 = vld [vmem:[#allocation75_spill] sm:$0xff] }
 0x251   : > { %v1450_v45 = vadd.f32 %v6031_v20, %v6028_v37  ;;  %v1451_v28 = vadd.f32 %v6035_v38, %v6032_v54  ;;  %v2417_v55 = vadd.f32 -1.0, %v2666_v46  ;;  %2677 = vpow2.f32 %v1768_v63  ;;  %v2668_v44 = vpop.eup %2667  ;;  %v2607_v37 = vld [vmem:[%s5511_s1 + $0x100] ss:$8 sps:$4 sm:$0xff]   ;;  %v6052_v61 = vld [vmem:[#allocation77_spill] sm:$0xff] }
 0x252   : > { %v1712_v58 = vmul.f32 1.442695, %v5178_v26  ;;  %v6041_v24 = vsub.f32 %v6039_v40, %v6040_v10  ;;  %v6044_v5 = vsub.f32 %v6042_v60, %v6043_v14  ;;  %v5201_v13 = vadd.f32 %v1687_v15, %v1583_v52  ;;  %v2612_v47 = vld [vmem:[%s5511_s1 + $0x114] ss:$8 sps:$4 sm:$0xff]  }
 0x253   : > { %v1658_v11 = vsub.f32 %v6046_v19, %v6045_v27  ;;  %v1659_v41 = vsub.f32 %v6047_v6, %v4890_v50  ;;  %v2416_v43 = vadd.f32 -1.0, %v2668_v44  ;;  %vm1750_vm6 = vcmp.gt.f32.partialorder %v5123_v36, 0.0  ;;  %v2670_v63 = vpop.eup %2669  ;;  %v6062_v27 = vld [vmem:[#allocation89_spill] sm:$0xff] }
 0x254   : > { %v1570_v8 = vadd.f32 %v6041_v24, %v1450_v45  ;;  %v1571_v62 = vadd.f32 %v6044_v5, %v1451_v28  ;;  %2679 = vpow2.f32 %v1712_v58  ;;  %v1453_v9 = vadd.f32 %v1421_v32, %v4982_v7  ;;  %v2672_v50 = vpop.eup %2671  ;;  %v2610_v58 = vld [vmem:[%s5511_s1 + $0x110] ss:$8 sps:$4 sm:$0xff]  }
 0x255   : > { %v6050_v1 = vsub.f32 %v6048_v3, %v6049_v0  ;;  %vm1751_vm12 = vcmp.gt.f32.partialorder %v5125_v34, 0.0  ;;  %v1770_v2 = vmul.f32 1.442695, %v5201_v13  ;;  %v1780_v7 = vsel %vm1748_vm4, %v5118_v22, %v2416_v43  ;;  %v2613_v0 = vld [vmem:[%s5511_s1 + $0x120] ss:$8 sps:$4 sm:$0xff]  }
 0x256   : > { %v5215_v57 = vadd.f32 %v1658_v11, %v1570_v8  ;;  %v5217_v33 = vadd.f32 %v1659_v41, %v1571_v62  ;;  %v2418_v32 = vadd.f32 -1.0, %v2670_v63  ;;  %v6053_v20 = vsub.f32 %v6051_v39, %v6052_v61  ;;  %v6065_v63 = vld [vmem:[#allocation92_spill] sm:$0xff] }
 0x257   : > { %v1572_v31 = vadd.f32 %v6050_v1, %v4936_v59  ;;  %v1781_v59 = vsel %vm1749_vm0, %v5105_v12, %v2417_v55  ;;  %v2419_v18 = vadd.f32 -1.0, %v2672_v50  ;;  %2681 = vpow2.f32 %v1770_v2  ;;  %v6054_v12 = vld [vmem:[#allocation29_spill] sm:$0xff]  ;;  %v6066_v2 = vld [vmem:[#allocation94_spill] sm:$0xff] }
 0x258   : > { %v1573_v45 = vadd.f32 %v6053_v20, %v1453_v9  ;;  %v1788_v54 = vpack.c.bf16 %v1781_v59, %v1780_v7  ;;  %v1660_v38 = vsub.f32 %v4896_v23, %v4931_v49  ;;  %v1782_v22 = vsel %vm1750_vm6, %v5123_v36, %v2418_v32  ;;  %v6055_v23 = vld [vmem:[#allocation43_spill] sm:$0xff]  ;;  %v6056_v49 = vld [vmem:[#allocation44_spill] sm:$0xff]  ;;  %v6069_v32 = vld [vmem:[#allocation81_spill] sm:$0xff] }
 0x259   : > { %vm1705_vm1 = vcmp.gt.f32.partialorder %v6054_v12, 0.0  ;;  %v1716_v28 = vmul.f32 1.442695, %v5215_v57  ;;  %v1718_v46 = vmul.f32 1.442695, %v5217_v33  ;;  %v1783_v51 = vsel %vm1751_vm12, %v5125_v34, %v2419_v18  ;;  %v2674_v15 = vpop.eup %2673  ;;  %v6058_v34 = vld [vmem:[#allocation88_spill] sm:$0xff] }
 0x25a   : > { %1938 = vmatmul.mubr.bf16.vlgmr.msra.gmra.mrb[0].mxu1 %v1788_v54  ;;  %v1661_v52 = vsub.f32 %v5156_v56, %v5167_v17  ;;  %v5247_v30 = vadd.f32 %v1660_v38, %v1572_v31  ;;  %v6057_v36 = vsub.f32 %v6055_v23, %v6056_v49  ;;  %v1789_v55 = vpack.c.bf16 %v1783_v51, %v1782_v22  ;;  %v6059_v56 = vld [vmem:[#allocation78_spill] sm:$0xff]  ;;  %v6060_v17 = vld [vmem:[#allocation80_spill] sm:$0xff]  ;;  %v2676_v8 = vpop.eup %2675  ;;  %v6068_v59 = vld [vmem:[#allocation79_spill] sm:$0xff] }
 0x25b   : > { %2059 = vmatpush1.bf16.msra.mxu1 %v2607_v37  ;;  %1947 = vmatprep.mubr.bf16.mxu1 %v2755_v4  ;;  %v2409_v40 = vadd.f32 -1.0, %v6058_v34  ;;  %2683 = vpow2.f32 %v1716_v28  ;;  %v6061_v10 = vsub.f32 %v6059_v56, %v6060_v17  ;;  %vm1752_vm2 = vcmp.gt.f32.partialorder %v5149_v16, 0.0  ;;  %v2678_v5 = vpop.eup %2677  ;;  %v6071_v20 = vld [vmem:[#allocation37_spill] sm:$0xff] }
 0x25c   : > { %v1262_v29 = vadd.f32 %v6057_v36, %v5092_v42  ;;  %2060 = vmatprep.subr.bf16.mxu1 %v2612_v47  ;;  %v2615_v42 = vld [vmem:[%s5511_s1 + $0x124] ss:$8 sps:$4 sm:$0xff]   ;;  %v2420_v60 = vadd.f32 -1.0, %v2674_v15  ;;  %2685 = vpow2.f32 %v1718_v46  ;;  %v5265_v14 = vadd.f32 %v1661_v52, %v1573_v45  ;;  %v2616_v38 = vld [vmem:[%s5511_s1 + $0x130] ss:$8 sps:$4 sm:$0xff]  }
 0x25d   : > { %v1574_v24 = vadd.f32 %v6061_v10, %v1454_v25  ;;  %vm1753_vm3 = vcmp.gt.f32.partialorder %v5151_v53, 0.0  ;;  %v2421_v62 = vadd.f32 -1.0, %v2676_v8  ;;  %v1720_v44 = vmul.f32 1.442695, %v5247_v30  ;;  %v6063_v25 = vld [vmem:[#allocation95_spill] sm:$0xff]  ;;  %v6072_v45 = vld [vmem:[#allocation90_spill] sm:$0xff] }
 0x25e   : > { %v6064_v19 = vsub.f32 %v6062_v27, %v6063_v25  ;;  %v2680_v6 = vpop.eup %2679  ;;  %v1784_v41 = vsel %vm1752_vm2, %v5149_v16, %v2420_v60  ;;  %v2422_v43 = vadd.f32 -1.0, %v2678_v5  ;;  %v1722_v9 = vmul.f32 1.442695, %v5265_v14  ;;  %v2618_v16 = vld [vmem:[%s5511_s1 + $0x134] ss:$8 sps:$4 sm:$0xff]  }
 0x25f   : > { %v1662_v3 = vsub.f32 %v5134_v48, %v5159_v21  ;;  %2061 = vmatpush1.bf16.msra.mxu1 %v2610_v58  ;;  %v1785_v1 = vsel %vm1753_vm3, %v5151_v53, %v2421_v62  ;;  %v2408_v31 = vadd.f32 -1.0, %v2680_v6  ;;  %2687 = vpow2.f32 %v1720_v44  ;;  %v2621_v46 = vld [vmem:[%s5511_s1 + $0x144] ss:$8 sps:$4 sm:$0xff]   ;;  %v2624_v58 = vld [vmem:[%s5511_s1 + $0x154] ss:$8 sps:$4 sm:$0xff]  }
 0x260   : > { %v1334_v11 = vadd.f32 %v6064_v19, %v1262_v29  ;;  %v6067_v50 = vsub.f32 %v6065_v63, %v6066_v2  ;;  %2062 = vmatprep.subr.bf16.mxu1 %v2615_v42  ;;  %v1790_v7 = vpack.c.bf16 %v1785_v1, %v1784_v41  ;;  %vm1704_vm5 = vcmp.gt.f32.partialorder %v5178_v26, 0.0  ;;  %v2622_v10 = vld [vmem:[%s5511_s1 + $0x150] ss:$8 sps:$4 sm:$0xff]   ;;  %v2627_v8 = vld [vmem:[%s5511_s1 + $0x164] ss:$8 sps:$4 sm:$0xff]  }
 0x261   : > { %2689 = vpow2.f32 %v1722_v9  ;;  %v5287_v48 = vadd.f32 %v1662_v3, %v1574_v24  ;;  %v5290_v21 = vsel %vm1704_vm5, %v5178_v26, %v2408_v31  ;;  %v5295_v53 = vsel %vm1705_vm1, %v6054_v12, %v2409_v40  ;;  %v2682_v47 = vpop.eup %2681  ;;  %v2625_v5 = vld [vmem:[%s5511_s1 + $0x160] ss:$8 sps:$4 sm:$0xff]   ;;  %v2630_v44 = vld [vmem:[%s5511_s1 + $0x174] ss:$8 sps:$4 sm:$0xff]   ;;  %v2628_v25 = vld [vmem:[%s5511_s1 + $0x170] ss:$8 sps:$4 sm:$0xff]  }
 0x262   : > { %v1455_v37 = vadd.f32 %v6067_v50, %v1334_v11  ;;  %v6070_v39 = vsub.f32 %v6068_v59, %v6069_v32  ;;  %v1663_v54 = vsub.f32 %v6072_v45, %v6071_v20  ;;  %1948 = vmatmul.mubr.bf16.gmra.mrb[4].mxu1 %v1789_v55  ;;  %vm1754_vm7 = vcmp.gt.f32.partialorder %v5161_v35, 0.0  ;;  %v2727_v6 = vld [vmem:[%s5512_s2] sm:$0xff]  ;;  %v6073_v41 = vld [vmem:[#allocation3_spill] sm:$0xff] }
 0x263   : > { %v1744_v26 = vpack.c.bf16 %v5295_v53, %v5290_v21  ;;  %v1724_v18 = vmul.f32 1.442695, %v5287_v48  ;;  %2063 = vmatpush1.bf16.msra.mxu1 %v2613_v0  ;;  %1957 = vmatprep.mubr.bf16.mxu1 %v2755_v4  ;;  %v2423_v22 = vadd.f32 -1.0, %v2682_v47  ;;  %v1786_v12 = vsel %vm1754_vm7, %v5161_v35, %v2422_v43  ;;  %v2619_v35 = vld [vmem:[%s5511_s1 + $0x140] ss:$8 sps:$4 sm:$0xff]  }
 0x264   : > { %v1575_v61 = vadd.f32 %v6070_v39, %v1455_v37  ;;  %2064 = vmatprep.subr.bf16.mxu1 %v2618_v16  ;;  %vm1755_vm8 = vcmp.gt.f32.partialorder %v5201_v13, 0.0  ;;  %vm1706_vm9 = vcmp.gt.f32.partialorder %v5215_v57, 0.0  ;;  %vm1707_vm10 = vcmp.gt.f32.partialorder %v5217_v33, 0.0  ;;  %v2728_v9 = vld [vmem:[%s5512_s2 + $0x8] sm:$0xff] }
 0x265   : > { %2691 = vpow2.f32 %v1724_v18  ;;  %v2684_v51 = vpop.eup %2683  ;;  %v1787_v52 = vsel %vm1755_vm8, %v5201_v13, %v2423_v22  ;;  %vm1708_vm11 = vcmp.gt.f32.partialorder %v5247_v30, 0.0  ;;  %vm1709_vm13 = vcmp.gt.f32.partialorder %v5265_v14, 0.0 }
 0x266   : > { %v1695_v28 = vadd.f32 %v1663_v54, %v1575_v61  ;;  %v2686_v49 = vpop.eup %2685  ;;  %v1791_v36 = vpack.c.bf16 %v1787_v52, %v1786_v12  ;;  %v2410_v29 = vadd.f32 -1.0, %v2684_v51  ;;  %vm1710_vm14 = vcmp.gt.f32.partialorder %v5287_v48, 0.0  ;;  %v6074_v12 = vld [vmem:[#allocation5_spill] sm:$0xff] }
 0x267   : > { %2065 = vmatpush1.bf16.msra.mxu1 %v2616_v38  ;;  %v2411_v15 = vadd.f32 -1.0, %v2686_v49  ;;  %v5356_v43 = vrot.slane %v2727_v6, %v6073_v41  ;;  %v5362_v3 = vrot.slane %v2728_v9, %v6073_v41  ;;  %v5388_v52 = vrot.slane %v2728_v9, %v6074_v12  ;;  %v2732_v9 = vld [vmem:[%s2825_s14 + $0x18] sm:$0xff] }
 0x268   : > { %v1726_v23 = vmul.f32 1.442695, %v1695_v28  ;;  %2066 = vmatprep.subr.bf16.mxu1 %v2621_v46  ;;  %v1738_v55 = vsel %vm1706_vm9, %v5215_v57, %v2410_v29  ;;  %vm1711_vm15 = vcmp.gt.f32.partialorder %v1695_v28, 0.0 }
 0x269   : > { %v2688_v13 = vpop.eup %2687  ;;  %v1739_v34 = vsel %vm1707_vm10, %v5217_v33, %v2411_v15 }
 0x26a   : > { %2693 = vpow2.f32 %v1726_v23  ;;  %1958 = vmatmul.mubr.bf16.gmra.mrb[8].mxu1 %v1790_v7  ;;  %v1745_v56 = vpack.c.bf16 %v1739_v34, %v1738_v55  ;;  %v2412_v17 = vadd.f32 -1.0, %v2688_v13 }
 0x26b   : > { %v2690_v40 = vpop.eup %2689  ;;  %2067 = vmatpush1.bf16.msra.mxu1 %v2619_v35  ;;  %1967 = vmatprep.mubr.bf16.mxu1 %v2755_v4 }
 0x26c   : > { %v2413_v24 = vadd.f32 -1.0, %v2690_v40  ;;  %2068 = vmatprep.subr.bf16.mxu1 %v2624_v58  ;;  %v1740_v57 = vsel %vm1708_vm11, %v5247_v30, %v2412_v17 }
 0x26e   : > { %v1741_v33 = vsel %vm1709_vm13, %v5265_v14, %v2413_v24 }
 0x26f   : > { %v2692_v42 = vpop.eup %2691  ;;  %v1746_v60 = vpack.c.bf16 %v1741_v33, %v1740_v57  ;;  %2069 = vmatpush1.bf16.msra.mxu1 %v2622_v10  ;;  %v2729_v33 = vld [vmem:[%s2825_s14] sm:$0xff] }
 0x270   : > { %v2414_v62 = vadd.f32 -1.0, %v2692_v42  ;;  %2070 = vmatprep.subr.bf16.mxu1 %v2627_v8 }
 0x272   : > { %1968 = vmatmul.mubr.bf16.gmra.mrb[12].mxu1 %v1791_v36  ;;  %v1742_v14 = vsel %vm1710_vm14, %v5287_v48, %v2414_v62 }
 0x273   : > { %2071 = vmatpush1.bf16.msra.mxu1 %v2625_v5  ;;  %2090 = vmatprep.mubr.bf16.mxu1 %v2755_v4 }
 0x274   : > { %v2694_v27 = vpop.eup %2693  ;;  %2072 = vmatprep.subr.bf16.mxu1 %v2630_v44  ;;  %v2730_v44 = vld [vmem:[%s2825_s14 + $0x8] sm:$0xff] }
 0x275   : > { %v2415_v30 = vadd.f32 -1.0, %v2694_v27 }
 0x277   : > { %v1743_v19 = vsel %vm1711_vm15, %v1695_v28, %v2415_v30  ;;  %2073 = vmatpush1.bf16.msra.mxu1 %v2628_v25  ;;  %v5385_v28 = vrot.slane %v2727_v6, %v6074_v12 }
 0x278   : > { %v1747_v11 = vpack.c.bf16 %v1743_v19, %v1742_v14  ;;  %v2731_v19 = vld [vmem:[%s2825_s14 + $0x10] sm:$0xff] }
 0x27a   : > { %2091 = vmatmul.mubr.bf16.vlgmr.msra.gmra.mrb[0].mxu1 %v1744_v26 }
 0x27b   : > { %2100 = vmatprep.mubr.bf16.mxu1 %v2755_v4 }
 0x282   : > { %2101 = vmatmul.mubr.bf16.gmra.mrb[4].mxu1 %v1745_v56 }
 0x283   : > { %2110 = vmatprep.mubr.bf16.mxu1 %v2755_v4 }
 0x28a   : > { %2111 = vmatmul.mubr.bf16.gmra.mrb[8].mxu1 %v1746_v60 }
 0x28b   : > { %2120 = vmatprep.mubr.bf16.mxu1 %v2755_v4 }
 0x292   : > { %2121 = vmatmul.mubr.bf16.gmra.mrb[12].mxu1 %v1747_v11 }
 0x34d   : > { %v2092_v0 = vpop.f32.mrb[0].mxu1 }
 0x34e   : > { %v2139_v1 = vadd.f32 %v5356_v43, %v2092_v0  ;;  %v2094_v31 = vpop.f32.mrb[1].mxu1 }
 0x34f   : > { %v2140_v4 = vadd.f32 %v5362_v3, %v2094_v31  ;;  %v2096_v63 = vpop.f32.mrb[2].mxu1 }
 0x350   : > { %v2171_v2 = vmul.f32 1.442695, %v2139_v1  ;;  %v2141_v50 = vadd.f32 %v5356_v43, %v2096_v63  ;;  %v2098_v37 = vpop.f32.mrb[3].mxu1  ;;  %vm2155_vm0 = vcmp.gt.f32.partialorder %v2139_v1, 0.0 }
 0x351   : > { %v2173_v16 = vmul.f32 1.442695, %v2140_v4  ;;  %v2142_v7 = vadd.f32 %v5362_v3, %v2098_v37  ;;  %vm2156_vm4 = vcmp.gt.f32.partialorder %v2140_v4, 0.0 }
 0x352   : > { %2695 = vpow2.f32 %v2171_v2  ;;  %v2175_v48 = vmul.f32 1.442695, %v2141_v50  ;;  %vm2157_vm6 = vcmp.gt.f32.partialorder %v2141_v50, 0.0 }
 0x353   : > { %2697 = vpow2.f32 %v2173_v16  ;;  %v2177_v21 = vmul.f32 1.442695, %v2142_v7  ;;  %vm2158_vm12 = vcmp.gt.f32.partialorder %v2142_v7, 0.0 }
 0x354   : > { %2699 = vpow2.f32 %v2175_v48 }
 0x355   : > { %2701 = vpow2.f32 %v2177_v21  ;;  %v2102_v53 = vpop.f32.mrb[4].mxu1 }
 0x356   : > { %v5369_v59 = vadd.f32 %v5356_v43, %v2102_v53  ;;  %v2104_v32 = vpop.f32.mrb[5].mxu1 }
 0x357   : > { %v5372_v39 = vadd.f32 %v5362_v3, %v2104_v32  ;;  %v2106_v61 = vpop.f32.mrb[6].mxu1 }
 0x358   : > { %v2179_v20 = vmul.f32 1.442695, %v5369_v59  ;;  %v5376_v45 = vadd.f32 %v5356_v43, %v2106_v61  ;;  %v2108_v54 = vpop.f32.mrb[7].mxu1  ;;  %vm2159_vm1 = vcmp.gt.f32.partialorder %v5369_v59, 0.0 }
 0x359   : > { %v2181_v47 = vmul.f32 1.442695, %v5372_v39  ;;  %v5380_v26 = vadd.f32 %v5362_v3, %v2108_v54  ;;  %vm2160_vm2 = vcmp.gt.f32.partialorder %v5372_v39, 0.0 }
 0x35a   : > { %2703 = vpow2.f32 %v2179_v20  ;;  %v2183_v18 = vmul.f32 1.442695, %v5376_v45  ;;  %vm2161_vm3 = vcmp.gt.f32.partialorder %v5376_v45, 0.0 }
 0x35b   : > { %2705 = vpow2.f32 %v2181_v47  ;;  %v2185_v38 = vmul.f32 1.442695, %v5380_v26  ;;  %vm2162_vm5 = vcmp.gt.f32.partialorder %v5380_v26, 0.0 }
 0x35c   : > { %v2696_v22 = vpop.eup %2695  ;;  %2707 = vpow2.f32 %v2183_v18 }
 0x35d   : > { %v2698_v46 = vpop.eup %2697  ;;  %v2488_v51 = vadd.f32 -1.0, %v2696_v22  ;;  %2709 = vpow2.f32 %v2185_v38  ;;  %v2112_v23 = vpop.f32.mrb[8].mxu1  ;;  %v2733_v22 = vld [vmem:[%s2825_s14 + $0x20] sm:$0xff] }
 0x35e   : > { %v2700_v49 = vpop.eup %2699  ;;  %v2489_v36 = vadd.f32 -1.0, %v2698_v46  ;;  %v5391_v29 = vadd.f32 %v5356_v43, %v2112_v23  ;;  %v2114_v35 = vpop.f32.mrb[9].mxu1 }
 0x35f   : > { %v2702_v15 = vpop.eup %2701  ;;  %v2219_v58 = vsel %vm2155_vm0, %v2139_v1, %v2488_v51  ;;  %v2490_v13 = vadd.f32 -1.0, %v2700_v49  ;;  %v5394_v55 = vadd.f32 %v5362_v3, %v2114_v35  ;;  %v2116_v34 = vpop.f32.mrb[10].mxu1  ;;  %v2734_v51 = vld [vmem:[%s2825_s14 + $0x28] sm:$0xff] }
 0x360   : > { %v2243_v40 = vmul.f32 %v5385_v28, %v2219_v58  ;;  %v2220_v56 = vsel %vm2156_vm4, %v2140_v4, %v2489_v36  ;;  %v2491_v17 = vadd.f32 -1.0, %v2702_v15  ;;  %v2118_v10 = vpop.f32.mrb[11].mxu1  ;;  %v2187_v57 = vmul.f32 1.442695, %v5391_v29  ;;  %v2735_v36 = vld [vmem:[%s2825_s14 + $0x30] sm:$0xff] }
 0x361   : > { %v2244_v24 = vmul.f32 %v5388_v52, %v2220_v56  ;;  %v2221_v8 = vsel %vm2157_vm6, %v2141_v50, %v2490_v13  ;;  %v2189_v62 = vmul.f32 1.442695, %v5394_v55  ;;  %v5412_v14 = vadd.f32 %v5356_v43, %v2116_v34 }
 0x362   : > { %v2259_v42 = vadd.f32 %v2729_v33, %v2243_v40  ;;  %v2245_v60 = vmul.f32 %v5385_v28, %v2221_v8  ;;  %v2222_v5 = vsel %vm2158_vm12, %v2142_v7, %v2491_v17  ;;  %2711 = vpow2.f32 %v2187_v57 }
 0x363   : > { %v2260_v27 = vadd.f32 %v2730_v44, %v2244_v24  ;;  %v2246_v30 = vmul.f32 %v5388_v52, %v2222_v5  ;;  %2713 = vpow2.f32 %v2189_v62  ;;  %v5418_v6 = vadd.f32 %v5362_v3, %v2118_v10  ;;  %v2737_v5 = vld [vmem:[%s2825_s14 + $0x40] sm:$0xff]  ;;  %v2738_v44 = vld [vmem:[%s2825_s14 + $0x48] sm:$0xff] }
 0x364   : > { %v2704_v25 = vpop.eup %2703  ;;  %2275 = vst [vmem:[%s5402_s22] sm:$0xff] %v2259_v42  ;;  %v2261_v11 = vadd.f32 %v2731_v19, %v2245_v60  ;;  %v2191_v31 = vmul.f32 1.442695, %v5412_v14  ;;  %vm2163_vm7 = vcmp.gt.f32.partialorder %v5391_v29, 0.0  ;;  %vm2164_vm8 = vcmp.gt.f32.partialorder %v5394_v55, 0.0 }
 0x365   : > { %v2706_v41 = vpop.eup %2705  ;;  %2276 = vst [vmem:[%s5402_s22 + $0x8] sm:$0xff] %v2260_v27  ;;  %v2262_v0 = vadd.f32 %v2732_v9, %v2246_v30  ;;  %v2492_v1 = vadd.f32 -1.0, %v2704_v25  ;;  %v2122_v4 = vpop.f32.mrb[12].mxu1  ;;  %v2193_v50 = vmul.f32 1.442695, %v5418_v6  ;;  %vm2165_vm9 = vcmp.gt.f32.partialorder %v5412_v14, 0.0 }
 0x366   : > { %v2708_v63 = vpop.eup %2707  ;;  %2277 = vst [vmem:[%s5402_s22 + $0x10] sm:$0xff] %v2261_v11  ;;  %v2493_v2 = vadd.f32 -1.0, %v2706_v41  ;;  %v5428_v37 = vadd.f32 %v5356_v43, %v2122_v4  ;;  %v2124_v16 = vpop.f32.mrb[13].mxu1  ;;  %2715 = vpow2.f32 %v2191_v31  ;;  %vm2166_vm10 = vcmp.gt.f32.partialorder %v5418_v6, 0.0 }
 0x367   : > { %v2710_v7 = vpop.eup %2709  ;;  %2278 = vst [vmem:[%s5402_s22 + $0x18] sm:$0xff] %v2262_v0  ;;  %v2223_v48 = vsel %vm2159_vm1, %v5369_v59, %v2492_v1  ;;  %v2494_v21 = vadd.f32 -1.0, %v2708_v63  ;;  %v5435_v53 = vadd.f32 %v5362_v3, %v2124_v16  ;;  %v2126_v32 = vpop.f32.mrb[14].mxu1  ;;  %2717 = vpow2.f32 %v2193_v50  ;;  %v2739_v0 = vld [vmem:[%s2825_s14 + $0x50] sm:$0xff] }
 0x368   : > { %v2247_v61 = vmul.f32 %v5385_v28, %v2223_v48  ;;  %v2224_v20 = vsel %vm2160_vm2, %v5372_v39, %v2493_v2  ;;  %v2495_v54 = vadd.f32 -1.0, %v2710_v7  ;;  %v2128_v47 = vpop.f32.mrb[15].mxu1  ;;  %v2195_v38 = vmul.f32 1.442695, %v5428_v37  ;;  %v2741_v7 = vld [vmem:[%s2825_s14 + $0x60] sm:$0xff] }
 0x369   : > { %v2248_v59 = vmul.f32 %v5388_v52, %v2224_v20  ;;  %v2225_v18 = vsel %vm2161_vm3, %v5376_v45, %v2494_v21  ;;  %v2197_v45 = vmul.f32 1.442695, %v5435_v53  ;;  %v5456_v15 = vadd.f32 %v5356_v43, %v2126_v32 }
 0x36a   : > { %v2263_v12 = vadd.f32 %v2733_v22, %v2247_v61  ;;  %v2249_v39 = vmul.f32 %v5385_v28, %v2225_v18  ;;  %v2226_v46 = vsel %vm2162_vm5, %v5380_v26, %v2495_v54  ;;  %2719 = vpow2.f32 %v2195_v38  ;;  %v2736_v26 = vld [vmem:[%s2825_s14 + $0x38] sm:$0xff]  ;;  %v2742_v61 = vld [vmem:[%s2825_s14 + $0x68] sm:$0xff]  ;;  %v2743_v18 = vld [vmem:[%s2825_s14 + $0x70] sm:$0xff] }
 0x36b   : > { %v2264_v23 = vadd.f32 %v2734_v51, %v2248_v59  ;;  %v2250_v49 = vmul.f32 %v5388_v52, %v2226_v46  ;;  %v5459_v58 = vadd.f32 %v5362_v3, %v2128_v47  ;;  %2721 = vpow2.f32 %v2197_v45  ;;  %v2744_v22 = vld [vmem:[%s2825_s14 + $0x78] sm:$0xff] }
 0x36c   : > { %2279 = vst [vmem:[%s5402_s22 + $0x20] sm:$0xff] %v2263_v12  ;;  %v2265_v35 = vadd.f32 %v2735_v36, %v2249_v39  ;;  %v2712_v13 = vpop.eup %2711  ;;  %v2199_v17 = vmul.f32 1.442695, %v5456_v15  ;;  %vm2167_vm11 = vcmp.gt.f32.partialorder %v5428_v37, 0.0  ;;  %vm2168_vm13 = vcmp.gt.f32.partialorder %v5435_v53, 0.0 }
 0x36d   : > { %2280 = vst [vmem:[%s5402_s22 + $0x28] sm:$0xff] %v2264_v23  ;;  %v2266_v34 = vadd.f32 %v2736_v26, %v2250_v49  ;;  %v2714_v40 = vpop.eup %2713  ;;  %v2496_v56 = vadd.f32 -1.0, %v2712_v13  ;;  %v2201_v43 = vmul.f32 1.442695, %v5459_v58  ;;  %vm2169_vm14 = vcmp.gt.f32.partialorder %v5456_v15, 0.0 }
 0x36e   : > { %2281 = vst [vmem:[%s5402_s22 + $0x30] sm:$0xff] %v2265_v35  ;;  %v2497_v10 = vadd.f32 -1.0, %v2714_v40  ;;  %2723 = vpow2.f32 %v2199_v17  ;;  %vm2170_vm15 = vcmp.gt.f32.partialorder %v5459_v58, 0.0 }
 0x36f   : > { %2282 = vst [vmem:[%s5402_s22 + $0x38] sm:$0xff] %v2266_v34  ;;  %v2227_v3 = vsel %vm2163_vm7, %v5391_v29, %v2496_v56  ;;  %2725 = vpow2.f32 %v2201_v43 }
 0x370   : > { %v2716_v24 = vpop.eup %2715  ;;  %v2251_v8 = vmul.f32 %v5385_v28, %v2227_v3  ;;  %v2228_v57 = vsel %vm2164_vm8, %v5394_v55, %v2497_v10 }
 0x371   : > { %v2718_v33 = vpop.eup %2717  ;;  %v2252_v42 = vmul.f32 %v5388_v52, %v2228_v57  ;;  %v2498_v60 = vadd.f32 -1.0, %v2716_v24 }
 0x372   : > { %v2267_v62 = vadd.f32 %v2737_v5, %v2251_v8  ;;  %v2499_v29 = vadd.f32 -1.0, %v2718_v33 }
 0x373   : > { %v2268_v27 = vadd.f32 %v2738_v44, %v2252_v42  ;;  %v2229_v30 = vsel %vm2165_vm9, %v5412_v14, %v2498_v60  ;;  %v2740_v14 = vld [vmem:[%s2825_s14 + $0x58] sm:$0xff] }
 0x374   : > { %v2720_v55 = vpop.eup %2719  ;;  %2283 = vst [vmem:[%s5402_s22 + $0x40] sm:$0xff] %v2267_v62  ;;  %v2253_v25 = vmul.f32 %v5385_v28, %v2229_v30  ;;  %v2230_v19 = vsel %vm2166_vm10, %v5418_v6, %v2499_v29 }
 0x375   : > { %2284 = vst [vmem:[%s5402_s22 + $0x48] sm:$0xff] %v2268_v27  ;;  %v2254_v11 = vmul.f32 %v5388_v52, %v2230_v19  ;;  %v2500_v41 = vadd.f32 -1.0, %v2720_v55  ;;  %v2722_v9 = vpop.eup %2721 }
 0x376   : > { %v2269_v1 = vadd.f32 %v2739_v0, %v2253_v25  ;;  %v2501_v63 = vadd.f32 -1.0, %v2722_v9 }
 0x377   : > { %v2270_v31 = vadd.f32 %v2740_v14, %v2254_v11  ;;  %v2231_v4 = vsel %vm2167_vm11, %v5428_v37, %v2500_v41 }
 0x378   : > { %2285 = vst [vmem:[%s5402_s22 + $0x50] sm:$0xff] %v2269_v1  ;;  %v2255_v6 = vmul.f32 %v5385_v28, %v2231_v4  ;;  %v2724_v2 = vpop.eup %2723  ;;  %v2232_v50 = vsel %vm2168_vm13, %v5435_v53, %v2501_v63 }
 0x379   : > { %2286 = vst [vmem:[%s5402_s22 + $0x58] sm:$0xff] %v2270_v31  ;;  %v2726_v16 = vpop.eup %2725  ;;  %v2256_v21 = vmul.f32 %v5388_v52, %v2232_v50  ;;  %v2502_v37 = vadd.f32 -1.0, %v2724_v2 }
 0x37a   : > { %v2271_v48 = vadd.f32 %v2741_v7, %v2255_v6  ;;  %v2503_v32 = vadd.f32 -1.0, %v2726_v16 }
 0x37b   : > { %v2272_v20 = vadd.f32 %v2742_v61, %v2256_v21  ;;  %v2233_v54 = vsel %vm2169_vm14, %v5456_v15, %v2502_v37 }
 0x37c   : > { %2287 = vst [vmem:[%s5402_s22 + $0x60] sm:$0xff] %v2271_v48  ;;  %v2257_v53 = vmul.f32 %v5385_v28, %v2233_v54  ;;  %v2234_v47 = vsel %vm2170_vm15, %v5459_v58, %v2503_v32 }
 0x37d   : > { %2288 = vst [vmem:[%s5402_s22 + $0x68] sm:$0xff] %v2272_v20  ;;  %v2258_v59 = vmul.f32 %v5388_v52, %v2234_v47 }
 0x37e   : > { %v2273_v38 = vadd.f32 %v2743_v18, %v2257_v53 }
 0x37f   : > { %v2274_v12 = vadd.f32 %v2744_v22, %v2258_v59 }
 0x380   : > { %2289 = vst [vmem:[%s5402_s22 + $0x70] sm:$0xff] %v2273_v38 }
 0x381   : > { %2290 = vst [vmem:[%s5402_s22 + $0x78] sm:$0xff] %v2274_v12 }
 0x382 PF: > { %s13_s12 = sadd.s32 1, %s2751_s12  }
 0x383   : > { %p10_p4 = scmp.ge.s32.totalorder %s13_s12, 4  }
 0x385   :  { %12 = sbr.rel (!%p10_p4) target bundleno = 1 (0x1), region = 63 }

</bundles_post_ra>
